<compile_context>
chip_gen: v7x
topology: tpu7x:2x2x1
jax: 0.10.0
libtpu: 0.0.40
codegen_flags: <defaults>
</compile_context>

<pallas_src>
import functools

import jax
import jax.numpy as jnp
from jax.experimental import pallas as pl
from jax.experimental.pallas import tpu as pltpu


def _fused_conv_kernel(x_ref, w_ref, b_ref, o_ref, *,
                       Nb, C_in, C_out, K, dilation, pad, TH, W,
                       res_coef, act_slope):
    """One (batch-block, H-tile) per grid step.

    x_ref: (Nb, C_in, 1, TH + 2*pad, W + 2*pad)  halo'd input tile (VMEM, W on lanes)
    w_ref: (K*K*C_in*C_out,)                     flat weights, [ky][kx][ci][co] (SMEM)
    b_ref: (C_out,)                              conv bias (SMEM)
    o_ref: (Nb, C_out, TH, W)                    output tile (VMEM)
    """
    for nb in range(Nb):
        # C_out independent f32 accumulators (toy shapes: ~2 vregs each).
        acc = [jnp.zeros((TH, W), jnp.float32) for _ in range(C_out)]

        # Statically unrolled taps: load the shifted patch once per (ci, ky, kx)
        # and broadcast-FMA it into every co accumulator on the VPU (no starved
        # 4x4 MXU pushes, no reshapes).
        for ci in range(C_in):
            for ky in range(K):
                oy = ky * dilation                       # sublane offset (cheap vld)
                for kx in range(K):
                    ox = kx * dilation                   # lane shift -> XLU, reused
                    patch = x_ref[nb, ci, 0, oy:oy + TH, ox:ox + W].astype(jnp.float32)
                    base = ((ky * K + kx) * C_in + ci) * C_out
                    for co in range(C_out):
                        acc[co] = acc[co] + w_ref[base + co] * patch

        for co in range(C_out):
            y = acc[co] + b_ref[co]
            if res_coef != 0.0:
                # Residual read from the interior of the same halo'd tile:
                # no second HBM input stream.
                res = x_ref[nb, co, 0, pad:pad + TH, pad:pad + W].astype(jnp.float32)
                y = y + res_coef * res
            if act_slope is not None:
                y = jnp.where(y >= 0, y, act_slope * y)   # fused LeakyReLU
            o_ref[nb, co, :, :] = y.astype(o_ref.dtype)


def _choose_tile_h(H, W, C_in, C_out, pad):
    """H-tile height: multiple of 8, sized by a VMEM budget, and >=2 tiles when H
    allows (pipelining on 1-TC chips, spatial sharding on v7x's 2 TCs)."""
    if H <= 8:
        return H
    itemsize = 4
    rows_in = max(8, (4 * 1024 * 1024) // max(1, C_in * (W + 2 * pad) * itemsize))
    rows_acc = max(8, (2 * 1024 * 1024) // max(1, C_out * W * itemsize))
    th = min(H, rows_in, rows_acc, max(8, -(-H // 2)))
    return max(8, (th // 8) * 8)


def fused_conv2d(x, weight, bias, *, kernel_size, stride=1, dilation=1, groups=1,
                 res_coef=0.0, act_slope=None):
    """y = conv2d_same(x, weight) + bias [+ res_coef*x] [LeakyReLU(act_slope)].

    x: (N, C_in, H, W) NCHW; weight: (C_out, C_in, K, K) OIHW; bias: (C_out,).
    """
    assert stride == 1, "RUAS ConvBlock/ResBlock use stride == 1"
    assert groups == 1  # TODO(synk): grouped conv is unused by the RUAS genotypes
    N, C_in, H, W = x.shape
    C_out = weight.shape[0]
    K = kernel_size
    assert weight.shape == (C_out, C_in, K, K)
    assert K % 2 == 1, "PyTorch 'same-ish' padding formula assumes odd kernel size"
    if res_coef != 0.0:
        assert C_out == C_in, "residual add requires C_out == C_in"

    pad = ((K - 1) // 2) * dilation
    Wp = W + 2 * pad

    TH = _choose_tile_h(H, W, C_in, C_out, pad)
    Ht = -(-H // TH)                       # ceil
    THp = TH + 2 * pad
    H_out_pad = Ht * TH

    # Zero spatial halo + explicit overlapped H-tiles (one fused host-side pass).
    # TODO(synk): move the halo construction into the kernel (pl.ANY + manual DMA)
    #             to avoid this extra HBM pass on full-resolution frames.
    xpad = jnp.pad(x, ((0, 0), (0, 0), (pad, pad), (pad, pad))) if pad > 0 else x
    if Ht == 1:
        x_tiles = xpad[:, :, None, :, :]                  # (N, C_in, 1, THp, Wp)
    else:
        row_idx = jnp.arange(Ht)[:, None] * TH + jnp.arange(THp)[None, :]
        row_idx = jnp.minimum(row_idx, H + 2 * pad - 1)   # clamp last (partial) tile
        x_tiles = xpad[:, :, row_idx, :]                  # (N, C_in, Ht, THp, Wp)

    # Fold the whole batch into a single block when tiny (amortise the ~0.35us
    # per-grid-step overhead); large frames keep one image per step.
    blk_bytes = C_in * THp * Wp * x.dtype.itemsize
    Nb = N if N * blk_bytes <= (1 << 19) else 1

    # Per-tap-grouped weights: [ky][kx][ci][co] so the C_out reads of one tap group
    # are contiguous SMEM scalar reads.
    w_flat = jnp.asarray(weight, jnp.float32).transpose(2, 3, 1, 0).reshape(-1)
    b_flat = jnp.asarray(bias, jnp.float32).reshape(-1)

    kernel = functools.partial(
        _fused_conv_kernel, Nb=Nb, C_in=C_in, C_out=C_out, K=K,
        dilation=dilation, pad=pad, TH=TH, W=W,
        res_coef=float(res_coef), act_slope=act_slope)

    flops = 2 * N * H * W * C_out * (K * K * C_in + 2)
    bytes_accessed = (x.size * x.dtype.itemsize
                      + w_flat.size * 4 + b_flat.size * 4
                      + N * C_out * H * W * x.dtype.itemsize)

    out = pl.pallas_call(
        kernel,
        out_shape=jax.ShapeDtypeStruct((N, C_out, H_out_pad, W), x.dtype),
        grid_spec=pltpu.PrefetchScalarGridSpec(
            num_scalar_prefetch=0,
            grid=(N // Nb, Ht),
            in_specs=[
                pl.BlockSpec((Nb, C_in, 1, THp, Wp), lambda n, t: (n, 0, t, 0, 0)),
                pl.BlockSpec(memory_space=pltpu.MemorySpace.SMEM),   # weights
                pl.BlockSpec(memory_space=pltpu.MemorySpace.SMEM),   # bias
            ],
            out_specs=pl.BlockSpec((Nb, C_out, TH, W), lambda n, t: (n, 0, t, 0)),
        ),
        compiler_params=pltpu.CompilerParams(
            dimension_semantics=("parallel", "parallel"),
            vmem_limit_bytes=64 * 1024 * 1024),
        cost_estimate=pl.CostEstimate(
            flops=flops, transcendentals=0, bytes_accessed=bytes_accessed),
    )(x_tiles, w_flat, b_flat)

    return out[:, :, :H, :] if H_out_pad != H else out


def resblock_forward(x, weight, bias, *, kernel_size, stride=1, dilation=1, groups=1):
    """RUAS ResBlock forward: Conv2d(..., bias=True)(x) + x."""
    return fused_conv2d(x, weight, bias, kernel_size=kernel_size, stride=stride,
                        dilation=dilation, groups=groups, res_coef=1.0)


def convblock_forward(x, weight, bias, *, kernel_size, stride=1, dilation=1, groups=1):
    """RUAS ConvBlock forward: Conv2d(..., bias=True)(x)."""
    return fused_conv2d(x, weight, bias, kernel_size=kernel_size, stride=stride,
                        dilation=dilation, groups=groups, res_coef=0.0)


def _reference_conv(x, weight, bias, *, kernel_size, dilation=1, res_coef=0.0,
                    act_slope=None):
    pad = ((kernel_size - 1) // 2) * dilation
    y = jax.lax.conv_general_dilated(
        x, weight, window_strides=(1, 1), padding=((pad, pad), (pad, pad)),
        rhs_dilation=(dilation, dilation),
        dimension_numbers=("NCHW", "OIHW", "NCHW"))
    y = y + bias[None, :, None, None]
    if res_coef != 0.0:
        y = y + res_coef * x
    if act_slope is not None:
        y = jnp.where(y >= 0, y, act_slope * y)
    return y


if __name__ == "__main__":
    # Small shapes consistent with ResBlock(C, C, k) usage in RUAS.
    N, C, H, W = 2, 4, 16, 16

    key = jax.random.PRNGKey(0)
    kx_, kparam = jax.random.split(key)
    x = jax.random.normal(kx_, (N, C, H, W), dtype=jnp.float32)

    # Primary check: ResBlock(C, C, 3) forward ('resconv_3x3').
    kw0, kb0 = jax.random.split(jax.random.fold_in(kparam, 0))
    weight = jax.random.normal(kw0, (C, C, 3, 3), dtype=jnp.float32) * 0.1
    bias = jax.random.normal(kb0, (C,), dtype=jnp.float32) * 0.1
    y = jax.block_until_ready(resblock_forward(x, weight, bias, kernel_size=3))
    y_ref = _reference_conv(x, weight, bias, kernel_size=3, res_coef=1.0)
    assert y.shape == (N, C, H, W)
    assert jnp.allclose(y, y_ref, atol=1e-4, rtol=1e-4), (
        "mismatch vs reference: max|err|="
        f"{float(jnp.max(jnp.abs(y - y_ref)))}")

    # Other conv variants used by the RUAS genotypes, sharing the same kernel:
    #   resconv_1x1, resdilconv_3x3, and a SearchBlock-style fused
    #   LeakyReLU(resconv_1x1(x) + x-like) = conv + bias + 2*x + LeakyReLU(0.05).
    extra_configs = [
        dict(kernel_size=1, dilation=1, res_coef=1.0, act_slope=None),
        dict(kernel_size=3, dilation=2, res_coef=1.0, act_slope=None),
        dict(kernel_size=1, dilation=1, res_coef=2.0, act_slope=0.05),
    ]
    for i, cfg in enumerate(extra_configs, start=1):
        Kk = cfg["kernel_size"]
        kw_i, kb_i = jax.random.split(jax.random.fold_in(kparam, i))
        w_i = jax.random.normal(kw_i, (C, C, Kk, Kk), dtype=jnp.float32) * 0.1
        b_i = jax.random.normal(kb_i, (C,), dtype=jnp.float32) * 0.1

        y_i = jax.block_until_ready(fused_conv2d(x, w_i, b_i, **cfg))
        y_i_ref = _reference_conv(x, w_i, b_i, **cfg)
        assert y_i.shape == (N, C, H, W)
        assert jnp.allclose(y_i, y_i_ref, atol=1e-4, rtol=1e-4), (
            f"mismatch vs reference for {cfg}: max|err|="
            f"{float(jnp.max(jnp.abs(y_i - y_i_ref)))}")

    # Production-like layout check: lane-dense W (multiple of 128) and an H-tiled
    # parallel spatial grid axis even with N=1 (v7x 2-TC case).
    N2, C2, H2, W2 = 1, 4, 32, 128
    x2 = jax.random.normal(jax.random.fold_in(key, 7), (N2, C2, H2, W2), jnp.float32)
    kw2, kb2 = jax.random.split(jax.random.fold_in(kparam, 9))
    w2 = jax.random.normal(kw2, (C2, C2, 3, 3), dtype=jnp.float32) * 0.1
    b2 = jax.random.normal(kb2, (C2,), dtype=jnp.float32) * 0.1
    y2 = jax.block_until_ready(resblock_forward(x2, w2, b2, kernel_size=3))
    y2_ref = _reference_conv(x2, w2, b2, kernel_size=3, res_coef=1.0)
    assert y2.shape == (N2, C2, H2, W2)
    assert jnp.allclose(y2, y2_ref, atol=1e-4, rtol=1e-4), (
        "mismatch vs reference (lane-dense case): max|err|="
        f"{float(jnp.max(jnp.abs(y2 - y2_ref)))}")

    print("KERNEL_OK")
</pallas_src>

<mosaic_0001>
module attributes {stable_mosaic.version = 11 : i64} {
  func.func @_fused_conv_kernel(%arg0: i32, %arg1: i32, %arg2: memref<2x4x1x10x18xf32, #tpu.memory_space<vmem>>, %arg3: memref<144xf32, #tpu.memory_space<smem>>, %arg4: memref<4xf32, #tpu.memory_space<smem>>, %arg5: memref<2x4x8x16xf32, #tpu.memory_space<vmem>>) attributes {dimension_semantics = [#tpu.dimension_semantics<parallel>, #tpu.dimension_semantics<parallel>], iteration_bounds = array<i64: 1, 2>, scalar_prefetch = 0 : i64, scratch_operands = 0 : i64, tpu.core_type = #tpu.core_type<tc>, window_params = [{transform_indices = @transform_0, window_bounds = array<i64: 2, 4, 1, 10, 18>}, {transform_indices = @transform_1, window_bounds = array<i64: 144>}, {transform_indices = @transform_2, window_bounds = array<i64: 4>}, {transform_indices = @transform_3, window_bounds = array<i64: 2, 4, 8, 16>}]} {
    %cst = arith.constant 0.000000e+00 : f32
    %0 = vector.broadcast %cst : f32 to vector<8x16xf32>
    %cst_0 = arith.constant 0.000000e+00 : f32
    %1 = vector.broadcast %cst_0 : f32 to vector<8x16xf32>
    %cst_1 = arith.constant 0.000000e+00 : f32
    %2 = vector.broadcast %cst_1 : f32 to vector<8x16xf32>
    %cst_2 = arith.constant 0.000000e+00 : f32
    %3 = vector.broadcast %cst_2 : f32 to vector<8x16xf32>
    %c0 = arith.constant 0 : index
    %c0_3 = arith.constant 0 : index
    %c0_4 = arith.constant 0 : index
    %c0_5 = arith.constant 0 : index
    %c0_6 = arith.constant 0 : index
    %4 = vector.load %arg2[%c0, %c0_3, %c0_4, %c0_5, %c0_6] : memref<2x4x1x10x18xf32, #tpu.memory_space<vmem>>, vector<1x1x1x8x16xf32>
    %5 = vector.shape_cast %4 : vector<1x1x1x8x16xf32> to vector<8x16xf32>
    %c0_7 = arith.constant 0 : index
    %6 = memref.load %arg3[%c0_7] : memref<144xf32, #tpu.memory_space<smem>>
    %7 = vector.broadcast %6 : f32 to vector<8x16xf32>
    %8 = arith.mulf %7, %5 : vector<8x16xf32>
    %9 = arith.addf %0, %8 : vector<8x16xf32>
    %c1 = arith.constant 1 : index
    %10 = memref.load %arg3[%c1] : memref<144xf32, #tpu.memory_space<smem>>
    %11 = vector.broadcast %10 : f32 to vector<8x16xf32>
    %12 = arith.mulf %11, %5 : vector<8x16xf32>
    %13 = arith.addf %1, %12 : vector<8x16xf32>
    %c2 = arith.constant 2 : index
    %14 = memref.load %arg3[%c2] : memref<144xf32, #tpu.memory_space<smem>>
    %15 = vector.broadcast %14 : f32 to vector<8x16xf32>
    %16 = arith.mulf %15, %5 : vector<8x16xf32>
    %17 = arith.addf %2, %16 : vector<8x16xf32>
    %c3 = arith.constant 3 : index
    %18 = memref.load %arg3[%c3] : memref<144xf32, #tpu.memory_space<smem>>
    %19 = vector.broadcast %18 : f32 to vector<8x16xf32>
    %20 = arith.mulf %19, %5 : vector<8x16xf32>
    %21 = arith.addf %3, %20 : vector<8x16xf32>
    %c0_8 = arith.constant 0 : index
    %c0_9 = arith.constant 0 : index
    %c0_10 = arith.constant 0 : index
    %c0_11 = arith.constant 0 : index
    %c1_12 = arith.constant 1 : index
    %22 = vector.load %arg2[%c0_8, %c0_9, %c0_10, %c0_11, %c1_12] : memref<2x4x1x10x18xf32, #tpu.memory_space<vmem>>, vector<1x1x1x8x16xf32>
    %23 = vector.shape_cast %22 : vector<1x1x1x8x16xf32> to vector<8x16xf32>
    %c16 = arith.constant 16 : index
    %24 = memref.load %arg3[%c16] : memref<144xf32, #tpu.memory_space<smem>>
    %25 = vector.broadcast %24 : f32 to vector<8x16xf32>
    %26 = arith.mulf %25, %23 : vector<8x16xf32>
    %27 = arith.addf %9, %26 : vector<8x16xf32>
    %c17 = arith.constant 17 : index
    %28 = memref.load %arg3[%c17] : memref<144xf32, #tpu.memory_space<smem>>
    %29 = vector.broadcast %28 : f32 to vector<8x16xf32>
    %30 = arith.mulf %29, %23 : vector<8x16xf32>
    %31 = arith.addf %13, %30 : vector<8x16xf32>
    %c18 = arith.constant 18 : index
    %32 = memref.load %arg3[%c18] : memref<144xf32, #tpu.memory_space<smem>>
    %33 = vector.broadcast %32 : f32 to vector<8x16xf32>
    %34 = arith.mulf %33, %23 : vector<8x16xf32>
    %35 = arith.addf %17, %34 : vector<8x16xf32>
    %c19 = arith.constant 19 : index
    %36 = memref.load %arg3[%c19] : memref<144xf32, #tpu.memory_space<smem>>
    %37 = vector.broadcast %36 : f32 to vector<8x16xf32>
    %38 = arith.mulf %37, %23 : vector<8x16xf32>
    %39 = arith.addf %21, %38 : vector<8x16xf32>
    %c0_13 = arith.constant 0 : index
    %c0_14 = arith.constant 0 : index
    %c0_15 = arith.constant 0 : index
    %c0_16 = arith.constant 0 : index
    %c2_17 = arith.constant 2 : index
    %40 = vector.load %arg2[%c0_13, %c0_14, %c0_15, %c0_16, %c2_17] : memref<2x4x1x10x18xf32, #tpu.memory_space<vmem>>, vector<1x1x1x8x16xf32>
    %41 = vector.shape_cast %40 : vector<1x1x1x8x16xf32> to vector<8x16xf32>
    %c32 = arith.constant 32 : index
    %42 = memref.load %arg3[%c32] : memref<144xf32, #tpu.memory_space<smem>>
    %43 = vector.broadcast %42 : f32 to vector<8x16xf32>
    %44 = arith.mulf %43, %41 : vector<8x16xf32>
    %45 = arith.addf %27, %44 : vector<8x16xf32>
    %c33 = arith.constant 33 : index
    %46 = memref.load %arg3[%c33] : memref<144xf32, #tpu.memory_space<smem>>
    %47 = vector.broadcast %46 : f32 to vector<8x16xf32>
    %48 = arith.mulf %47, %41 : vector<8x16xf32>
    %49 = arith.addf %31, %48 : vector<8x16xf32>
    %c34 = arith.constant 34 : index
    %50 = memref.load %arg3[%c34] : memref<144xf32, #tpu.memory_space<smem>>
    %51 = vector.broadcast %50 : f32 to vector<8x16xf32>
    %52 = arith.mulf %51, %41 : vector<8x16xf32>
    %53 = arith.addf %35, %52 : vector<8x16xf32>
    %c35 = arith.constant 35 : index
    %54 = memref.load %arg3[%c35] : memref<144xf32, #tpu.memory_space<smem>>
    %55 = vector.broadcast %54 : f32 to vector<8x16xf32>
    %56 = arith.mulf %55, %41 : vector<8x16xf32>
    %57 = arith.addf %39, %56 : vector<8x16xf32>
    %c0_18 = arith.constant 0 : index
    %c0_19 = arith.constant 0 : index
    %c0_20 = arith.constant 0 : index
    %c1_21 = arith.constant 1 : index
    %c0_22 = arith.constant 0 : index
    %58 = vector.load %arg2[%c0_18, %c0_19, %c0_20, %c1_21, %c0_22] : memref<2x4x1x10x18xf32, #tpu.memory_space<vmem>>, vector<1x1x1x8x16xf32>
    %59 = vector.shape_cast %58 : vector<1x1x1x8x16xf32> to vector<8x16xf32>
    %c48 = arith.constant 48 : index
    %60 = memref.load %arg3[%c48] : memref<144xf32, #tpu.memory_space<smem>>
    %61 = vector.broadcast %60 : f32 to vector<8x16xf32>
    %62 = arith.mulf %61, %59 : vector<8x16xf32>
    %63 = arith.addf %45, %62 : vector<8x16xf32>
    %c49 = arith.constant 49 : index
    %64 = memref.load %arg3[%c49] : memref<144xf32, #tpu.memory_space<smem>>
    %65 = vector.broadcast %64 : f32 to vector<8x16xf32>
    %66 = arith.mulf %65, %59 : vector<8x16xf32>
    %67 = arith.addf %49, %66 : vector<8x16xf32>
    %c50 = arith.constant 50 : index
    %68 = memref.load %arg3[%c50] : memref<144xf32, #tpu.memory_space<smem>>
    %69 = vector.broadcast %68 : f32 to vector<8x16xf32>
    %70 = arith.mulf %69, %59 : vector<8x16xf32>
    %71 = arith.addf %53, %70 : vector<8x16xf32>
    %c51 = arith.constant 51 : index
    %72 = memref.load %arg3[%c51] : memref<144xf32, #tpu.memory_space<smem>>
    %73 = vector.broadcast %72 : f32 to vector<8x16xf32>
    %74 = arith.mulf %73, %59 : vector<8x16xf32>
    %75 = arith.addf %57, %74 : vector<8x16xf32>
    %c0_23 = arith.constant 0 : index
    %c0_24 = arith.constant 0 : index
    %c0_25 = arith.constant 0 : index
    %c1_26 = arith.constant 1 : index
    %c1_27 = arith.constant 1 : index
    %76 = vector.load %arg2[%c0_23, %c0_24, %c0_25, %c1_26, %c1_27] : memref<2x4x1x10x18xf32, #tpu.memory_space<vmem>>, vector<1x1x1x8x16xf32>
    %77 = vector.shape_cast %76 : vector<1x1x1x8x16xf32> to vector<8x16xf32>
    %c64 = arith.constant 64 : index
    %78 = memref.load %arg3[%c64] : memref<144xf32, #tpu.memory_space<smem>>
    %79 = vector.broadcast %78 : f32 to vector<8x16xf32>
    %80 = arith.mulf %79, %77 : vector<8x16xf32>
    %81 = arith.addf %63, %80 : vector<8x16xf32>
    %c65 = arith.constant 65 : index
    %82 = memref.load %arg3[%c65] : memref<144xf32, #tpu.memory_space<smem>>
    %83 = vector.broadcast %82 : f32 to vector<8x16xf32>
    %84 = arith.mulf %83, %77 : vector<8x16xf32>
    %85 = arith.addf %67, %84 : vector<8x16xf32>
    %c66 = arith.constant 66 : index
    %86 = memref.load %arg3[%c66] : memref<144xf32, #tpu.memory_space<smem>>
    %87 = vector.broadcast %86 : f32 to vector<8x16xf32>
    %88 = arith.mulf %87, %77 : vector<8x16xf32>
    %89 = arith.addf %71, %88 : vector<8x16xf32>
    %c67 = arith.constant 67 : index
    %90 = memref.load %arg3[%c67] : memref<144xf32, #tpu.memory_space<smem>>
    %91 = vector.broadcast %90 : f32 to vector<8x16xf32>
    %92 = arith.mulf %91, %77 : vector<8x16xf32>
    %93 = arith.addf %75, %92 : vector<8x16xf32>
    %c0_28 = arith.constant 0 : index
    %c0_29 = arith.constant 0 : index
    %c0_30 = arith.constant 0 : index
    %c1_31 = arith.constant 1 : index
    %c2_32 = arith.constant 2 : index
    %94 = vector.load %arg2[%c0_28, %c0_29, %c0_30, %c1_31, %c2_32] : memref<2x4x1x10x18xf32, #tpu.memory_space<vmem>>, vector<1x1x1x8x16xf32>
    %95 = vector.shape_cast %94 : vector<1x1x1x8x16xf32> to vector<8x16xf32>
    %c80 = arith.constant 80 : index
    %96 = memref.load %arg3[%c80] : memref<144xf32, #tpu.memory_space<smem>>
    %97 = vector.broadcast %96 : f32 to vector<8x16xf32>
    %98 = arith.mulf %97, %95 : vector<8x16xf32>
    %99 = arith.addf %81, %98 : vector<8x16xf32>
    %c81 = arith.constant 81 : index
    %100 = memref.load %arg3[%c81] : memref<144xf32, #tpu.memory_space<smem>>
    %101 = vector.broadcast %100 : f32 to vector<8x16xf32>
    %102 = arith.mulf %101, %95 : vector<8x16xf32>
    %103 = arith.addf %85, %102 : vector<8x16xf32>
    %c82 = arith.constant 82 : index
    %104 = memref.load %arg3[%c82] : memref<144xf32, #tpu.memory_space<smem>>
    %105 = vector.broadcast %104 : f32 to vector<8x16xf32>
    %106 = arith.mulf %105, %95 : vector<8x16xf32>
    %107 = arith.addf %89, %106 : vector<8x16xf32>
    %c83 = arith.constant 83 : index
    %108 = memref.load %arg3[%c83] : memref<144xf32, #tpu.memory_space<smem>>
    %109 = vector.broadcast %108 : f32 to vector<8x16xf32>
    %110 = arith.mulf %109, %95 : vector<8x16xf32>
    %111 = arith.addf %93, %110 : vector<8x16xf32>
    %c0_33 = arith.constant 0 : index
    %c0_34 = arith.constant 0 : index
    %c0_35 = arith.constant 0 : index
    %c2_36 = arith.constant 2 : index
    %c0_37 = arith.constant 0 : index
    %112 = vector.load %arg2[%c0_33, %c0_34, %c0_35, %c2_36, %c0_37] : memref<2x4x1x10x18xf32, #tpu.memory_space<vmem>>, vector<1x1x1x8x16xf32>
    %113 = vector.shape_cast %112 : vector<1x1x1x8x16xf32> to vector<8x16xf32>
    %c96 = arith.constant 96 : index
    %114 = memref.load %arg3[%c96] : memref<144xf32, #tpu.memory_space<smem>>
    %115 = vector.broadcast %114 : f32 to vector<8x16xf32>
    %116 = arith.mulf %115, %113 : vector<8x16xf32>
    %117 = arith.addf %99, %116 : vector<8x16xf32>
    %c97 = arith.constant 97 : index
    %118 = memref.load %arg3[%c97] : memref<144xf32, #tpu.memory_space<smem>>
    %119 = vector.broadcast %118 : f32 to vector<8x16xf32>
    %120 = arith.mulf %119, %113 : vector<8x16xf32>
    %121 = arith.addf %103, %120 : vector<8x16xf32>
    %c98 = arith.constant 98 : index
    %122 = memref.load %arg3[%c98] : memref<144xf32, #tpu.memory_space<smem>>
    %123 = vector.broadcast %122 : f32 to vector<8x16xf32>
    %124 = arith.mulf %123, %113 : vector<8x16xf32>
    %125 = arith.addf %107, %124 : vector<8x16xf32>
    %c99 = arith.constant 99 : index
    %126 = memref.load %arg3[%c99] : memref<144xf32, #tpu.memory_space<smem>>
    %127 = vector.broadcast %126 : f32 to vector<8x16xf32>
    %128 = arith.mulf %127, %113 : vector<8x16xf32>
    %129 = arith.addf %111, %128 : vector<8x16xf32>
    %c0_38 = arith.constant 0 : index
    %c0_39 = arith.constant 0 : index
    %c0_40 = arith.constant 0 : index
    %c2_41 = arith.constant 2 : index
    %c1_42 = arith.constant 1 : index
    %130 = vector.load %arg2[%c0_38, %c0_39, %c0_40, %c2_41, %c1_42] : memref<2x4x1x10x18xf32, #tpu.memory_space<vmem>>, vector<1x1x1x8x16xf32>
    %131 = vector.shape_cast %130 : vector<1x1x1x8x16xf32> to vector<8x16xf32>
    %c112 = arith.constant 112 : index
    %132 = memref.load %arg3[%c112] : memref<144xf32, #tpu.memory_space<smem>>
    %133 = vector.broadcast %132 : f32 to vector<8x16xf32>
    %134 = arith.mulf %133, %131 : vector<8x16xf32>
    %135 = arith.addf %117, %134 : vector<8x16xf32>
    %c113 = arith.constant 113 : index
    %136 = memref.load %arg3[%c113] : memref<144xf32, #tpu.memory_space<smem>>
    %137 = vector.broadcast %136 : f32 to vector<8x16xf32>
    %138 = arith.mulf %137, %131 : vector<8x16xf32>
    %139 = arith.addf %121, %138 : vector<8x16xf32>
    %c114 = arith.constant 114 : index
    %140 = memref.load %arg3[%c114] : memref<144xf32, #tpu.memory_space<smem>>
    %141 = vector.broadcast %140 : f32 to vector<8x16xf32>
    %142 = arith.mulf %141, %131 : vector<8x16xf32>
    %143 = arith.addf %125, %142 : vector<8x16xf32>
    %c115 = arith.constant 115 : index
    %144 = memref.load %arg3[%c115] : memref<144xf32, #tpu.memory_space<smem>>
    %145 = vector.broadcast %144 : f32 to vector<8x16xf32>
    %146 = arith.mulf %145, %131 : vector<8x16xf32>
    %147 = arith.addf %129, %146 : vector<8x16xf32>
    %c0_43 = arith.constant 0 : index
    %c0_44 = arith.constant 0 : index
    %c0_45 = arith.constant 0 : index
    %c2_46 = arith.constant 2 : index
    %c2_47 = arith.constant 2 : index
    %148 = vector.load %arg2[%c0_43, %c0_44, %c0_45, %c2_46, %c2_47] : memref<2x4x1x10x18xf32, #tpu.memory_space<vmem>>, vector<1x1x1x8x16xf32>
    %149 = vector.shape_cast %148 : vector<1x1x1x8x16xf32> to vector<8x16xf32>
    %c128 = arith.constant 128 : index
    %150 = memref.load %arg3[%c128] : memref<144xf32, #tpu.memory_space<smem>>
    %151 = vector.broadcast %150 : f32 to vector<8x16xf32>
    %152 = arith.mulf %151, %149 : vector<8x16xf32>
    %153 = arith.addf %135, %152 : vector<8x16xf32>
    %c129 = arith.constant 129 : index
    %154 = memref.load %arg3[%c129] : memref<144xf32, #tpu.memory_space<smem>>
    %155 = vector.broadcast %154 : f32 to vector<8x16xf32>
    %156 = arith.mulf %155, %149 : vector<8x16xf32>
    %157 = arith.addf %139, %156 : vector<8x16xf32>
    %c130 = arith.constant 130 : index
    %158 = memref.load %arg3[%c130] : memref<144xf32, #tpu.memory_space<smem>>
    %159 = vector.broadcast %158 : f32 to vector<8x16xf32>
    %160 = arith.mulf %159, %149 : vector<8x16xf32>
    %161 = arith.addf %143, %160 : vector<8x16xf32>
    %c131 = arith.constant 131 : index
    %162 = memref.load %arg3[%c131] : memref<144xf32, #tpu.memory_space<smem>>
    %163 = vector.broadcast %162 : f32 to vector<8x16xf32>
    %164 = arith.mulf %163, %149 : vector<8x16xf32>
    %165 = arith.addf %147, %164 : vector<8x16xf32>
    %c0_48 = arith.constant 0 : index
    %c1_49 = arith.constant 1 : index
    %c0_50 = arith.constant 0 : index
    %c0_51 = arith.constant 0 : index
    %c0_52 = arith.constant 0 : index
    %166 = vector.load %arg2[%c0_48, %c1_49, %c0_50, %c0_51, %c0_52] : memref<2x4x1x10x18xf32, #tpu.memory_space<vmem>>, vector<1x1x1x8x16xf32>
    %167 = vector.shape_cast %166 : vector<1x1x1x8x16xf32> to vector<8x16xf32>
    %c4 = arith.constant 4 : index
    %168 = memref.load %arg3[%c4] : memref<144xf32, #tpu.memory_space<smem>>
    %169 = vector.broadcast %168 : f32 to vector<8x16xf32>
    %170 = arith.mulf %169, %167 : vector<8x16xf32>
    %171 = arith.addf %153, %170 : vector<8x16xf32>
    %c5 = arith.constant 5 : index
    %172 = memref.load %arg3[%c5] : memref<144xf32, #tpu.memory_space<smem>>
    %173 = vector.broadcast %172 : f32 to vector<8x16xf32>
    %174 = arith.mulf %173, %167 : vector<8x16xf32>
    %175 = arith.addf %157, %174 : vector<8x16xf32>
    %c6 = arith.constant 6 : index
    %176 = memref.load %arg3[%c6] : memref<144xf32, #tpu.memory_space<smem>>
    %177 = vector.broadcast %176 : f32 to vector<8x16xf32>
    %178 = arith.mulf %177, %167 : vector<8x16xf32>
    %179 = arith.addf %161, %178 : vector<8x16xf32>
    %c7 = arith.constant 7 : index
    %180 = memref.load %arg3[%c7] : memref<144xf32, #tpu.memory_space<smem>>
    %181 = vector.broadcast %180 : f32 to vector<8x16xf32>
    %182 = arith.mulf %181, %167 : vector<8x16xf32>
    %183 = arith.addf %165, %182 : vector<8x16xf32>
    %c0_53 = arith.constant 0 : index
    %c1_54 = arith.constant 1 : index
    %c0_55 = arith.constant 0 : index
    %c0_56 = arith.constant 0 : index
    %c1_57 = arith.constant 1 : index
    %184 = vector.load %arg2[%c0_53, %c1_54, %c0_55, %c0_56, %c1_57] : memref<2x4x1x10x18xf32, #tpu.memory_space<vmem>>, vector<1x1x1x8x16xf32>
    %185 = vector.shape_cast %184 : vector<1x1x1x8x16xf32> to vector<8x16xf32>
    %c20 = arith.constant 20 : index
    %186 = memref.load %arg3[%c20] : memref<144xf32, #tpu.memory_space<smem>>
    %187 = vector.broadcast %186 : f32 to vector<8x16xf32>
    %188 = arith.mulf %187, %185 : vector<8x16xf32>
    %189 = arith.addf %171, %188 : vector<8x16xf32>
    %c21 = arith.constant 21 : index
    %190 = memref.load %arg3[%c21] : memref<144xf32, #tpu.memory_space<smem>>
    %191 = vector.broadcast %190 : f32 to vector<8x16xf32>
    %192 = arith.mulf %191, %185 : vector<8x16xf32>
    %193 = arith.addf %175, %192 : vector<8x16xf32>
    %c22 = arith.constant 22 : index
    %194 = memref.load %arg3[%c22] : memref<144xf32, #tpu.memory_space<smem>>
    %195 = vector.broadcast %194 : f32 to vector<8x16xf32>
    %196 = arith.mulf %195, %185 : vector<8x16xf32>
    %197 = arith.addf %179, %196 : vector<8x16xf32>
    %c23 = arith.constant 23 : index
    %198 = memref.load %arg3[%c23] : memref<144xf32, #tpu.memory_space<smem>>
    %199 = vector.broadcast %198 : f32 to vector<8x16xf32>
    %200 = arith.mulf %199, %185 : vector<8x16xf32>
    %201 = arith.addf %183, %200 : vector<8x16xf32>
    %c0_58 = arith.constant 0 : index
    %c1_59 = arith.constant 1 : index
    %c0_60 = arith.constant 0 : index
    %c0_61 = arith.constant 0 : index
    %c2_62 = arith.constant 2 : index
    %202 = vector.load %arg2[%c0_58, %c1_59, %c0_60, %c0_61, %c2_62] : memref<2x4x1x10x18xf32, #tpu.memory_space<vmem>>, vector<1x1x1x8x16xf32>
    %203 = vector.shape_cast %202 : vector<1x1x1x8x16xf32> to vector<8x16xf32>
    %c36 = arith.constant 36 : index
    %204 = memref.load %arg3[%c36] : memref<144xf32, #tpu.memory_space<smem>>
    %205 = vector.broadcast %204 : f32 to vector<8x16xf32>
    %206 = arith.mulf %205, %203 : vector<8x16xf32>
    %207 = arith.addf %189, %206 : vector<8x16xf32>
    %c37 = arith.constant 37 : index
    %208 = memref.load %arg3[%c37] : memref<144xf32, #tpu.memory_space<smem>>
    %209 = vector.broadcast %208 : f32 to vector<8x16xf32>
    %210 = arith.mulf %209, %203 : vector<8x16xf32>
    %211 = arith.addf %193, %210 : vector<8x16xf32>
    %c38 = arith.constant 38 : index
    %212 = memref.load %arg3[%c38] : memref<144xf32, #tpu.memory_space<smem>>
    %213 = vector.broadcast %212 : f32 to vector<8x16xf32>
    %214 = arith.mulf %213, %203 : vector<8x16xf32>
    %215 = arith.addf %197, %214 : vector<8x16xf32>
    %c39 = arith.constant 39 : index
    %216 = memref.load %arg3[%c39] : memref<144xf32, #tpu.memory_space<smem>>
    %217 = vector.broadcast %216 : f32 to vector<8x16xf32>
    %218 = arith.mulf %217, %203 : vector<8x16xf32>
    %219 = arith.addf %201, %218 : vector<8x16xf32>
    %c0_63 = arith.constant 0 : index
    %c1_64 = arith.constant 1 : index
    %c0_65 = arith.constant 0 : index
    %c1_66 = arith.constant 1 : index
    %c0_67 = arith.constant 0 : index
    %220 = vector.load %arg2[%c0_63, %c1_64, %c0_65, %c1_66, %c0_67] : memref<2x4x1x10x18xf32, #tpu.memory_space<vmem>>, vector<1x1x1x8x16xf32>
    %221 = vector.shape_cast %220 : vector<1x1x1x8x16xf32> to vector<8x16xf32>
    %c52 = arith.constant 52 : index
    %222 = memref.load %arg3[%c52] : memref<144xf32, #tpu.memory_space<smem>>
    %223 = vector.broadcast %222 : f32 to vector<8x16xf32>
    %224 = arith.mulf %223, %221 : vector<8x16xf32>
    %225 = arith.addf %207, %224 : vector<8x16xf32>
    %c53 = arith.constant 53 : index
    %226 = memref.load %arg3[%c53] : memref<144xf32, #tpu.memory_space<smem>>
    %227 = vector.broadcast %226 : f32 to vector<8x16xf32>
    %228 = arith.mulf %227, %221 : vector<8x16xf32>
    %229 = arith.addf %211, %228 : vector<8x16xf32>
    %c54 = arith.constant 54 : index
    %230 = memref.load %arg3[%c54] : memref<144xf32, #tpu.memory_space<smem>>
    %231 = vector.broadcast %230 : f32 to vector<8x16xf32>
    %232 = arith.mulf %231, %221 : vector<8x16xf32>
    %233 = arith.addf %215, %232 : vector<8x16xf32>
    %c55 = arith.constant 55 : index
    %234 = memref.load %arg3[%c55] : memref<144xf32, #tpu.memory_space<smem>>
    %235 = vector.broadcast %234 : f32 to vector<8x16xf32>
    %236 = arith.mulf %235, %221 : vector<8x16xf32>
    %237 = arith.addf %219, %236 : vector<8x16xf32>
    %c0_68 = arith.constant 0 : index
    %c1_69 = arith.constant 1 : index
    %c0_70 = arith.constant 0 : index
    %c1_71 = arith.constant 1 : index
    %c1_72 = arith.constant 1 : index
    %238 = vector.load %arg2[%c0_68, %c1_69, %c0_70, %c1_71, %c1_72] : memref<2x4x1x10x18xf32, #tpu.memory_space<vmem>>, vector<1x1x1x8x16xf32>
    %239 = vector.shape_cast %238 : vector<1x1x1x8x16xf32> to vector<8x16xf32>
    %c68 = arith.constant 68 : index
    %240 = memref.load %arg3[%c68] : memref<144xf32, #tpu.memory_space<smem>>
    %241 = vector.broadcast %240 : f32 to vector<8x16xf32>
    %242 = arith.mulf %241, %239 : vector<8x16xf32>
    %243 = arith.addf %225, %242 : vector<8x16xf32>
    %c69 = arith.constant 69 : index
    %244 = memref.load %arg3[%c69] : memref<144xf32, #tpu.memory_space<smem>>
    %245 = vector.broadcast %244 : f32 to vector<8x16xf32>
    %246 = arith.mulf %245, %239 : vector<8x16xf32>
    %247 = arith.addf %229, %246 : vector<8x16xf32>
    %c70 = arith.constant 70 : index
    %248 = memref.load %arg3[%c70] : memref<144xf32, #tpu.memory_space<smem>>
    %249 = vector.broadcast %248 : f32 to vector<8x16xf32>
    %250 = arith.mulf %249, %239 : vector<8x16xf32>
    %251 = arith.addf %233, %250 : vector<8x16xf32>
    %c71 = arith.constant 71 : index
    %252 = memref.load %arg3[%c71] : memref<144xf32, #tpu.memory_space<smem>>
    %253 = vector.broadcast %252 : f32 to vector<8x16xf32>
    %254 = arith.mulf %253, %239 : vector<8x16xf32>
    %255 = arith.addf %237, %254 : vector<8x16xf32>
    %c0_73 = arith.constant 0 : index
    %c1_74 = arith.constant 1 : index
    %c0_75 = arith.constant 0 : index
    %c1_76 = arith.constant 1 : index
    %c2_77 = arith.constant 2 : index
    %256 = vector.load %arg2[%c0_73, %c1_74, %c0_75, %c1_76, %c2_77] : memref<2x4x1x10x18xf32, #tpu.memory_space<vmem>>, vector<1x1x1x8x16xf32>
    %257 = vector.shape_cast %256 : vector<1x1x1x8x16xf32> to vector<8x16xf32>
    %c84 = arith.constant 84 : index
    %258 = memref.load %arg3[%c84] : memref<144xf32, #tpu.memory_space<smem>>
    %259 = vector.broadcast %258 : f32 to vector<8x16xf32>
    %260 = arith.mulf %259, %257 : vector<8x16xf32>
    %261 = arith.addf %243, %260 : vector<8x16xf32>
    %c85 = arith.constant 85 : index
    %262 = memref.load %arg3[%c85] : memref<144xf32, #tpu.memory_space<smem>>
    %263 = vector.broadcast %262 : f32 to vector<8x16xf32>
    %264 = arith.mulf %263, %257 : vector<8x16xf32>
    %265 = arith.addf %247, %264 : vector<8x16xf32>
    %c86 = arith.constant 86 : index
    %266 = memref.load %arg3[%c86] : memref<144xf32, #tpu.memory_space<smem>>
    %267 = vector.broadcast %266 : f32 to vector<8x16xf32>
    %268 = arith.mulf %267, %257 : vector<8x16xf32>
    %269 = arith.addf %251, %268 : vector<8x16xf32>
    %c87 = arith.constant 87 : index
    %270 = memref.load %arg3[%c87] : memref<144xf32, #tpu.memory_space<smem>>
    %271 = vector.broadcast %270 : f32 to vector<8x16xf32>
    %272 = arith.mulf %271, %257 : vector<8x16xf32>
    %273 = arith.addf %255, %272 : vector<8x16xf32>
    %c0_78 = arith.constant 0 : index
    %c1_79 = arith.constant 1 : index
    %c0_80 = arith.constant 0 : index
    %c2_81 = arith.constant 2 : index
    %c0_82 = arith.constant 0 : index
    %274 = vector.load %arg2[%c0_78, %c1_79, %c0_80, %c2_81, %c0_82] : memref<2x4x1x10x18xf32, #tpu.memory_space<vmem>>, vector<1x1x1x8x16xf32>
    %275 = vector.shape_cast %274 : vector<1x1x1x8x16xf32> to vector<8x16xf32>
    %c100 = arith.constant 100 : index
    %276 = memref.load %arg3[%c100] : memref<144xf32, #tpu.memory_space<smem>>
    %277 = vector.broadcast %276 : f32 to vector<8x16xf32>
    %278 = arith.mulf %277, %275 : vector<8x16xf32>
    %279 = arith.addf %261, %278 : vector<8x16xf32>
    %c101 = arith.constant 101 : index
    %280 = memref.load %arg3[%c101] : memref<144xf32, #tpu.memory_space<smem>>
    %281 = vector.broadcast %280 : f32 to vector<8x16xf32>
    %282 = arith.mulf %281, %275 : vector<8x16xf32>
    %283 = arith.addf %265, %282 : vector<8x16xf32>
    %c102 = arith.constant 102 : index
    %284 = memref.load %arg3[%c102] : memref<144xf32, #tpu.memory_space<smem>>
    %285 = vector.broadcast %284 : f32 to vector<8x16xf32>
    %286 = arith.mulf %285, %275 : vector<8x16xf32>
    %287 = arith.addf %269, %286 : vector<8x16xf32>
    %c103 = arith.constant 103 : index
    %288 = memref.load %arg3[%c103] : memref<144xf32, #tpu.memory_space<smem>>
    %289 = vector.broadcast %288 : f32 to vector<8x16xf32>
    %290 = arith.mulf %289, %275 : vector<8x16xf32>
    %291 = arith.addf %273, %290 : vector<8x16xf32>
    %c0_83 = arith.constant 0 : index
    %c1_84 = arith.constant 1 : index
    %c0_85 = arith.constant 0 : index
    %c2_86 = arith.constant 2 : index
    %c1_87 = arith.constant 1 : index
    %292 = vector.load %arg2[%c0_83, %c1_84, %c0_85, %c2_86, %c1_87] : memref<2x4x1x10x18xf32, #tpu.memory_space<vmem>>, vector<1x1x1x8x16xf32>
    %293 = vector.shape_cast %292 : vector<1x1x1x8x16xf32> to vector<8x16xf32>
    %c116 = arith.constant 116 : index
    %294 = memref.load %arg3[%c116] : memref<144xf32, #tpu.memory_space<smem>>
    %295 = vector.broadcast %294 : f32 to vector<8x16xf32>
    %296 = arith.mulf %295, %293 : vector<8x16xf32>
    %297 = arith.addf %279, %296 : vector<8x16xf32>
    %c117 = arith.constant 117 : index
    %298 = memref.load %arg3[%c117] : memref<144xf32, #tpu.memory_space<smem>>
    %299 = vector.broadcast %298 : f32 to vector<8x16xf32>
    %300 = arith.mulf %299, %293 : vector<8x16xf32>
    %301 = arith.addf %283, %300 : vector<8x16xf32>
    %c118 = arith.constant 118 : index
    %302 = memref.load %arg3[%c118] : memref<144xf32, #tpu.memory_space<smem>>
    %303 = vector.broadcast %302 : f32 to vector<8x16xf32>
    %304 = arith.mulf %303, %293 : vector<8x16xf32>
    %305 = arith.addf %287, %304 : vector<8x16xf32>
    %c119 = arith.constant 119 : index
    %306 = memref.load %arg3[%c119] : memref<144xf32, #tpu.memory_space<smem>>
    %307 = vector.broadcast %306 : f32 to vector<8x16xf32>
    %308 = arith.mulf %307, %293 : vector<8x16xf32>
    %309 = arith.addf %291, %308 : vector<8x16xf32>
    %c0_88 = arith.constant 0 : index
    %c1_89 = arith.constant 1 : index
    %c0_90 = arith.constant 0 : index
    %c2_91 = arith.constant 2 : index
    %c2_92 = arith.constant 2 : index
    %310 = vector.load %arg2[%c0_88, %c1_89, %c0_90, %c2_91, %c2_92] : memref<2x4x1x10x18xf32, #tpu.memory_space<vmem>>, vector<1x1x1x8x16xf32>
    %311 = vector.shape_cast %310 : vector<1x1x1x8x16xf32> to vector<8x16xf32>
    %c132 = arith.constant 132 : index
    %312 = memref.load %arg3[%c132] : memref<144xf32, #tpu.memory_space<smem>>
    %313 = vector.broadcast %312 : f32 to vector<8x16xf32>
    %314 = arith.mulf %313, %311 : vector<8x16xf32>
    %315 = arith.addf %297, %314 : vector<8x16xf32>
    %c133 = arith.constant 133 : index
    %316 = memref.load %arg3[%c133] : memref<144xf32, #tpu.memory_space<smem>>
    %317 = vector.broadcast %316 : f32 to vector<8x16xf32>
    %318 = arith.mulf %317, %311 : vector<8x16xf32>
    %319 = arith.addf %301, %318 : vector<8x16xf32>
    %c134 = arith.constant 134 : index
    %320 = memref.load %arg3[%c134] : memref<144xf32, #tpu.memory_space<smem>>
    %321 = vector.broadcast %320 : f32 to vector<8x16xf32>
    %322 = arith.mulf %321, %311 : vector<8x16xf32>
    %323 = arith.addf %305, %322 : vector<8x16xf32>
    %c135 = arith.constant 135 : index
    %324 = memref.load %arg3[%c135] : memref<144xf32, #tpu.memory_space<smem>>
    %325 = vector.broadcast %324 : f32 to vector<8x16xf32>
    %326 = arith.mulf %325, %311 : vector<8x16xf32>
    %327 = arith.addf %309, %326 : vector<8x16xf32>
    %c0_93 = arith.constant 0 : index
    %c2_94 = arith.constant 2 : index
    %c0_95 = arith.constant 0 : index
    %c0_96 = arith.constant 0 : index
    %c0_97 = arith.constant 0 : index
    %328 = vector.load %arg2[%c0_93, %c2_94, %c0_95, %c0_96, %c0_97] : memref<2x4x1x10x18xf32, #tpu.memory_space<vmem>>, vector<1x1x1x8x16xf32>
    %329 = vector.shape_cast %328 : vector<1x1x1x8x16xf32> to vector<8x16xf32>
    %c8 = arith.constant 8 : index
    %330 = memref.load %arg3[%c8] : memref<144xf32, #tpu.memory_space<smem>>
    %331 = vector.broadcast %330 : f32 to vector<8x16xf32>
    %332 = arith.mulf %331, %329 : vector<8x16xf32>
    %333 = arith.addf %315, %332 : vector<8x16xf32>
    %c9 = arith.constant 9 : index
    %334 = memref.load %arg3[%c9] : memref<144xf32, #tpu.memory_space<smem>>
    %335 = vector.broadcast %334 : f32 to vector<8x16xf32>
    %336 = arith.mulf %335, %329 : vector<8x16xf32>
    %337 = arith.addf %319, %336 : vector<8x16xf32>
    %c10 = arith.constant 10 : index
    %338 = memref.load %arg3[%c10] : memref<144xf32, #tpu.memory_space<smem>>
    %339 = vector.broadcast %338 : f32 to vector<8x16xf32>
    %340 = arith.mulf %339, %329 : vector<8x16xf32>
    %341 = arith.addf %323, %340 : vector<8x16xf32>
    %c11 = arith.constant 11 : index
    %342 = memref.load %arg3[%c11] : memref<144xf32, #tpu.memory_space<smem>>
    %343 = vector.broadcast %342 : f32 to vector<8x16xf32>
    %344 = arith.mulf %343, %329 : vector<8x16xf32>
    %345 = arith.addf %327, %344 : vector<8x16xf32>
    %c0_98 = arith.constant 0 : index
    %c2_99 = arith.constant 2 : index
    %c0_100 = arith.constant 0 : index
    %c0_101 = arith.constant 0 : index
    %c1_102 = arith.constant 1 : index
    %346 = vector.load %arg2[%c0_98, %c2_99, %c0_100, %c0_101, %c1_102] : memref<2x4x1x10x18xf32, #tpu.memory_space<vmem>>, vector<1x1x1x8x16xf32>
    %347 = vector.shape_cast %346 : vector<1x1x1x8x16xf32> to vector<8x16xf32>
    %c24 = arith.constant 24 : index
    %348 = memref.load %arg3[%c24] : memref<144xf32, #tpu.memory_space<smem>>
    %349 = vector.broadcast %348 : f32 to vector<8x16xf32>
    %350 = arith.mulf %349, %347 : vector<8x16xf32>
    %351 = arith.addf %333, %350 : vector<8x16xf32>
    %c25 = arith.constant 25 : index
    %352 = memref.load %arg3[%c25] : memref<144xf32, #tpu.memory_space<smem>>
    %353 = vector.broadcast %352 : f32 to vector<8x16xf32>
    %354 = arith.mulf %353, %347 : vector<8x16xf32>
    %355 = arith.addf %337, %354 : vector<8x16xf32>
    %c26 = arith.constant 26 : index
    %356 = memref.load %arg3[%c26] : memref<144xf32, #tpu.memory_space<smem>>
    %357 = vector.broadcast %356 : f32 to vector<8x16xf32>
    %358 = arith.mulf %357, %347 : vector<8x16xf32>
    %359 = arith.addf %341, %358 : vector<8x16xf32>
    %c27 = arith.constant 27 : index
    %360 = memref.load %arg3[%c27] : memref<144xf32, #tpu.memory_space<smem>>
    %361 = vector.broadcast %360 : f32 to vector<8x16xf32>
    %362 = arith.mulf %361, %347 : vector<8x16xf32>
    %363 = arith.addf %345, %362 : vector<8x16xf32>
    %c0_103 = arith.constant 0 : index
    %c2_104 = arith.constant 2 : index
    %c0_105 = arith.constant 0 : index
    %c0_106 = arith.constant 0 : index
    %c2_107 = arith.constant 2 : index
    %364 = vector.load %arg2[%c0_103, %c2_104, %c0_105, %c0_106, %c2_107] : memref<2x4x1x10x18xf32, #tpu.memory_space<vmem>>, vector<1x1x1x8x16xf32>
    %365 = vector.shape_cast %364 : vector<1x1x1x8x16xf32> to vector<8x16xf32>
    %c40 = arith.constant 40 : index
    %366 = memref.load %arg3[%c40] : memref<144xf32, #tpu.memory_space<smem>>
    %367 = vector.broadcast %366 : f32 to vector<8x16xf32>
    %368 = arith.mulf %367, %365 : vector<8x16xf32>
    %369 = arith.addf %351, %368 : vector<8x16xf32>
    %c41 = arith.constant 41 : index
    %370 = memref.load %arg3[%c41] : memref<144xf32, #tpu.memory_space<smem>>
    %371 = vector.broadcast %370 : f32 to vector<8x16xf32>
    %372 = arith.mulf %371, %365 : vector<8x16xf32>
    %373 = arith.addf %355, %372 : vector<8x16xf32>
    %c42 = arith.constant 42 : index
    %374 = memref.load %arg3[%c42] : memref<144xf32, #tpu.memory_space<smem>>
    %375 = vector.broadcast %374 : f32 to vector<8x16xf32>
    %376 = arith.mulf %375, %365 : vector<8x16xf32>
    %377 = arith.addf %359, %376 : vector<8x16xf32>
    %c43 = arith.constant 43 : index
    %378 = memref.load %arg3[%c43] : memref<144xf32, #tpu.memory_space<smem>>
    %379 = vector.broadcast %378 : f32 to vector<8x16xf32>
    %380 = arith.mulf %379, %365 : vector<8x16xf32>
    %381 = arith.addf %363, %380 : vector<8x16xf32>
    %c0_108 = arith.constant 0 : index
    %c2_109 = arith.constant 2 : index
    %c0_110 = arith.constant 0 : index
    %c1_111 = arith.constant 1 : index
    %c0_112 = arith.constant 0 : index
    %382 = vector.load %arg2[%c0_108, %c2_109, %c0_110, %c1_111, %c0_112] : memref<2x4x1x10x18xf32, #tpu.memory_space<vmem>>, vector<1x1x1x8x16xf32>
    %383 = vector.shape_cast %382 : vector<1x1x1x8x16xf32> to vector<8x16xf32>
    %c56 = arith.constant 56 : index
    %384 = memref.load %arg3[%c56] : memref<144xf32, #tpu.memory_space<smem>>
    %385 = vector.broadcast %384 : f32 to vector<8x16xf32>
    %386 = arith.mulf %385, %383 : vector<8x16xf32>
    %387 = arith.addf %369, %386 : vector<8x16xf32>
    %c57 = arith.constant 57 : index
    %388 = memref.load %arg3[%c57] : memref<144xf32, #tpu.memory_space<smem>>
    %389 = vector.broadcast %388 : f32 to vector<8x16xf32>
    %390 = arith.mulf %389, %383 : vector<8x16xf32>
    %391 = arith.addf %373, %390 : vector<8x16xf32>
    %c58 = arith.constant 58 : index
    %392 = memref.load %arg3[%c58] : memref<144xf32, #tpu.memory_space<smem>>
    %393 = vector.broadcast %392 : f32 to vector<8x16xf32>
    %394 = arith.mulf %393, %383 : vector<8x16xf32>
    %395 = arith.addf %377, %394 : vector<8x16xf32>
    %c59 = arith.constant 59 : index
    %396 = memref.load %arg3[%c59] : memref<144xf32, #tpu.memory_space<smem>>
    %397 = vector.broadcast %396 : f32 to vector<8x16xf32>
    %398 = arith.mulf %397, %383 : vector<8x16xf32>
    %399 = arith.addf %381, %398 : vector<8x16xf32>
    %c0_113 = arith.constant 0 : index
    %c2_114 = arith.constant 2 : index
    %c0_115 = arith.constant 0 : index
    %c1_116 = arith.constant 1 : index
    %c1_117 = arith.constant 1 : index
    %400 = vector.load %arg2[%c0_113, %c2_114, %c0_115, %c1_116, %c1_117] : memref<2x4x1x10x18xf32, #tpu.memory_space<vmem>>, vector<1x1x1x8x16xf32>
    %401 = vector.shape_cast %400 : vector<1x1x1x8x16xf32> to vector<8x16xf32>
    %c72 = arith.constant 72 : index
    %402 = memref.load %arg3[%c72] : memref<144xf32, #tpu.memory_space<smem>>
    %403 = vector.broadcast %402 : f32 to vector<8x16xf32>
    %404 = arith.mulf %403, %401 : vector<8x16xf32>
    %405 = arith.addf %387, %404 : vector<8x16xf32>
    %c73 = arith.constant 73 : index
    %406 = memref.load %arg3[%c73] : memref<144xf32, #tpu.memory_space<smem>>
    %407 = vector.broadcast %406 : f32 to vector<8x16xf32>
    %408 = arith.mulf %407, %401 : vector<8x16xf32>
    %409 = arith.addf %391, %408 : vector<8x16xf32>
    %c74 = arith.constant 74 : index
    %410 = memref.load %arg3[%c74] : memref<144xf32, #tpu.memory_space<smem>>
    %411 = vector.broadcast %410 : f32 to vector<8x16xf32>
    %412 = arith.mulf %411, %401 : vector<8x16xf32>
    %413 = arith.addf %395, %412 : vector<8x16xf32>
    %c75 = arith.constant 75 : index
    %414 = memref.load %arg3[%c75] : memref<144xf32, #tpu.memory_space<smem>>
    %415 = vector.broadcast %414 : f32 to vector<8x16xf32>
    %416 = arith.mulf %415, %401 : vector<8x16xf32>
    %417 = arith.addf %399, %416 : vector<8x16xf32>
    %c0_118 = arith.constant 0 : index
    %c2_119 = arith.constant 2 : index
    %c0_120 = arith.constant 0 : index
    %c1_121 = arith.constant 1 : index
    %c2_122 = arith.constant 2 : index
    %418 = vector.load %arg2[%c0_118, %c2_119, %c0_120, %c1_121, %c2_122] : memref<2x4x1x10x18xf32, #tpu.memory_space<vmem>>, vector<1x1x1x8x16xf32>
    %419 = vector.shape_cast %418 : vector<1x1x1x8x16xf32> to vector<8x16xf32>
    %c88 = arith.constant 88 : index
    %420 = memref.load %arg3[%c88] : memref<144xf32, #tpu.memory_space<smem>>
    %421 = vector.broadcast %420 : f32 to vector<8x16xf32>
    %422 = arith.mulf %421, %419 : vector<8x16xf32>
    %423 = arith.addf %405, %422 : vector<8x16xf32>
    %c89 = arith.constant 89 : index
    %424 = memref.load %arg3[%c89] : memref<144xf32, #tpu.memory_space<smem>>
    %425 = vector.broadcast %424 : f32 to vector<8x16xf32>
    %426 = arith.mulf %425, %419 : vector<8x16xf32>
    %427 = arith.addf %409, %426 : vector<8x16xf32>
    %c90 = arith.constant 90 : index
    %428 = memref.load %arg3[%c90] : memref<144xf32, #tpu.memory_space<smem>>
    %429 = vector.broadcast %428 : f32 to vector<8x16xf32>
    %430 = arith.mulf %429, %419 : vector<8x16xf32>
    %431 = arith.addf %413, %430 : vector<8x16xf32>
    %c91 = arith.constant 91 : index
    %432 = memref.load %arg3[%c91] : memref<144xf32, #tpu.memory_space<smem>>
    %433 = vector.broadcast %432 : f32 to vector<8x16xf32>
    %434 = arith.mulf %433, %419 : vector<8x16xf32>
    %435 = arith.addf %417, %434 : vector<8x16xf32>
    %c0_123 = arith.constant 0 : index
    %c2_124 = arith.constant 2 : index
    %c0_125 = arith.constant 0 : index
    %c2_126 = arith.constant 2 : index
    %c0_127 = arith.constant 0 : index
    %436 = vector.load %arg2[%c0_123, %c2_124, %c0_125, %c2_126, %c0_127] : memref<2x4x1x10x18xf32, #tpu.memory_space<vmem>>, vector<1x1x1x8x16xf32>
    %437 = vector.shape_cast %436 : vector<1x1x1x8x16xf32> to vector<8x16xf32>
    %c104 = arith.constant 104 : index
    %438 = memref.load %arg3[%c104] : memref<144xf32, #tpu.memory_space<smem>>
    %439 = vector.broadcast %438 : f32 to vector<8x16xf32>
    %440 = arith.mulf %439, %437 : vector<8x16xf32>
    %441 = arith.addf %423, %440 : vector<8x16xf32>
    %c105 = arith.constant 105 : index
    %442 = memref.load %arg3[%c105] : memref<144xf32, #tpu.memory_space<smem>>
    %443 = vector.broadcast %442 : f32 to vector<8x16xf32>
    %444 = arith.mulf %443, %437 : vector<8x16xf32>
    %445 = arith.addf %427, %444 : vector<8x16xf32>
    %c106 = arith.constant 106 : index
    %446 = memref.load %arg3[%c106] : memref<144xf32, #tpu.memory_space<smem>>
    %447 = vector.broadcast %446 : f32 to vector<8x16xf32>
    %448 = arith.mulf %447, %437 : vector<8x16xf32>
    %449 = arith.addf %431, %448 : vector<8x16xf32>
    %c107 = arith.constant 107 : index
    %450 = memref.load %arg3[%c107] : memref<144xf32, #tpu.memory_space<smem>>
    %451 = vector.broadcast %450 : f32 to vector<8x16xf32>
    %452 = arith.mulf %451, %437 : vector<8x16xf32>
    %453 = arith.addf %435, %452 : vector<8x16xf32>
    %c0_128 = arith.constant 0 : index
    %c2_129 = arith.constant 2 : index
    %c0_130 = arith.constant 0 : index
    %c2_131 = arith.constant 2 : index
    %c1_132 = arith.constant 1 : index
    %454 = vector.load %arg2[%c0_128, %c2_129, %c0_130, %c2_131, %c1_132] : memref<2x4x1x10x18xf32, #tpu.memory_space<vmem>>, vector<1x1x1x8x16xf32>
    %455 = vector.shape_cast %454 : vector<1x1x1x8x16xf32> to vector<8x16xf32>
    %c120 = arith.constant 120 : index
    %456 = memref.load %arg3[%c120] : memref<144xf32, #tpu.memory_space<smem>>
    %457 = vector.broadcast %456 : f32 to vector<8x16xf32>
    %458 = arith.mulf %457, %455 : vector<8x16xf32>
    %459 = arith.addf %441, %458 : vector<8x16xf32>
    %c121 = arith.constant 121 : index
    %460 = memref.load %arg3[%c121] : memref<144xf32, #tpu.memory_space<smem>>
    %461 = vector.broadcast %460 : f32 to vector<8x16xf32>
    %462 = arith.mulf %461, %455 : vector<8x16xf32>
    %463 = arith.addf %445, %462 : vector<8x16xf32>
    %c122 = arith.constant 122 : index
    %464 = memref.load %arg3[%c122] : memref<144xf32, #tpu.memory_space<smem>>
    %465 = vector.broadcast %464 : f32 to vector<8x16xf32>
    %466 = arith.mulf %465, %455 : vector<8x16xf32>
    %467 = arith.addf %449, %466 : vector<8x16xf32>
    %c123 = arith.constant 123 : index
    %468 = memref.load %arg3[%c123] : memref<144xf32, #tpu.memory_space<smem>>
    %469 = vector.broadcast %468 : f32 to vector<8x16xf32>
    %470 = arith.mulf %469, %455 : vector<8x16xf32>
    %471 = arith.addf %453, %470 : vector<8x16xf32>
    %c0_133 = arith.constant 0 : index
    %c2_134 = arith.constant 2 : index
    %c0_135 = arith.constant 0 : index
    %c2_136 = arith.constant 2 : index
    %c2_137 = arith.constant 2 : index
    %472 = vector.load %arg2[%c0_133, %c2_134, %c0_135, %c2_136, %c2_137] : memref<2x4x1x10x18xf32, #tpu.memory_space<vmem>>, vector<1x1x1x8x16xf32>
    %473 = vector.shape_cast %472 : vector<1x1x1x8x16xf32> to vector<8x16xf32>
    %c136 = arith.constant 136 : index
    %474 = memref.load %arg3[%c136] : memref<144xf32, #tpu.memory_space<smem>>
    %475 = vector.broadcast %474 : f32 to vector<8x16xf32>
    %476 = arith.mulf %475, %473 : vector<8x16xf32>
    %477 = arith.addf %459, %476 : vector<8x16xf32>
    %c137 = arith.constant 137 : index
    %478 = memref.load %arg3[%c137] : memref<144xf32, #tpu.memory_space<smem>>
    %479 = vector.broadcast %478 : f32 to vector<8x16xf32>
    %480 = arith.mulf %479, %473 : vector<8x16xf32>
    %481 = arith.addf %463, %480 : vector<8x16xf32>
    %c138 = arith.constant 138 : index
    %482 = memref.load %arg3[%c138] : memref<144xf32, #tpu.memory_space<smem>>
    %483 = vector.broadcast %482 : f32 to vector<8x16xf32>
    %484 = arith.mulf %483, %473 : vector<8x16xf32>
    %485 = arith.addf %467, %484 : vector<8x16xf32>
    %c139 = arith.constant 139 : index
    %486 = memref.load %arg3[%c139] : memref<144xf32, #tpu.memory_space<smem>>
    %487 = vector.broadcast %486 : f32 to vector<8x16xf32>
    %488 = arith.mulf %487, %473 : vector<8x16xf32>
    %489 = arith.addf %471, %488 : vector<8x16xf32>
    %c0_138 = arith.constant 0 : index
    %c3_139 = arith.constant 3 : index
    %c0_140 = arith.constant 0 : index
    %c0_141 = arith.constant 0 : index
    %c0_142 = arith.constant 0 : index
    %490 = vector.load %arg2[%c0_138, %c3_139, %c0_140, %c0_141, %c0_142] : memref<2x4x1x10x18xf32, #tpu.memory_space<vmem>>, vector<1x1x1x8x16xf32>
    %491 = vector.shape_cast %490 : vector<1x1x1x8x16xf32> to vector<8x16xf32>
    %c12 = arith.constant 12 : index
    %492 = memref.load %arg3[%c12] : memref<144xf32, #tpu.memory_space<smem>>
    %493 = vector.broadcast %492 : f32 to vector<8x16xf32>
    %494 = arith.mulf %493, %491 : vector<8x16xf32>
    %495 = arith.addf %477, %494 : vector<8x16xf32>
    %c13 = arith.constant 13 : index
    %496 = memref.load %arg3[%c13] : memref<144xf32, #tpu.memory_space<smem>>
    %497 = vector.broadcast %496 : f32 to vector<8x16xf32>
    %498 = arith.mulf %497, %491 : vector<8x16xf32>
    %499 = arith.addf %481, %498 : vector<8x16xf32>
    %c14 = arith.constant 14 : index
    %500 = memref.load %arg3[%c14] : memref<144xf32, #tpu.memory_space<smem>>
    %501 = vector.broadcast %500 : f32 to vector<8x16xf32>
    %502 = arith.mulf %501, %491 : vector<8x16xf32>
    %503 = arith.addf %485, %502 : vector<8x16xf32>
    %c15 = arith.constant 15 : index
    %504 = memref.load %arg3[%c15] : memref<144xf32, #tpu.memory_space<smem>>
    %505 = vector.broadcast %504 : f32 to vector<8x16xf32>
    %506 = arith.mulf %505, %491 : vector<8x16xf32>
    %507 = arith.addf %489, %506 : vector<8x16xf32>
    %c0_143 = arith.constant 0 : index
    %c3_144 = arith.constant 3 : index
    %c0_145 = arith.constant 0 : index
    %c0_146 = arith.constant 0 : index
    %c1_147 = arith.constant 1 : index
    %508 = vector.load %arg2[%c0_143, %c3_144, %c0_145, %c0_146, %c1_147] : memref<2x4x1x10x18xf32, #tpu.memory_space<vmem>>, vector<1x1x1x8x16xf32>
    %509 = vector.shape_cast %508 : vector<1x1x1x8x16xf32> to vector<8x16xf32>
    %c28 = arith.constant 28 : index
    %510 = memref.load %arg3[%c28] : memref<144xf32, #tpu.memory_space<smem>>
    %511 = vector.broadcast %510 : f32 to vector<8x16xf32>
    %512 = arith.mulf %511, %509 : vector<8x16xf32>
    %513 = arith.addf %495, %512 : vector<8x16xf32>
    %c29 = arith.constant 29 : index
    %514 = memref.load %arg3[%c29] : memref<144xf32, #tpu.memory_space<smem>>
    %515 = vector.broadcast %514 : f32 to vector<8x16xf32>
    %516 = arith.mulf %515, %509 : vector<8x16xf32>
    %517 = arith.addf %499, %516 : vector<8x16xf32>
    %c30 = arith.constant 30 : index
    %518 = memref.load %arg3[%c30] : memref<144xf32, #tpu.memory_space<smem>>
    %519 = vector.broadcast %518 : f32 to vector<8x16xf32>
    %520 = arith.mulf %519, %509 : vector<8x16xf32>
    %521 = arith.addf %503, %520 : vector<8x16xf32>
    %c31 = arith.constant 31 : index
    %522 = memref.load %arg3[%c31] : memref<144xf32, #tpu.memory_space<smem>>
    %523 = vector.broadcast %522 : f32 to vector<8x16xf32>
    %524 = arith.mulf %523, %509 : vector<8x16xf32>
    %525 = arith.addf %507, %524 : vector<8x16xf32>
    %c0_148 = arith.constant 0 : index
    %c3_149 = arith.constant 3 : index
    %c0_150 = arith.constant 0 : index
    %c0_151 = arith.constant 0 : index
    %c2_152 = arith.constant 2 : index
    %526 = vector.load %arg2[%c0_148, %c3_149, %c0_150, %c0_151, %c2_152] : memref<2x4x1x10x18xf32, #tpu.memory_space<vmem>>, vector<1x1x1x8x16xf32>
    %527 = vector.shape_cast %526 : vector<1x1x1x8x16xf32> to vector<8x16xf32>
    %c44 = arith.constant 44 : index
    %528 = memref.load %arg3[%c44] : memref<144xf32, #tpu.memory_space<smem>>
    %529 = vector.broadcast %528 : f32 to vector<8x16xf32>
    %530 = arith.mulf %529, %527 : vector<8x16xf32>
    %531 = arith.addf %513, %530 : vector<8x16xf32>
    %c45 = arith.constant 45 : index
    %532 = memref.load %arg3[%c45] : memref<144xf32, #tpu.memory_space<smem>>
    %533 = vector.broadcast %532 : f32 to vector<8x16xf32>
    %534 = arith.mulf %533, %527 : vector<8x16xf32>
    %535 = arith.addf %517, %534 : vector<8x16xf32>
    %c46 = arith.constant 46 : index
    %536 = memref.load %arg3[%c46] : memref<144xf32, #tpu.memory_space<smem>>
    %537 = vector.broadcast %536 : f32 to vector<8x16xf32>
    %538 = arith.mulf %537, %527 : vector<8x16xf32>
    %539 = arith.addf %521, %538 : vector<8x16xf32>
    %c47 = arith.constant 47 : index
    %540 = memref.load %arg3[%c47] : memref<144xf32, #tpu.memory_space<smem>>
    %541 = vector.broadcast %540 : f32 to vector<8x16xf32>
    %542 = arith.mulf %541, %527 : vector<8x16xf32>
    %543 = arith.addf %525, %542 : vector<8x16xf32>
    %c0_153 = arith.constant 0 : index
    %c3_154 = arith.constant 3 : index
    %c0_155 = arith.constant 0 : index
    %c1_156 = arith.constant 1 : index
    %c0_157 = arith.constant 0 : index
    %544 = vector.load %arg2[%c0_153, %c3_154, %c0_155, %c1_156, %c0_157] : memref<2x4x1x10x18xf32, #tpu.memory_space<vmem>>, vector<1x1x1x8x16xf32>
    %545 = vector.shape_cast %544 : vector<1x1x1x8x16xf32> to vector<8x16xf32>
    %c60 = arith.constant 60 : index
    %546 = memref.load %arg3[%c60] : memref<144xf32, #tpu.memory_space<smem>>
    %547 = vector.broadcast %546 : f32 to vector<8x16xf32>
    %548 = arith.mulf %547, %545 : vector<8x16xf32>
    %549 = arith.addf %531, %548 : vector<8x16xf32>
    %c61 = arith.constant 61 : index
    %550 = memref.load %arg3[%c61] : memref<144xf32, #tpu.memory_space<smem>>
    %551 = vector.broadcast %550 : f32 to vector<8x16xf32>
    %552 = arith.mulf %551, %545 : vector<8x16xf32>
    %553 = arith.addf %535, %552 : vector<8x16xf32>
    %c62 = arith.constant 62 : index
    %554 = memref.load %arg3[%c62] : memref<144xf32, #tpu.memory_space<smem>>
    %555 = vector.broadcast %554 : f32 to vector<8x16xf32>
    %556 = arith.mulf %555, %545 : vector<8x16xf32>
    %557 = arith.addf %539, %556 : vector<8x16xf32>
    %c63 = arith.constant 63 : index
    %558 = memref.load %arg3[%c63] : memref<144xf32, #tpu.memory_space<smem>>
    %559 = vector.broadcast %558 : f32 to vector<8x16xf32>
    %560 = arith.mulf %559, %545 : vector<8x16xf32>
    %561 = arith.addf %543, %560 : vector<8x16xf32>
    %c0_158 = arith.constant 0 : index
    %c3_159 = arith.constant 3 : index
    %c0_160 = arith.constant 0 : index
    %c1_161 = arith.constant 1 : index
    %c1_162 = arith.constant 1 : index
    %562 = vector.load %arg2[%c0_158, %c3_159, %c0_160, %c1_161, %c1_162] : memref<2x4x1x10x18xf32, #tpu.memory_space<vmem>>, vector<1x1x1x8x16xf32>
    %563 = vector.shape_cast %562 : vector<1x1x1x8x16xf32> to vector<8x16xf32>
    %c76 = arith.constant 76 : index
    %564 = memref.load %arg3[%c76] : memref<144xf32, #tpu.memory_space<smem>>
    %565 = vector.broadcast %564 : f32 to vector<8x16xf32>
    %566 = arith.mulf %565, %563 : vector<8x16xf32>
    %567 = arith.addf %549, %566 : vector<8x16xf32>
    %c77 = arith.constant 77 : index
    %568 = memref.load %arg3[%c77] : memref<144xf32, #tpu.memory_space<smem>>
    %569 = vector.broadcast %568 : f32 to vector<8x16xf32>
    %570 = arith.mulf %569, %563 : vector<8x16xf32>
    %571 = arith.addf %553, %570 : vector<8x16xf32>
    %c78 = arith.constant 78 : index
    %572 = memref.load %arg3[%c78] : memref<144xf32, #tpu.memory_space<smem>>
    %573 = vector.broadcast %572 : f32 to vector<8x16xf32>
    %574 = arith.mulf %573, %563 : vector<8x16xf32>
    %575 = arith.addf %557, %574 : vector<8x16xf32>
    %c79 = arith.constant 79 : index
    %576 = memref.load %arg3[%c79] : memref<144xf32, #tpu.memory_space<smem>>
    %577 = vector.broadcast %576 : f32 to vector<8x16xf32>
    %578 = arith.mulf %577, %563 : vector<8x16xf32>
    %579 = arith.addf %561, %578 : vector<8x16xf32>
    %c0_163 = arith.constant 0 : index
    %c3_164 = arith.constant 3 : index
    %c0_165 = arith.constant 0 : index
    %c1_166 = arith.constant 1 : index
    %c2_167 = arith.constant 2 : index
    %580 = vector.load %arg2[%c0_163, %c3_164, %c0_165, %c1_166, %c2_167] : memref<2x4x1x10x18xf32, #tpu.memory_space<vmem>>, vector<1x1x1x8x16xf32>
    %581 = vector.shape_cast %580 : vector<1x1x1x8x16xf32> to vector<8x16xf32>
    %c92 = arith.constant 92 : index
    %582 = memref.load %arg3[%c92] : memref<144xf32, #tpu.memory_space<smem>>
    %583 = vector.broadcast %582 : f32 to vector<8x16xf32>
    %584 = arith.mulf %583, %581 : vector<8x16xf32>
    %585 = arith.addf %567, %584 : vector<8x16xf32>
    %c93 = arith.constant 93 : index
    %586 = memref.load %arg3[%c93] : memref<144xf32, #tpu.memory_space<smem>>
    %587 = vector.broadcast %586 : f32 to vector<8x16xf32>
    %588 = arith.mulf %587, %581 : vector<8x16xf32>
    %589 = arith.addf %571, %588 : vector<8x16xf32>
    %c94 = arith.constant 94 : index
    %590 = memref.load %arg3[%c94] : memref<144xf32, #tpu.memory_space<smem>>
    %591 = vector.broadcast %590 : f32 to vector<8x16xf32>
    %592 = arith.mulf %591, %581 : vector<8x16xf32>
    %593 = arith.addf %575, %592 : vector<8x16xf32>
    %c95 = arith.constant 95 : index
    %594 = memref.load %arg3[%c95] : memref<144xf32, #tpu.memory_space<smem>>
    %595 = vector.broadcast %594 : f32 to vector<8x16xf32>
    %596 = arith.mulf %595, %581 : vector<8x16xf32>
    %597 = arith.addf %579, %596 : vector<8x16xf32>
    %c0_168 = arith.constant 0 : index
    %c3_169 = arith.constant 3 : index
    %c0_170 = arith.constant 0 : index
    %c2_171 = arith.constant 2 : index
    %c0_172 = arith.constant 0 : index
    %598 = vector.load %arg2[%c0_168, %c3_169, %c0_170, %c2_171, %c0_172] : memref<2x4x1x10x18xf32, #tpu.memory_space<vmem>>, vector<1x1x1x8x16xf32>
    %599 = vector.shape_cast %598 : vector<1x1x1x8x16xf32> to vector<8x16xf32>
    %c108 = arith.constant 108 : index
    %600 = memref.load %arg3[%c108] : memref<144xf32, #tpu.memory_space<smem>>
    %601 = vector.broadcast %600 : f32 to vector<8x16xf32>
    %602 = arith.mulf %601, %599 : vector<8x16xf32>
    %603 = arith.addf %585, %602 : vector<8x16xf32>
    %c109 = arith.constant 109 : index
    %604 = memref.load %arg3[%c109] : memref<144xf32, #tpu.memory_space<smem>>
    %605 = vector.broadcast %604 : f32 to vector<8x16xf32>
    %606 = arith.mulf %605, %599 : vector<8x16xf32>
    %607 = arith.addf %589, %606 : vector<8x16xf32>
    %c110 = arith.constant 110 : index
    %608 = memref.load %arg3[%c110] : memref<144xf32, #tpu.memory_space<smem>>
    %609 = vector.broadcast %608 : f32 to vector<8x16xf32>
    %610 = arith.mulf %609, %599 : vector<8x16xf32>
    %611 = arith.addf %593, %610 : vector<8x16xf32>
    %c111 = arith.constant 111 : index
    %612 = memref.load %arg3[%c111] : memref<144xf32, #tpu.memory_space<smem>>
    %613 = vector.broadcast %612 : f32 to vector<8x16xf32>
    %614 = arith.mulf %613, %599 : vector<8x16xf32>
    %615 = arith.addf %597, %614 : vector<8x16xf32>
    %c0_173 = arith.constant 0 : index
    %c3_174 = arith.constant 3 : index
    %c0_175 = arith.constant 0 : index
    %c2_176 = arith.constant 2 : index
    %c1_177 = arith.constant 1 : index
    %616 = vector.load %arg2[%c0_173, %c3_174, %c0_175, %c2_176, %c1_177] : memref<2x4x1x10x18xf32, #tpu.memory_space<vmem>>, vector<1x1x1x8x16xf32>
    %617 = vector.shape_cast %616 : vector<1x1x1x8x16xf32> to vector<8x16xf32>
    %c124 = arith.constant 124 : index
    %618 = memref.load %arg3[%c124] : memref<144xf32, #tpu.memory_space<smem>>
    %619 = vector.broadcast %618 : f32 to vector<8x16xf32>
    %620 = arith.mulf %619, %617 : vector<8x16xf32>
    %621 = arith.addf %603, %620 : vector<8x16xf32>
    %c125 = arith.constant 125 : index
    %622 = memref.load %arg3[%c125] : memref<144xf32, #tpu.memory_space<smem>>
    %623 = vector.broadcast %622 : f32 to vector<8x16xf32>
    %624 = arith.mulf %623, %617 : vector<8x16xf32>
    %625 = arith.addf %607, %624 : vector<8x16xf32>
    %c126 = arith.constant 126 : index
    %626 = memref.load %arg3[%c126] : memref<144xf32, #tpu.memory_space<smem>>
    %627 = vector.broadcast %626 : f32 to vector<8x16xf32>
    %628 = arith.mulf %627, %617 : vector<8x16xf32>
    %629 = arith.addf %611, %628 : vector<8x16xf32>
    %c127 = arith.constant 127 : index
    %630 = memref.load %arg3[%c127] : memref<144xf32, #tpu.memory_space<smem>>
    %631 = vector.broadcast %630 : f32 to vector<8x16xf32>
    %632 = arith.mulf %631, %617 : vector<8x16xf32>
    %633 = arith.addf %615, %632 : vector<8x16xf32>
    %c0_178 = arith.constant 0 : index
    %c3_179 = arith.constant 3 : index
    %c0_180 = arith.constant 0 : index
    %c2_181 = arith.constant 2 : index
    %c2_182 = arith.constant 2 : index
    %634 = vector.load %arg2[%c0_178, %c3_179, %c0_180, %c2_181, %c2_182] : memref<2x4x1x10x18xf32, #tpu.memory_space<vmem>>, vector<1x1x1x8x16xf32>
    %635 = vector.shape_cast %634 : vector<1x1x1x8x16xf32> to vector<8x16xf32>
    %c140 = arith.constant 140 : index
    %636 = memref.load %arg3[%c140] : memref<144xf32, #tpu.memory_space<smem>>
    %637 = vector.broadcast %636 : f32 to vector<8x16xf32>
    %638 = arith.mulf %637, %635 : vector<8x16xf32>
    %639 = arith.addf %621, %638 : vector<8x16xf32>
    %c141 = arith.constant 141 : index
    %640 = memref.load %arg3[%c141] : memref<144xf32, #tpu.memory_space<smem>>
    %641 = vector.broadcast %640 : f32 to vector<8x16xf32>
    %642 = arith.mulf %641, %635 : vector<8x16xf32>
    %643 = arith.addf %625, %642 : vector<8x16xf32>
    %c142 = arith.constant 142 : index
    %644 = memref.load %arg3[%c142] : memref<144xf32, #tpu.memory_space<smem>>
    %645 = vector.broadcast %644 : f32 to vector<8x16xf32>
    %646 = arith.mulf %645, %635 : vector<8x16xf32>
    %647 = arith.addf %629, %646 : vector<8x16xf32>
    %c143 = arith.constant 143 : index
    %648 = memref.load %arg3[%c143] : memref<144xf32, #tpu.memory_space<smem>>
    %649 = vector.broadcast %648 : f32 to vector<8x16xf32>
    %650 = arith.mulf %649, %635 : vector<8x16xf32>
    %651 = arith.addf %633, %650 : vector<8x16xf32>
    %c0_183 = arith.constant 0 : index
    %652 = memref.load %arg4[%c0_183] : memref<4xf32, #tpu.memory_space<smem>>
    %653 = vector.broadcast %652 : f32 to vector<8x16xf32>
    %654 = arith.addf %639, %653 : vector<8x16xf32>
    %c0_184 = arith.constant 0 : index
    %c0_185 = arith.constant 0 : index
    %c0_186 = arith.constant 0 : index
    %c1_187 = arith.constant 1 : index
    %c1_188 = arith.constant 1 : index
    %655 = vector.load %arg2[%c0_184, %c0_185, %c0_186, %c1_187, %c1_188] : memref<2x4x1x10x18xf32, #tpu.memory_space<vmem>>, vector<1x1x1x8x16xf32>
    %656 = vector.shape_cast %655 : vector<1x1x1x8x16xf32> to vector<8x16xf32>
    %cst_189 = arith.constant 1.000000e+00 : f32
    %657 = vector.broadcast %cst_189 : f32 to vector<8x16xf32>
    %658 = arith.mulf %657, %656 : vector<8x16xf32>
    %659 = arith.addf %654, %658 : vector<8x16xf32>
    %c0_190 = arith.constant 0 : index
    %c0_191 = arith.constant 0 : index
    %c0_192 = arith.constant 0 : index
    %c0_193 = arith.constant 0 : index
    %660 = vector.load %arg5[%c0_190, %c0_191, %c0_192, %c0_193] : memref<2x4x8x16xf32, #tpu.memory_space<vmem>>, vector<1x1x8x16xf32>
    %661 = vector.shape_cast %660 : vector<1x1x8x16xf32> to vector<8x16xf32>
    %662 = vector.shape_cast %659 : vector<8x16xf32> to vector<1x1x8x16xf32>
    tpu.vector_store %arg5[%c0_190, %c0_191, %c0_192, %c0_193], %662 {strides = array<i32>} : memref<2x4x8x16xf32, #tpu.memory_space<vmem>>, vector<1x1x8x16xf32>,
    %c1_194 = arith.constant 1 : index
    %663 = memref.load %arg4[%c1_194] : memref<4xf32, #tpu.memory_space<smem>>
    %664 = vector.broadcast %663 : f32 to vector<8x16xf32>
    %665 = arith.addf %643, %664 : vector<8x16xf32>
    %c0_195 = arith.constant 0 : index
    %c1_196 = arith.constant 1 : index
    %c0_197 = arith.constant 0 : index
    %c1_198 = arith.constant 1 : index
    %c1_199 = arith.constant 1 : index
    %666 = vector.load %arg2[%c0_195, %c1_196, %c0_197, %c1_198, %c1_199] : memref<2x4x1x10x18xf32, #tpu.memory_space<vmem>>, vector<1x1x1x8x16xf32>
    %667 = vector.shape_cast %666 : vector<1x1x1x8x16xf32> to vector<8x16xf32>
    %cst_200 = arith.constant 1.000000e+00 : f32
    %668 = vector.broadcast %cst_200 : f32 to vector<8x16xf32>
    %669 = arith.mulf %668, %667 : vector<8x16xf32>
    %670 = arith.addf %665, %669 : vector<8x16xf32>
    %c0_201 = arith.constant 0 : index
    %c1_202 = arith.constant 1 : index
    %c0_203 = arith.constant 0 : index
    %c0_204 = arith.constant 0 : index
    %671 = vector.load %arg5[%c0_201, %c1_202, %c0_203, %c0_204] : memref<2x4x8x16xf32, #tpu.memory_space<vmem>>, vector<1x1x8x16xf32>
    %672 = vector.shape_cast %671 : vector<1x1x8x16xf32> to vector<8x16xf32>
    %673 = vector.shape_cast %670 : vector<8x16xf32> to vector<1x1x8x16xf32>
    tpu.vector_store %arg5[%c0_201, %c1_202, %c0_203, %c0_204], %673 {strides = array<i32>} : memref<2x4x8x16xf32, #tpu.memory_space<vmem>>, vector<1x1x8x16xf32>,
    %c2_205 = arith.constant 2 : index
    %674 = memref.load %arg4[%c2_205] : memref<4xf32, #tpu.memory_space<smem>>
    %675 = vector.broadcast %674 : f32 to vector<8x16xf32>
    %676 = arith.addf %647, %675 : vector<8x16xf32>
    %c0_206 = arith.constant 0 : index
    %c2_207 = arith.constant 2 : index
    %c0_208 = arith.constant 0 : index
    %c1_209 = arith.constant 1 : index
    %c1_210 = arith.constant 1 : index
    %677 = vector.load %arg2[%c0_206, %c2_207, %c0_208, %c1_209, %c1_210] : memref<2x4x1x10x18xf32, #tpu.memory_space<vmem>>, vector<1x1x1x8x16xf32>
    %678 = vector.shape_cast %677 : vector<1x1x1x8x16xf32> to vector<8x16xf32>
    %cst_211 = arith.constant 1.000000e+00 : f32
    %679 = vector.broadcast %cst_211 : f32 to vector<8x16xf32>
    %680 = arith.mulf %679, %678 : vector<8x16xf32>
    %681 = arith.addf %676, %680 : vector<8x16xf32>
    %c0_212 = arith.constant 0 : index
    %c2_213 = arith.constant 2 : index
    %c0_214 = arith.constant 0 : index
    %c0_215 = arith.constant 0 : index
    %682 = vector.load %arg5[%c0_212, %c2_213, %c0_214, %c0_215] : memref<2x4x8x16xf32, #tpu.memory_space<vmem>>, vector<1x1x8x16xf32>
    %683 = vector.shape_cast %682 : vector<1x1x8x16xf32> to vector<8x16xf32>
    %684 = vector.shape_cast %681 : vector<8x16xf32> to vector<1x1x8x16xf32>
    tpu.vector_store %arg5[%c0_212, %c2_213, %c0_214, %c0_215], %684 {strides = array<i32>} : memref<2x4x8x16xf32, #tpu.memory_space<vmem>>, vector<1x1x8x16xf32>,
    %c3_216 = arith.constant 3 : index
    %685 = memref.load %arg4[%c3_216] : memref<4xf32, #tpu.memory_space<smem>>
    %686 = vector.broadcast %685 : f32 to vector<8x16xf32>
    %687 = arith.addf %651, %686 : vector<8x16xf32>
    %c0_217 = arith.constant 0 : index
    %c3_218 = arith.constant 3 : index
    %c0_219 = arith.constant 0 : index
    %c1_220 = arith.constant 1 : index
    %c1_221 = arith.constant 1 : index
    %688 = vector.load %arg2[%c0_217, %c3_218, %c0_219, %c1_220, %c1_221] : memref<2x4x1x10x18xf32, #tpu.memory_space<vmem>>, vector<1x1x1x8x16xf32>
    %689 = vector.shape_cast %688 : vector<1x1x1x8x16xf32> to vector<8x16xf32>
    %cst_222 = arith.constant 1.000000e+00 : f32
    %690 = vector.broadcast %cst_222 : f32 to vector<8x16xf32>
    %691 = arith.mulf %690, %689 : vector<8x16xf32>
    %692 = arith.addf %687, %691 : vector<8x16xf32>
    %c0_223 = arith.constant 0 : index
    %c3_224 = arith.constant 3 : index
    %c0_225 = arith.constant 0 : index
    %c0_226 = arith.constant 0 : index
    %693 = vector.load %arg5[%c0_223, %c3_224, %c0_225, %c0_226] : memref<2x4x8x16xf32, #tpu.memory_space<vmem>>, vector<1x1x8x16xf32>
    %694 = vector.shape_cast %693 : vector<1x1x8x16xf32> to vector<8x16xf32>
    %695 = vector.shape_cast %692 : vector<8x16xf32> to vector<1x1x8x16xf32>
    tpu.vector_store %arg5[%c0_223, %c3_224, %c0_225, %c0_226], %695 {strides = array<i32>} : memref<2x4x8x16xf32, #tpu.memory_space<vmem>>, vector<1x1x8x16xf32>,
    %cst_227 = arith.constant 0.000000e+00 : f32
    %696 = vector.broadcast %cst_227 : f32 to vector<8x16xf32>
    %cst_228 = arith.constant 0.000000e+00 : f32
    %697 = vector.broadcast %cst_228 : f32 to vector<8x16xf32>
    %cst_229 = arith.constant 0.000000e+00 : f32
    %698 = vector.broadcast %cst_229 : f32 to vector<8x16xf32>
    %cst_230 = arith.constant 0.000000e+00 : f32
    %699 = vector.broadcast %cst_230 : f32 to vector<8x16xf32>
    %c1_231 = arith.constant 1 : index
    %c0_232 = arith.constant 0 : index
    %c0_233 = arith.constant 0 : index
    %c0_234 = arith.constant 0 : index
    %c0_235 = arith.constant 0 : index
    %700 = vector.load %arg2[%c1_231, %c0_232, %c0_233, %c0_234, %c0_235] : memref<2x4x1x10x18xf32, #tpu.memory_space<vmem>>, vector<1x1x1x8x16xf32>
    %701 = vector.shape_cast %700 : vector<1x1x1x8x16xf32> to vector<8x16xf32>
    %c0_236 = arith.constant 0 : index
    %702 = memref.load %arg3[%c0_236] : memref<144xf32, #tpu.memory_space<smem>>
    %703 = vector.broadcast %702 : f32 to vector<8x16xf32>
    %704 = arith.mulf %703, %701 : vector<8x16xf32>
    %705 = arith.addf %696, %704 : vector<8x16xf32>
    %c1_237 = arith.constant 1 : index
    %706 = memref.load %arg3[%c1_237] : memref<144xf32, #tpu.memory_space<smem>>
    %707 = vector.broadcast %706 : f32 to vector<8x16xf32>
    %708 = arith.mulf %707, %701 : vector<8x16xf32>
    %709 = arith.addf %697, %708 : vector<8x16xf32>
    %c2_238 = arith.constant 2 : index
    %710 = memref.load %arg3[%c2_238] : memref<144xf32, #tpu.memory_space<smem>>
    %711 = vector.broadcast %710 : f32 to vector<8x16xf32>
    %712 = arith.mulf %711, %701 : vector<8x16xf32>
    %713 = arith.addf %698, %712 : vector<8x16xf32>
    %c3_239 = arith.constant 3 : index
    %714 = memref.load %arg3[%c3_239] : memref<144xf32, #tpu.memory_space<smem>>
    %715 = vector.broadcast %714 : f32 to vector<8x16xf32>
    %716 = arith.mulf %715, %701 : vector<8x16xf32>
    %717 = arith.addf %699, %716 : vector<8x16xf32>
    %c1_240 = arith.constant 1 : index
    %c0_241 = arith.constant 0 : index
    %c0_242 = arith.constant 0 : index
    %c0_243 = arith.constant 0 : index
    %c1_244 = arith.constant 1 : index
    %718 = vector.load %arg2[%c1_240, %c0_241, %c0_242, %c0_243, %c1_244] : memref<2x4x1x10x18xf32, #tpu.memory_space<vmem>>, vector<1x1x1x8x16xf32>
    %719 = vector.shape_cast %718 : vector<1x1x1x8x16xf32> to vector<8x16xf32>
    %c16_245 = arith.constant 16 : index
    %720 = memref.load %arg3[%c16_245] : memref<144xf32, #tpu.memory_space<smem>>
    %721 = vector.broadcast %720 : f32 to vector<8x16xf32>
    %722 = arith.mulf %721, %719 : vector<8x16xf32>
    %723 = arith.addf %705, %722 : vector<8x16xf32>
    %c17_246 = arith.constant 17 : index
    %724 = memref.load %arg3[%c17_246] : memref<144xf32, #tpu.memory_space<smem>>
    %725 = vector.broadcast %724 : f32 to vector<8x16xf32>
    %726 = arith.mulf %725, %719 : vector<8x16xf32>
    %727 = arith.addf %709, %726 : vector<8x16xf32>
    %c18_247 = arith.constant 18 : index
    %728 = memref.load %arg3[%c18_247] : memref<144xf32, #tpu.memory_space<smem>>
    %729 = vector.broadcast %728 : f32 to vector<8x16xf32>
    %730 = arith.mulf %729, %719 : vector<8x16xf32>
    %731 = arith.addf %713, %730 : vector<8x16xf32>
    %c19_248 = arith.constant 19 : index
    %732 = memref.load %arg3[%c19_248] : memref<144xf32, #tpu.memory_space<smem>>
    %733 = vector.broadcast %732 : f32 to vector<8x16xf32>
    %734 = arith.mulf %733, %719 : vector<8x16xf32>
    %735 = arith.addf %717, %734 : vector<8x16xf32>
    %c1_249 = arith.constant 1 : index
    %c0_250 = arith.constant 0 : index
    %c0_251 = arith.constant 0 : index
    %c0_252 = arith.constant 0 : index
    %c2_253 = arith.constant 2 : index
    %736 = vector.load %arg2[%c1_249, %c0_250, %c0_251, %c0_252, %c2_253] : memref<2x4x1x10x18xf32, #tpu.memory_space<vmem>>, vector<1x1x1x8x16xf32>
    %737 = vector.shape_cast %736 : vector<1x1x1x8x16xf32> to vector<8x16xf32>
    %c32_254 = arith.constant 32 : index
    %738 = memref.load %arg3[%c32_254] : memref<144xf32, #tpu.memory_space<smem>>
    %739 = vector.broadcast %738 : f32 to vector<8x16xf32>
    %740 = arith.mulf %739, %737 : vector<8x16xf32>
    %741 = arith.addf %723, %740 : vector<8x16xf32>
    %c33_255 = arith.constant 33 : index
    %742 = memref.load %arg3[%c33_255] : memref<144xf32, #tpu.memory_space<smem>>
    %743 = vector.broadcast %742 : f32 to vector<8x16xf32>
    %744 = arith.mulf %743, %737 : vector<8x16xf32>
    %745 = arith.addf %727, %744 : vector<8x16xf32>
    %c34_256 = arith.constant 34 : index
    %746 = memref.load %arg3[%c34_256] : memref<144xf32, #tpu.memory_space<smem>>
    %747 = vector.broadcast %746 : f32 to vector<8x16xf32>
    %748 = arith.mulf %747, %737 : vector<8x16xf32>
    %749 = arith.addf %731, %748 : vector<8x16xf32>
    %c35_257 = arith.constant 35 : index
    %750 = memref.load %arg3[%c35_257] : memref<144xf32, #tpu.memory_space<smem>>
    %751 = vector.broadcast %750 : f32 to vector<8x16xf32>
    %752 = arith.mulf %751, %737 : vector<8x16xf32>
    %753 = arith.addf %735, %752 : vector<8x16xf32>
    %c1_258 = arith.constant 1 : index
    %c0_259 = arith.constant 0 : index
    %c0_260 = arith.constant 0 : index
    %c1_261 = arith.constant 1 : index
    %c0_262 = arith.constant 0 : index
    %754 = vector.load %arg2[%c1_258, %c0_259, %c0_260, %c1_261, %c0_262] : memref<2x4x1x10x18xf32, #tpu.memory_space<vmem>>, vector<1x1x1x8x16xf32>
    %755 = vector.shape_cast %754 : vector<1x1x1x8x16xf32> to vector<8x16xf32>
    %c48_263 = arith.constant 48 : index
    %756 = memref.load %arg3[%c48_263] : memref<144xf32, #tpu.memory_space<smem>>
    %757 = vector.broadcast %756 : f32 to vector<8x16xf32>
    %758 = arith.mulf %757, %755 : vector<8x16xf32>
    %759 = arith.addf %741, %758 : vector<8x16xf32>
    %c49_264 = arith.constant 49 : index
    %760 = memref.load %arg3[%c49_264] : memref<144xf32, #tpu.memory_space<smem>>
    %761 = vector.broadcast %760 : f32 to vector<8x16xf32>
    %762 = arith.mulf %761, %755 : vector<8x16xf32>
    %763 = arith.addf %745, %762 : vector<8x16xf32>
    %c50_265 = arith.constant 50 : index
    %764 = memref.load %arg3[%c50_265] : memref<144xf32, #tpu.memory_space<smem>>
    %765 = vector.broadcast %764 : f32 to vector<8x16xf32>
    %766 = arith.mulf %765, %755 : vector<8x16xf32>
    %767 = arith.addf %749, %766 : vector<8x16xf32>
    %c51_266 = arith.constant 51 : index
    %768 = memref.load %arg3[%c51_266] : memref<144xf32, #tpu.memory_space<smem>>
    %769 = vector.broadcast %768 : f32 to vector<8x16xf32>
    %770 = arith.mulf %769, %755 : vector<8x16xf32>
    %771 = arith.addf %753, %770 : vector<8x16xf32>
    %c1_267 = arith.constant 1 : index
    %c0_268 = arith.constant 0 : index
    %c0_269 = arith.constant 0 : index
    %c1_270 = arith.constant 1 : index
    %c1_271 = arith.constant 1 : index
    %772 = vector.load %arg2[%c1_267, %c0_268, %c0_269, %c1_270, %c1_271] : memref<2x4x1x10x18xf32, #tpu.memory_space<vmem>>, vector<1x1x1x8x16xf32>
    %773 = vector.shape_cast %772 : vector<1x1x1x8x16xf32> to vector<8x16xf32>
    %c64_272 = arith.constant 64 : index
    %774 = memref.load %arg3[%c64_272] : memref<144xf32, #tpu.memory_space<smem>>
    %775 = vector.broadcast %774 : f32 to vector<8x16xf32>
    %776 = arith.mulf %775, %773 : vector<8x16xf32>
    %777 = arith.addf %759, %776 : vector<8x16xf32>
    %c65_273 = arith.constant 65 : index
    %778 = memref.load %arg3[%c65_273] : memref<144xf32, #tpu.memory_space<smem>>
    %779 = vector.broadcast %778 : f32 to vector<8x16xf32>
    %780 = arith.mulf %779, %773 : vector<8x16xf32>
    %781 = arith.addf %763, %780 : vector<8x16xf32>
    %c66_274 = arith.constant 66 : index
    %782 = memref.load %arg3[%c66_274] : memref<144xf32, #tpu.memory_space<smem>>
    %783 = vector.broadcast %782 : f32 to vector<8x16xf32>
    %784 = arith.mulf %783, %773 : vector<8x16xf32>
    %785 = arith.addf %767, %784 : vector<8x16xf32>
    %c67_275 = arith.constant 67 : index
    %786 = memref.load %arg3[%c67_275] : memref<144xf32, #tpu.memory_space<smem>>
    %787 = vector.broadcast %786 : f32 to vector<8x16xf32>
    %788 = arith.mulf %787, %773 : vector<8x16xf32>
    %789 = arith.addf %771, %788 : vector<8x16xf32>
    %c1_276 = arith.constant 1 : index
    %c0_277 = arith.constant 0 : index
    %c0_278 = arith.constant 0 : index
    %c1_279 = arith.constant 1 : index
    %c2_280 = arith.constant 2 : index
    %790 = vector.load %arg2[%c1_276, %c0_277, %c0_278, %c1_279, %c2_280] : memref<2x4x1x10x18xf32, #tpu.memory_space<vmem>>, vector<1x1x1x8x16xf32>
    %791 = vector.shape_cast %790 : vector<1x1x1x8x16xf32> to vector<8x16xf32>
    %c80_281 = arith.constant 80 : index
    %792 = memref.load %arg3[%c80_281] : memref<144xf32, #tpu.memory_space<smem>>
    %793 = vector.broadcast %792 : f32 to vector<8x16xf32>
    %794 = arith.mulf %793, %791 : vector<8x16xf32>
    %795 = arith.addf %777, %794 : vector<8x16xf32>
    %c81_282 = arith.constant 81 : index
    %796 = memref.load %arg3[%c81_282] : memref<144xf32, #tpu.memory_space<smem>>
    %797 = vector.broadcast %796 : f32 to vector<8x16xf32>
    %798 = arith.mulf %797, %791 : vector<8x16xf32>
    %799 = arith.addf %781, %798 : vector<8x16xf32>
    %c82_283 = arith.constant 82 : index
    %800 = memref.load %arg3[%c82_283] : memref<144xf32, #tpu.memory_space<smem>>
    %801 = vector.broadcast %800 : f32 to vector<8x16xf32>
    %802 = arith.mulf %801, %791 : vector<8x16xf32>
    %803 = arith.addf %785, %802 : vector<8x16xf32>
    %c83_284 = arith.constant 83 : index
    %804 = memref.load %arg3[%c83_284] : memref<144xf32, #tpu.memory_space<smem>>
    %805 = vector.broadcast %804 : f32 to vector<8x16xf32>
    %806 = arith.mulf %805, %791 : vector<8x16xf32>
    %807 = arith.addf %789, %806 : vector<8x16xf32>
    %c1_285 = arith.constant 1 : index
    %c0_286 = arith.constant 0 : index
    %c0_287 = arith.constant 0 : index
    %c2_288 = arith.constant 2 : index
    %c0_289 = arith.constant 0 : index
    %808 = vector.load %arg2[%c1_285, %c0_286, %c0_287, %c2_288, %c0_289] : memref<2x4x1x10x18xf32, #tpu.memory_space<vmem>>, vector<1x1x1x8x16xf32>
    %809 = vector.shape_cast %808 : vector<1x1x1x8x16xf32> to vector<8x16xf32>
    %c96_290 = arith.constant 96 : index
    %810 = memref.load %arg3[%c96_290] : memref<144xf32, #tpu.memory_space<smem>>
    %811 = vector.broadcast %810 : f32 to vector<8x16xf32>
    %812 = arith.mulf %811, %809 : vector<8x16xf32>
    %813 = arith.addf %795, %812 : vector<8x16xf32>
    %c97_291 = arith.constant 97 : index
    %814 = memref.load %arg3[%c97_291] : memref<144xf32, #tpu.memory_space<smem>>
    %815 = vector.broadcast %814 : f32 to vector<8x16xf32>
    %816 = arith.mulf %815, %809 : vector<8x16xf32>
    %817 = arith.addf %799, %816 : vector<8x16xf32>
    %c98_292 = arith.constant 98 : index
    %818 = memref.load %arg3[%c98_292] : memref<144xf32, #tpu.memory_space<smem>>
    %819 = vector.broadcast %818 : f32 to vector<8x16xf32>
    %820 = arith.mulf %819, %809 : vector<8x16xf32>
    %821 = arith.addf %803, %820 : vector<8x16xf32>
    %c99_293 = arith.constant 99 : index
    %822 = memref.load %arg3[%c99_293] : memref<144xf32, #tpu.memory_space<smem>>
    %823 = vector.broadcast %822 : f32 to vector<8x16xf32>
    %824 = arith.mulf %823, %809 : vector<8x16xf32>
    %825 = arith.addf %807, %824 : vector<8x16xf32>
    %c1_294 = arith.constant 1 : index
    %c0_295 = arith.constant 0 : index
    %c0_296 = arith.constant 0 : index
    %c2_297 = arith.constant 2 : index
    %c1_298 = arith.constant 1 : index
    %826 = vector.load %arg2[%c1_294, %c0_295, %c0_296, %c2_297, %c1_298] : memref<2x4x1x10x18xf32, #tpu.memory_space<vmem>>, vector<1x1x1x8x16xf32>
    %827 = vector.shape_cast %826 : vector<1x1x1x8x16xf32> to vector<8x16xf32>
    %c112_299 = arith.constant 112 : index
    %828 = memref.load %arg3[%c112_299] : memref<144xf32, #tpu.memory_space<smem>>
    %829 = vector.broadcast %828 : f32 to vector<8x16xf32>
    %830 = arith.mulf %829, %827 : vector<8x16xf32>
    %831 = arith.addf %813, %830 : vector<8x16xf32>
    %c113_300 = arith.constant 113 : index
    %832 = memref.load %arg3[%c113_300] : memref<144xf32, #tpu.memory_space<smem>>
    %833 = vector.broadcast %832 : f32 to vector<8x16xf32>
    %834 = arith.mulf %833, %827 : vector<8x16xf32>
    %835 = arith.addf %817, %834 : vector<8x16xf32>
    %c114_301 = arith.constant 114 : index
    %836 = memref.load %arg3[%c114_301] : memref<144xf32, #tpu.memory_space<smem>>
    %837 = vector.broadcast %836 : f32 to vector<8x16xf32>
    %838 = arith.mulf %837, %827 : vector<8x16xf32>
    %839 = arith.addf %821, %838 : vector<8x16xf32>
    %c115_302 = arith.constant 115 : index
    %840 = memref.load %arg3[%c115_302] : memref<144xf32, #tpu.memory_space<smem>>
    %841 = vector.broadcast %840 : f32 to vector<8x16xf32>
    %842 = arith.mulf %841, %827 : vector<8x16xf32>
    %843 = arith.addf %825, %842 : vector<8x16xf32>
    %c1_303 = arith.constant 1 : index
    %c0_304 = arith.constant 0 : index
    %c0_305 = arith.constant 0 : index
    %c2_306 = arith.constant 2 : index
    %c2_307 = arith.constant 2 : index
    %844 = vector.load %arg2[%c1_303, %c0_304, %c0_305, %c2_306, %c2_307] : memref<2x4x1x10x18xf32, #tpu.memory_space<vmem>>, vector<1x1x1x8x16xf32>
    %845 = vector.shape_cast %844 : vector<1x1x1x8x16xf32> to vector<8x16xf32>
    %c128_308 = arith.constant 128 : index
    %846 = memref.load %arg3[%c128_308] : memref<144xf32, #tpu.memory_space<smem>>
    %847 = vector.broadcast %846 : f32 to vector<8x16xf32>
    %848 = arith.mulf %847, %845 : vector<8x16xf32>
    %849 = arith.addf %831, %848 : vector<8x16xf32>
    %c129_309 = arith.constant 129 : index
    %850 = memref.load %arg3[%c129_309] : memref<144xf32, #tpu.memory_space<smem>>
    %851 = vector.broadcast %850 : f32 to vector<8x16xf32>
    %852 = arith.mulf %851, %845 : vector<8x16xf32>
    %853 = arith.addf %835, %852 : vector<8x16xf32>
    %c130_310 = arith.constant 130 : index
    %854 = memref.load %arg3[%c130_310] : memref<144xf32, #tpu.memory_space<smem>>
    %855 = vector.broadcast %854 : f32 to vector<8x16xf32>
    %856 = arith.mulf %855, %845 : vector<8x16xf32>
    %857 = arith.addf %839, %856 : vector<8x16xf32>
    %c131_311 = arith.constant 131 : index
    %858 = memref.load %arg3[%c131_311] : memref<144xf32, #tpu.memory_space<smem>>
    %859 = vector.broadcast %858 : f32 to vector<8x16xf32>
    %860 = arith.mulf %859, %845 : vector<8x16xf32>
    %861 = arith.addf %843, %860 : vector<8x16xf32>
    %c1_312 = arith.constant 1 : index
    %c1_313 = arith.constant 1 : index
    %c0_314 = arith.constant 0 : index
    %c0_315 = arith.constant 0 : index
    %c0_316 = arith.constant 0 : index
    %862 = vector.load %arg2[%c1_312, %c1_313, %c0_314, %c0_315, %c0_316] : memref<2x4x1x10x18xf32, #tpu.memory_space<vmem>>, vector<1x1x1x8x16xf32>
    %863 = vector.shape_cast %862 : vector<1x1x1x8x16xf32> to vector<8x16xf32>
    %c4_317 = arith.constant 4 : index
    %864 = memref.load %arg3[%c4_317] : memref<144xf32, #tpu.memory_space<smem>>
    %865 = vector.broadcast %864 : f32 to vector<8x16xf32>
    %866 = arith.mulf %865, %863 : vector<8x16xf32>
    %867 = arith.addf %849, %866 : vector<8x16xf32>
    %c5_318 = arith.constant 5 : index
    %868 = memref.load %arg3[%c5_318] : memref<144xf32, #tpu.memory_space<smem>>
    %869 = vector.broadcast %868 : f32 to vector<8x16xf32>
    %870 = arith.mulf %869, %863 : vector<8x16xf32>
    %871 = arith.addf %853, %870 : vector<8x16xf32>
    %c6_319 = arith.constant 6 : index
    %872 = memref.load %arg3[%c6_319] : memref<144xf32, #tpu.memory_space<smem>>
    %873 = vector.broadcast %872 : f32 to vector<8x16xf32>
    %874 = arith.mulf %873, %863 : vector<8x16xf32>
    %875 = arith.addf %857, %874 : vector<8x16xf32>
    %c7_320 = arith.constant 7 : index
    %876 = memref.load %arg3[%c7_320] : memref<144xf32, #tpu.memory_space<smem>>
    %877 = vector.broadcast %876 : f32 to vector<8x16xf32>
    %878 = arith.mulf %877, %863 : vector<8x16xf32>
    %879 = arith.addf %861, %878 : vector<8x16xf32>
    %c1_321 = arith.constant 1 : index
    %c1_322 = arith.constant 1 : index
    %c0_323 = arith.constant 0 : index
    %c0_324 = arith.constant 0 : index
    %c1_325 = arith.constant 1 : index
    %880 = vector.load %arg2[%c1_321, %c1_322, %c0_323, %c0_324, %c1_325] : memref<2x4x1x10x18xf32, #tpu.memory_space<vmem>>, vector<1x1x1x8x16xf32>
    %881 = vector.shape_cast %880 : vector<1x1x1x8x16xf32> to vector<8x16xf32>
    %c20_326 = arith.constant 20 : index
    %882 = memref.load %arg3[%c20_326] : memref<144xf32, #tpu.memory_space<smem>>
    %883 = vector.broadcast %882 : f32 to vector<8x16xf32>
    %884 = arith.mulf %883, %881 : vector<8x16xf32>
    %885 = arith.addf %867, %884 : vector<8x16xf32>
    %c21_327 = arith.constant 21 : index
    %886 = memref.load %arg3[%c21_327] : memref<144xf32, #tpu.memory_space<smem>>
    %887 = vector.broadcast %886 : f32 to vector<8x16xf32>
    %888 = arith.mulf %887, %881 : vector<8x16xf32>
    %889 = arith.addf %871, %888 : vector<8x16xf32>
    %c22_328 = arith.constant 22 : index
    %890 = memref.load %arg3[%c22_328] : memref<144xf32, #tpu.memory_space<smem>>
    %891 = vector.broadcast %890 : f32 to vector<8x16xf32>
    %892 = arith.mulf %891, %881 : vector<8x16xf32>
    %893 = arith.addf %875, %892 : vector<8x16xf32>
    %c23_329 = arith.constant 23 : index
    %894 = memref.load %arg3[%c23_329] : memref<144xf32, #tpu.memory_space<smem>>
    %895 = vector.broadcast %894 : f32 to vector<8x16xf32>
    %896 = arith.mulf %895, %881 : vector<8x16xf32>
    %897 = arith.addf %879, %896 : vector<8x16xf32>
    %c1_330 = arith.constant 1 : index
    %c1_331 = arith.constant 1 : index
    %c0_332 = arith.constant 0 : index
    %c0_333 = arith.constant 0 : index
    %c2_334 = arith.constant 2 : index
    %898 = vector.load %arg2[%c1_330, %c1_331, %c0_332, %c0_333, %c2_334] : memref<2x4x1x10x18xf32, #tpu.memory_space<vmem>>, vector<1x1x1x8x16xf32>
    %899 = vector.shape_cast %898 : vector<1x1x1x8x16xf32> to vector<8x16xf32>
    %c36_335 = arith.constant 36 : index
    %900 = memref.load %arg3[%c36_335] : memref<144xf32, #tpu.memory_space<smem>>
    %901 = vector.broadcast %900 : f32 to vector<8x16xf32>
    %902 = arith.mulf %901, %899 : vector<8x16xf32>
    %903 = arith.addf %885, %902 : vector<8x16xf32>
    %c37_336 = arith.constant 37 : index
    %904 = memref.load %arg3[%c37_336] : memref<144xf32, #tpu.memory_space<smem>>
    %905 = vector.broadcast %904 : f32 to vector<8x16xf32>
    %906 = arith.mulf %905, %899 : vector<8x16xf32>
    %907 = arith.addf %889, %906 : vector<8x16xf32>
    %c38_337 = arith.constant 38 : index
    %908 = memref.load %arg3[%c38_337] : memref<144xf32, #tpu.memory_space<smem>>
    %909 = vector.broadcast %908 : f32 to vector<8x16xf32>
    %910 = arith.mulf %909, %899 : vector<8x16xf32>
    %911 = arith.addf %893, %910 : vector<8x16xf32>
    %c39_338 = arith.constant 39 : index
    %912 = memref.load %arg3[%c39_338] : memref<144xf32, #tpu.memory_space<smem>>
    %913 = vector.broadcast %912 : f32 to vector<8x16xf32>
    %914 = arith.mulf %913, %899 : vector<8x16xf32>
    %915 = arith.addf %897, %914 : vector<8x16xf32>
    %c1_339 = arith.constant 1 : index
    %c1_340 = arith.constant 1 : index
    %c0_341 = arith.constant 0 : index
    %c1_342 = arith.constant 1 : index
    %c0_343 = arith.constant 0 : index
    %916 = vector.load %arg2[%c1_339, %c1_340, %c0_341, %c1_342, %c0_343] : memref<2x4x1x10x18xf32, #tpu.memory_space<vmem>>, vector<1x1x1x8x16xf32>
    %917 = vector.shape_cast %916 : vector<1x1x1x8x16xf32> to vector<8x16xf32>
    %c52_344 = arith.constant 52 : index
    %918 = memref.load %arg3[%c52_344] : memref<144xf32, #tpu.memory_space<smem>>
    %919 = vector.broadcast %918 : f32 to vector<8x16xf32>
    %920 = arith.mulf %919, %917 : vector<8x16xf32>
    %921 = arith.addf %903, %920 : vector<8x16xf32>
    %c53_345 = arith.constant 53 : index
    %922 = memref.load %arg3[%c53_345] : memref<144xf32, #tpu.memory_space<smem>>
    %923 = vector.broadcast %922 : f32 to vector<8x16xf32>
    %924 = arith.mulf %923, %917 : vector<8x16xf32>
    %925 = arith.addf %907, %924 : vector<8x16xf32>
    %c54_346 = arith.constant 54 : index
    %926 = memref.load %arg3[%c54_346] : memref<144xf32, #tpu.memory_space<smem>>
    %927 = vector.broadcast %926 : f32 to vector<8x16xf32>
    %928 = arith.mulf %927, %917 : vector<8x16xf32>
    %929 = arith.addf %911, %928 : vector<8x16xf32>
    %c55_347 = arith.constant 55 : index
    %930 = memref.load %arg3[%c55_347] : memref<144xf32, #tpu.memory_space<smem>>
    %931 = vector.broadcast %930 : f32 to vector<8x16xf32>
    %932 = arith.mulf %931, %917 : vector<8x16xf32>
    %933 = arith.addf %915, %932 : vector<8x16xf32>
    %c1_348 = arith.constant 1 : index
    %c1_349 = arith.constant 1 : index
    %c0_350 = arith.constant 0 : index
    %c1_351 = arith.constant 1 : index
    %c1_352 = arith.constant 1 : index
    %934 = vector.load %arg2[%c1_348, %c1_349, %c0_350, %c1_351, %c1_352] : memref<2x4x1x10x18xf32, #tpu.memory_space<vmem>>, vector<1x1x1x8x16xf32>
    %935 = vector.shape_cast %934 : vector<1x1x1x8x16xf32> to vector<8x16xf32>
    %c68_353 = arith.constant 68 : index
    %936 = memref.load %arg3[%c68_353] : memref<144xf32, #tpu.memory_space<smem>>
    %937 = vector.broadcast %936 : f32 to vector<8x16xf32>
    %938 = arith.mulf %937, %935 : vector<8x16xf32>
    %939 = arith.addf %921, %938 : vector<8x16xf32>
    %c69_354 = arith.constant 69 : index
    %940 = memref.load %arg3[%c69_354] : memref<144xf32, #tpu.memory_space<smem>>
    %941 = vector.broadcast %940 : f32 to vector<8x16xf32>
    %942 = arith.mulf %941, %935 : vector<8x16xf32>
    %943 = arith.addf %925, %942 : vector<8x16xf32>
    %c70_355 = arith.constant 70 : index
    %944 = memref.load %arg3[%c70_355] : memref<144xf32, #tpu.memory_space<smem>>
    %945 = vector.broadcast %944 : f32 to vector<8x16xf32>
    %946 = arith.mulf %945, %935 : vector<8x16xf32>
    %947 = arith.addf %929, %946 : vector<8x16xf32>
    %c71_356 = arith.constant 71 : index
    %948 = memref.load %arg3[%c71_356] : memref<144xf32, #tpu.memory_space<smem>>
    %949 = vector.broadcast %948 : f32 to vector<8x16xf32>
    %950 = arith.mulf %949, %935 : vector<8x16xf32>
    %951 = arith.addf %933, %950 : vector<8x16xf32>
    %c1_357 = arith.constant 1 : index
    %c1_358 = arith.constant 1 : index
    %c0_359 = arith.constant 0 : index
    %c1_360 = arith.constant 1 : index
    %c2_361 = arith.constant 2 : index
    %952 = vector.load %arg2[%c1_357, %c1_358, %c0_359, %c1_360, %c2_361] : memref<2x4x1x10x18xf32, #tpu.memory_space<vmem>>, vector<1x1x1x8x16xf32>
    %953 = vector.shape_cast %952 : vector<1x1x1x8x16xf32> to vector<8x16xf32>
    %c84_362 = arith.constant 84 : index
    %954 = memref.load %arg3[%c84_362] : memref<144xf32, #tpu.memory_space<smem>>
    %955 = vector.broadcast %954 : f32 to vector<8x16xf32>
    %956 = arith.mulf %955, %953 : vector<8x16xf32>
    %957 = arith.addf %939, %956 : vector<8x16xf32>
    %c85_363 = arith.constant 85 : index
    %958 = memref.load %arg3[%c85_363] : memref<144xf32, #tpu.memory_space<smem>>
    %959 = vector.broadcast %958 : f32 to vector<8x16xf32>
    %960 = arith.mulf %959, %953 : vector<8x16xf32>
    %961 = arith.addf %943, %960 : vector<8x16xf32>
    %c86_364 = arith.constant 86 : index
    %962 = memref.load %arg3[%c86_364] : memref<144xf32, #tpu.memory_space<smem>>
    %963 = vector.broadcast %962 : f32 to vector<8x16xf32>
    %964 = arith.mulf %963, %953 : vector<8x16xf32>
    %965 = arith.addf %947, %964 : vector<8x16xf32>
    %c87_365 = arith.constant 87 : index
    %966 = memref.load %arg3[%c87_365] : memref<144xf32, #tpu.memory_space<smem>>
    %967 = vector.broadcast %966 : f32 to vector<8x16xf32>
    %968 = arith.mulf %967, %953 : vector<8x16xf32>
    %969 = arith.addf %951, %968 : vector<8x16xf32>
    %c1_366 = arith.constant 1 : index
    %c1_367 = arith.constant 1 : index
    %c0_368 = arith.constant 0 : index
    %c2_369 = arith.constant 2 : index
    %c0_370 = arith.constant 0 : index
    %970 = vector.load %arg2[%c1_366, %c1_367, %c0_368, %c2_369, %c0_370] : memref<2x4x1x10x18xf32, #tpu.memory_space<vmem>>, vector<1x1x1x8x16xf32>
    %971 = vector.shape_cast %970 : vector<1x1x1x8x16xf32> to vector<8x16xf32>
    %c100_371 = arith.constant 100 : index
    %972 = memref.load %arg3[%c100_371] : memref<144xf32, #tpu.memory_space<smem>>
    %973 = vector.broadcast %972 : f32 to vector<8x16xf32>
    %974 = arith.mulf %973, %971 : vector<8x16xf32>
    %975 = arith.addf %957, %974 : vector<8x16xf32>
    %c101_372 = arith.constant 101 : index
    %976 = memref.load %arg3[%c101_372] : memref<144xf32, #tpu.memory_space<smem>>
    %977 = vector.broadcast %976 : f32 to vector<8x16xf32>
    %978 = arith.mulf %977, %971 : vector<8x16xf32>
    %979 = arith.addf %961, %978 : vector<8x16xf32>
    %c102_373 = arith.constant 102 : index
    %980 = memref.load %arg3[%c102_373] : memref<144xf32, #tpu.memory_space<smem>>
    %981 = vector.broadcast %980 : f32 to vector<8x16xf32>
    %982 = arith.mulf %981, %971 : vector<8x16xf32>
    %983 = arith.addf %965, %982 : vector<8x16xf32>
    %c103_374 = arith.constant 103 : index
    %984 = memref.load %arg3[%c103_374] : memref<144xf32, #tpu.memory_space<smem>>
    %985 = vector.broadcast %984 : f32 to vector<8x16xf32>
    %986 = arith.mulf %985, %971 : vector<8x16xf32>
    %987 = arith.addf %969, %986 : vector<8x16xf32>
    %c1_375 = arith.constant 1 : index
    %c1_376 = arith.constant 1 : index
    %c0_377 = arith.constant 0 : index
    %c2_378 = arith.constant 2 : index
    %c1_379 = arith.constant 1 : index
    %988 = vector.load %arg2[%c1_375, %c1_376, %c0_377, %c2_378, %c1_379] : memref<2x4x1x10x18xf32, #tpu.memory_space<vmem>>, vector<1x1x1x8x16xf32>
    %989 = vector.shape_cast %988 : vector<1x1x1x8x16xf32> to vector<8x16xf32>
    %c116_380 = arith.constant 116 : index
    %990 = memref.load %arg3[%c116_380] : memref<144xf32, #tpu.memory_space<smem>>
    %991 = vector.broadcast %990 : f32 to vector<8x16xf32>
    %992 = arith.mulf %991, %989 : vector<8x16xf32>
    %993 = arith.addf %975, %992 : vector<8x16xf32>
    %c117_381 = arith.constant 117 : index
    %994 = memref.load %arg3[%c117_381] : memref<144xf32, #tpu.memory_space<smem>>
    %995 = vector.broadcast %994 : f32 to vector<8x16xf32>
    %996 = arith.mulf %995, %989 : vector<8x16xf32>
    %997 = arith.addf %979, %996 : vector<8x16xf32>
    %c118_382 = arith.constant 118 : index
    %998 = memref.load %arg3[%c118_382] : memref<144xf32, #tpu.memory_space<smem>>
    %999 = vector.broadcast %998 : f32 to vector<8x16xf32>
    %1000 = arith.mulf %999, %989 : vector<8x16xf32>
    %1001 = arith.addf %983, %1000 : vector<8x16xf32>
    %c119_383 = arith.constant 119 : index
    %1002 = memref.load %arg3[%c119_383] : memref<144xf32, #tpu.memory_space<smem>>
    %1003 = vector.broadcast %1002 : f32 to vector<8x16xf32>
    %1004 = arith.mulf %1003, %989 : vector<8x16xf32>
    %1005 = arith.addf %987, %1004 : vector<8x16xf32>
    %c1_384 = arith.constant 1 : index
    %c1_385 = arith.constant 1 : index
    %c0_386 = arith.constant 0 : index
    %c2_387 = arith.constant 2 : index
    %c2_388 = arith.constant 2 : index
    %1006 = vector.load %arg2[%c1_384, %c1_385, %c0_386, %c2_387, %c2_388] : memref<2x4x1x10x18xf32, #tpu.memory_space<vmem>>, vector<1x1x1x8x16xf32>
    %1007 = vector.shape_cast %1006 : vector<1x1x1x8x16xf32> to vector<8x16xf32>
    %c132_389 = arith.constant 132 : index
    %1008 = memref.load %arg3[%c132_389] : memref<144xf32, #tpu.memory_space<smem>>
    %1009 = vector.broadcast %1008 : f32 to vector<8x16xf32>
    %1010 = arith.mulf %1009, %1007 : vector<8x16xf32>
    %1011 = arith.addf %993, %1010 : vector<8x16xf32>
    %c133_390 = arith.constant 133 : index
    %1012 = memref.load %arg3[%c133_390] : memref<144xf32, #tpu.memory_space<smem>>
    %1013 = vector.broadcast %1012 : f32 to vector<8x16xf32>
    %1014 = arith.mulf %1013, %1007 : vector<8x16xf32>
    %1015 = arith.addf %997, %1014 : vector<8x16xf32>
    %c134_391 = arith.constant 134 : index
    %1016 = memref.load %arg3[%c134_391] : memref<144xf32, #tpu.memory_space<smem>>
    %1017 = vector.broadcast %1016 : f32 to vector<8x16xf32>
    %1018 = arith.mulf %1017, %1007 : vector<8x16xf32>
    %1019 = arith.addf %1001, %1018 : vector<8x16xf32>
    %c135_392 = arith.constant 135 : index
    %1020 = memref.load %arg3[%c135_392] : memref<144xf32, #tpu.memory_space<smem>>
    %1021 = vector.broadcast %1020 : f32 to vector<8x16xf32>
    %1022 = arith.mulf %1021, %1007 : vector<8x16xf32>
    %1023 = arith.addf %1005, %1022 : vector<8x16xf32>
    %c1_393 = arith.constant 1 : index
    %c2_394 = arith.constant 2 : index
    %c0_395 = arith.constant 0 : index
    %c0_396 = arith.constant 0 : index
    %c0_397 = arith.constant 0 : index
    %1024 = vector.load %arg2[%c1_393, %c2_394, %c0_395, %c0_396, %c0_397] : memref<2x4x1x10x18xf32, #tpu.memory_space<vmem>>, vector<1x1x1x8x16xf32>
    %1025 = vector.shape_cast %1024 : vector<1x1x1x8x16xf32> to vector<8x16xf32>
    %c8_398 = arith.constant 8 : index
    %1026 = memref.load %arg3[%c8_398] : memref<144xf32, #tpu.memory_space<smem>>
    %1027 = vector.broadcast %1026 : f32 to vector<8x16xf32>
    %1028 = arith.mulf %1027, %1025 : vector<8x16xf32>
    %1029 = arith.addf %1011, %1028 : vector<8x16xf32>
    %c9_399 = arith.constant 9 : index
    %1030 = memref.load %arg3[%c9_399] : memref<144xf32, #tpu.memory_space<smem>>
    %1031 = vector.broadcast %1030 : f32 to vector<8x16xf32>
    %1032 = arith.mulf %1031, %1025 : vector<8x16xf32>
    %1033 = arith.addf %1015, %1032 : vector<8x16xf32>
    %c10_400 = arith.constant 10 : index
    %1034 = memref.load %arg3[%c10_400] : memref<144xf32, #tpu.memory_space<smem>>
    %1035 = vector.broadcast %1034 : f32 to vector<8x16xf32>
    %1036 = arith.mulf %1035, %1025 : vector<8x16xf32>
    %1037 = arith.addf %1019, %1036 : vector<8x16xf32>
    %c11_401 = arith.constant 11 : index
    %1038 = memref.load %arg3[%c11_401] : memref<144xf32, #tpu.memory_space<smem>>
    %1039 = vector.broadcast %1038 : f32 to vector<8x16xf32>
    %1040 = arith.mulf %1039, %1025 : vector<8x16xf32>
    %1041 = arith.addf %1023, %1040 : vector<8x16xf32>
    %c1_402 = arith.constant 1 : index
    %c2_403 = arith.constant 2 : index
    %c0_404 = arith.constant 0 : index
    %c0_405 = arith.constant 0 : index
    %c1_406 = arith.constant 1 : index
    %1042 = vector.load %arg2[%c1_402, %c2_403, %c0_404, %c0_405, %c1_406] : memref<2x4x1x10x18xf32, #tpu.memory_space<vmem>>, vector<1x1x1x8x16xf32>
    %1043 = vector.shape_cast %1042 : vector<1x1x1x8x16xf32> to vector<8x16xf32>
    %c24_407 = arith.constant 24 : index
    %1044 = memref.load %arg3[%c24_407] : memref<144xf32, #tpu.memory_space<smem>>
    %1045 = vector.broadcast %1044 : f32 to vector<8x16xf32>
    %1046 = arith.mulf %1045, %1043 : vector<8x16xf32>
    %1047 = arith.addf %1029, %1046 : vector<8x16xf32>
    %c25_408 = arith.constant 25 : index
    %1048 = memref.load %arg3[%c25_408] : memref<144xf32, #tpu.memory_space<smem>>
    %1049 = vector.broadcast %1048 : f32 to vector<8x16xf32>
    %1050 = arith.mulf %1049, %1043 : vector<8x16xf32>
    %1051 = arith.addf %1033, %1050 : vector<8x16xf32>
    %c26_409 = arith.constant 26 : index
    %1052 = memref.load %arg3[%c26_409] : memref<144xf32, #tpu.memory_space<smem>>
    %1053 = vector.broadcast %1052 : f32 to vector<8x16xf32>
    %1054 = arith.mulf %1053, %1043 : vector<8x16xf32>
    %1055 = arith.addf %1037, %1054 : vector<8x16xf32>
    %c27_410 = arith.constant 27 : index
    %1056 = memref.load %arg3[%c27_410] : memref<144xf32, #tpu.memory_space<smem>>
    %1057 = vector.broadcast %1056 : f32 to vector<8x16xf32>
    %1058 = arith.mulf %1057, %1043 : vector<8x16xf32>
    %1059 = arith.addf %1041, %1058 : vector<8x16xf32>
    %c1_411 = arith.constant 1 : index
    %c2_412 = arith.constant 2 : index
    %c0_413 = arith.constant 0 : index
    %c0_414 = arith.constant 0 : index
    %c2_415 = arith.constant 2 : index
    %1060 = vector.load %arg2[%c1_411, %c2_412, %c0_413, %c0_414, %c2_415] : memref<2x4x1x10x18xf32, #tpu.memory_space<vmem>>, vector<1x1x1x8x16xf32>
    %1061 = vector.shape_cast %1060 : vector<1x1x1x8x16xf32> to vector<8x16xf32>
    %c40_416 = arith.constant 40 : index
    %1062 = memref.load %arg3[%c40_416] : memref<144xf32, #tpu.memory_space<smem>>
    %1063 = vector.broadcast %1062 : f32 to vector<8x16xf32>
    %1064 = arith.mulf %1063, %1061 : vector<8x16xf32>
    %1065 = arith.addf %1047, %1064 : vector<8x16xf32>
    %c41_417 = arith.constant 41 : index
    %1066 = memref.load %arg3[%c41_417] : memref<144xf32, #tpu.memory_space<smem>>
    %1067 = vector.broadcast %1066 : f32 to vector<8x16xf32>
    %1068 = arith.mulf %1067, %1061 : vector<8x16xf32>
    %1069 = arith.addf %1051, %1068 : vector<8x16xf32>
    %c42_418 = arith.constant 42 : index
    %1070 = memref.load %arg3[%c42_418] : memref<144xf32, #tpu.memory_space<smem>>
    %1071 = vector.broadcast %1070 : f32 to vector<8x16xf32>
    %1072 = arith.mulf %1071, %1061 : vector<8x16xf32>
    %1073 = arith.addf %1055, %1072 : vector<8x16xf32>
    %c43_419 = arith.constant 43 : index
    %1074 = memref.load %arg3[%c43_419] : memref<144xf32, #tpu.memory_space<smem>>
    %1075 = vector.broadcast %1074 : f32 to vector<8x16xf32>
    %1076 = arith.mulf %1075, %1061 : vector<8x16xf32>
    %1077 = arith.addf %1059, %1076 : vector<8x16xf32>
    %c1_420 = arith.constant 1 : index
    %c2_421 = arith.constant 2 : index
    %c0_422 = arith.constant 0 : index
    %c1_423 = arith.constant 1 : index
    %c0_424 = arith.constant 0 : index
    %1078 = vector.load %arg2[%c1_420, %c2_421, %c0_422, %c1_423, %c0_424] : memref<2x4x1x10x18xf32, #tpu.memory_space<vmem>>, vector<1x1x1x8x16xf32>
    %1079 = vector.shape_cast %1078 : vector<1x1x1x8x16xf32> to vector<8x16xf32>
    %c56_425 = arith.constant 56 : index
    %1080 = memref.load %arg3[%c56_425] : memref<144xf32, #tpu.memory_space<smem>>
    %1081 = vector.broadcast %1080 : f32 to vector<8x16xf32>
    %1082 = arith.mulf %1081, %1079 : vector<8x16xf32>
    %1083 = arith.addf %1065, %1082 : vector<8x16xf32>
    %c57_426 = arith.constant 57 : index
    %1084 = memref.load %arg3[%c57_426] : memref<144xf32, #tpu.memory_space<smem>>
    %1085 = vector.broadcast %1084 : f32 to vector<8x16xf32>
    %1086 = arith.mulf %1085, %1079 : vector<8x16xf32>
    %1087 = arith.addf %1069, %1086 : vector<8x16xf32>
    %c58_427 = arith.constant 58 : index
    %1088 = memref.load %arg3[%c58_427] : memref<144xf32, #tpu.memory_space<smem>>
    %1089 = vector.broadcast %1088 : f32 to vector<8x16xf32>
    %1090 = arith.mulf %1089, %1079 : vector<8x16xf32>
    %1091 = arith.addf %1073, %1090 : vector<8x16xf32>
    %c59_428 = arith.constant 59 : index
    %1092 = memref.load %arg3[%c59_428] : memref<144xf32, #tpu.memory_space<smem>>
    %1093 = vector.broadcast %1092 : f32 to vector<8x16xf32>
    %1094 = arith.mulf %1093, %1079 : vector<8x16xf32>
    %1095 = arith.addf %1077, %1094 : vector<8x16xf32>
    %c1_429 = arith.constant 1 : index
    %c2_430 = arith.constant 2 : index
    %c0_431 = arith.constant 0 : index
    %c1_432 = arith.constant 1 : index
    %c1_433 = arith.constant 1 : index
    %1096 = vector.load %arg2[%c1_429, %c2_430, %c0_431, %c1_432, %c1_433] : memref<2x4x1x10x18xf32, #tpu.memory_space<vmem>>, vector<1x1x1x8x16xf32>
    %1097 = vector.shape_cast %1096 : vector<1x1x1x8x16xf32> to vector<8x16xf32>
    %c72_434 = arith.constant 72 : index
    %1098 = memref.load %arg3[%c72_434] : memref<144xf32, #tpu.memory_space<smem>>
    %1099 = vector.broadcast %1098 : f32 to vector<8x16xf32>
    %1100 = arith.mulf %1099, %1097 : vector<8x16xf32>
    %1101 = arith.addf %1083, %1100 : vector<8x16xf32>
    %c73_435 = arith.constant 73 : index
    %1102 = memref.load %arg3[%c73_435] : memref<144xf32, #tpu.memory_space<smem>>
    %1103 = vector.broadcast %1102 : f32 to vector<8x16xf32>
    %1104 = arith.mulf %1103, %1097 : vector<8x16xf32>
    %1105 = arith.addf %1087, %1104 : vector<8x16xf32>
    %c74_436 = arith.constant 74 : index
    %1106 = memref.load %arg3[%c74_436] : memref<144xf32, #tpu.memory_space<smem>>
    %1107 = vector.broadcast %1106 : f32 to vector<8x16xf32>
    %1108 = arith.mulf %1107, %1097 : vector<8x16xf32>
    %1109 = arith.addf %1091, %1108 : vector<8x16xf32>
    %c75_437 = arith.constant 75 : index
    %1110 = memref.load %arg3[%c75_437] : memref<144xf32, #tpu.memory_space<smem>>
    %1111 = vector.broadcast %1110 : f32 to vector<8x16xf32>
    %1112 = arith.mulf %1111, %1097 : vector<8x16xf32>
    %1113 = arith.addf %1095, %1112 : vector<8x16xf32>
    %c1_438 = arith.constant 1 : index
    %c2_439 = arith.constant 2 : index
    %c0_440 = arith.constant 0 : index
    %c1_441 = arith.constant 1 : index
    %c2_442 = arith.constant 2 : index
    %1114 = vector.load %arg2[%c1_438, %c2_439, %c0_440, %c1_441, %c2_442] : memref<2x4x1x10x18xf32, #tpu.memory_space<vmem>>, vector<1x1x1x8x16xf32>
    %1115 = vector.shape_cast %1114 : vector<1x1x1x8x16xf32> to vector<8x16xf32>
    %c88_443 = arith.constant 88 : index
    %1116 = memref.load %arg3[%c88_443] : memref<144xf32, #tpu.memory_space<smem>>
    %1117 = vector.broadcast %1116 : f32 to vector<8x16xf32>
    %1118 = arith.mulf %1117, %1115 : vector<8x16xf32>
    %1119 = arith.addf %1101, %1118 : vector<8x16xf32>
    %c89_444 = arith.constant 89 : index
    %1120 = memref.load %arg3[%c89_444] : memref<144xf32, #tpu.memory_space<smem>>
    %1121 = vector.broadcast %1120 : f32 to vector<8x16xf32>
    %1122 = arith.mulf %1121, %1115 : vector<8x16xf32>
    %1123 = arith.addf %1105, %1122 : vector<8x16xf32>
    %c90_445 = arith.constant 90 : index
    %1124 = memref.load %arg3[%c90_445] : memref<144xf32, #tpu.memory_space<smem>>
    %1125 = vector.broadcast %1124 : f32 to vector<8x16xf32>
    %1126 = arith.mulf %1125, %1115 : vector<8x16xf32>
    %1127 = arith.addf %1109, %1126 : vector<8x16xf32>
    %c91_446 = arith.constant 91 : index
    %1128 = memref.load %arg3[%c91_446] : memref<144xf32, #tpu.memory_space<smem>>
    %1129 = vector.broadcast %1128 : f32 to vector<8x16xf32>
    %1130 = arith.mulf %1129, %1115 : vector<8x16xf32>
    %1131 = arith.addf %1113, %1130 : vector<8x16xf32>
    %c1_447 = arith.constant 1 : index
    %c2_448 = arith.constant 2 : index
    %c0_449 = arith.constant 0 : index
    %c2_450 = arith.constant 2 : index
    %c0_451 = arith.constant 0 : index
    %1132 = vector.load %arg2[%c1_447, %c2_448, %c0_449, %c2_450, %c0_451] : memref<2x4x1x10x18xf32, #tpu.memory_space<vmem>>, vector<1x1x1x8x16xf32>
    %1133 = vector.shape_cast %1132 : vector<1x1x1x8x16xf32> to vector<8x16xf32>
    %c104_452 = arith.constant 104 : index
    %1134 = memref.load %arg3[%c104_452] : memref<144xf32, #tpu.memory_space<smem>>
    %1135 = vector.broadcast %1134 : f32 to vector<8x16xf32>
    %1136 = arith.mulf %1135, %1133 : vector<8x16xf32>
    %1137 = arith.addf %1119, %1136 : vector<8x16xf32>
    %c105_453 = arith.constant 105 : index
    %1138 = memref.load %arg3[%c105_453] : memref<144xf32, #tpu.memory_space<smem>>
    %1139 = vector.broadcast %1138 : f32 to vector<8x16xf32>
    %1140 = arith.mulf %1139, %1133 : vector<8x16xf32>
    %1141 = arith.addf %1123, %1140 : vector<8x16xf32>
    %c106_454 = arith.constant 106 : index
    %1142 = memref.load %arg3[%c106_454] : memref<144xf32, #tpu.memory_space<smem>>
    %1143 = vector.broadcast %1142 : f32 to vector<8x16xf32>
    %1144 = arith.mulf %1143, %1133 : vector<8x16xf32>
    %1145 = arith.addf %1127, %1144 : vector<8x16xf32>
    %c107_455 = arith.constant 107 : index
    %1146 = memref.load %arg3[%c107_455] : memref<144xf32, #tpu.memory_space<smem>>
    %1147 = vector.broadcast %1146 : f32 to vector<8x16xf32>
    %1148 = arith.mulf %1147, %1133 : vector<8x16xf32>
    %1149 = arith.addf %1131, %1148 : vector<8x16xf32>
    %c1_456 = arith.constant 1 : index
    %c2_457 = arith.constant 2 : index
    %c0_458 = arith.constant 0 : index
    %c2_459 = arith.constant 2 : index
    %c1_460 = arith.constant 1 : index
    %1150 = vector.load %arg2[%c1_456, %c2_457, %c0_458, %c2_459, %c1_460] : memref<2x4x1x10x18xf32, #tpu.memory_space<vmem>>, vector<1x1x1x8x16xf32>
    %1151 = vector.shape_cast %1150 : vector<1x1x1x8x16xf32> to vector<8x16xf32>
    %c120_461 = arith.constant 120 : index
    %1152 = memref.load %arg3[%c120_461] : memref<144xf32, #tpu.memory_space<smem>>
    %1153 = vector.broadcast %1152 : f32 to vector<8x16xf32>
    %1154 = arith.mulf %1153, %1151 : vector<8x16xf32>
    %1155 = arith.addf %1137, %1154 : vector<8x16xf32>
    %c121_462 = arith.constant 121 : index
    %1156 = memref.load %arg3[%c121_462] : memref<144xf32, #tpu.memory_space<smem>>
    %1157 = vector.broadcast %1156 : f32 to vector<8x16xf32>
    %1158 = arith.mulf %1157, %1151 : vector<8x16xf32>
    %1159 = arith.addf %1141, %1158 : vector<8x16xf32>
    %c122_463 = arith.constant 122 : index
    %1160 = memref.load %arg3[%c122_463] : memref<144xf32, #tpu.memory_space<smem>>
    %1161 = vector.broadcast %1160 : f32 to vector<8x16xf32>
    %1162 = arith.mulf %1161, %1151 : vector<8x16xf32>
    %1163 = arith.addf %1145, %1162 : vector<8x16xf32>
    %c123_464 = arith.constant 123 : index
    %1164 = memref.load %arg3[%c123_464] : memref<144xf32, #tpu.memory_space<smem>>
    %1165 = vector.broadcast %1164 : f32 to vector<8x16xf32>
    %1166 = arith.mulf %1165, %1151 : vector<8x16xf32>
    %1167 = arith.addf %1149, %1166 : vector<8x16xf32>
    %c1_465 = arith.constant 1 : index
    %c2_466 = arith.constant 2 : index
    %c0_467 = arith.constant 0 : index
    %c2_468 = arith.constant 2 : index
    %c2_469 = arith.constant 2 : index
    %1168 = vector.load %arg2[%c1_465, %c2_466, %c0_467, %c2_468, %c2_469] : memref<2x4x1x10x18xf32, #tpu.memory_space<vmem>>, vector<1x1x1x8x16xf32>
    %1169 = vector.shape_cast %1168 : vector<1x1x1x8x16xf32> to vector<8x16xf32>
    %c136_470 = arith.constant 136 : index
    %1170 = memref.load %arg3[%c136_470] : memref<144xf32, #tpu.memory_space<smem>>
    %1171 = vector.broadcast %1170 : f32 to vector<8x16xf32>
    %1172 = arith.mulf %1171, %1169 : vector<8x16xf32>
    %1173 = arith.addf %1155, %1172 : vector<8x16xf32>
    %c137_471 = arith.constant 137 : index
    %1174 = memref.load %arg3[%c137_471] : memref<144xf32, #tpu.memory_space<smem>>
    %1175 = vector.broadcast %1174 : f32 to vector<8x16xf32>
    %1176 = arith.mulf %1175, %1169 : vector<8x16xf32>
    %1177 = arith.addf %1159, %1176 : vector<8x16xf32>
    %c138_472 = arith.constant 138 : index
    %1178 = memref.load %arg3[%c138_472] : memref<144xf32, #tpu.memory_space<smem>>
    %1179 = vector.broadcast %1178 : f32 to vector<8x16xf32>
    %1180 = arith.mulf %1179, %1169 : vector<8x16xf32>
    %1181 = arith.addf %1163, %1180 : vector<8x16xf32>
    %c139_473 = arith.constant 139 : index
    %1182 = memref.load %arg3[%c139_473] : memref<144xf32, #tpu.memory_space<smem>>
    %1183 = vector.broadcast %1182 : f32 to vector<8x16xf32>
    %1184 = arith.mulf %1183, %1169 : vector<8x16xf32>
    %1185 = arith.addf %1167, %1184 : vector<8x16xf32>
    %c1_474 = arith.constant 1 : index
    %c3_475 = arith.constant 3 : index
    %c0_476 = arith.constant 0 : index
    %c0_477 = arith.constant 0 : index
    %c0_478 = arith.constant 0 : index
    %1186 = vector.load %arg2[%c1_474, %c3_475, %c0_476, %c0_477, %c0_478] : memref<2x4x1x10x18xf32, #tpu.memory_space<vmem>>, vector<1x1x1x8x16xf32>
    %1187 = vector.shape_cast %1186 : vector<1x1x1x8x16xf32> to vector<8x16xf32>
    %c12_479 = arith.constant 12 : index
    %1188 = memref.load %arg3[%c12_479] : memref<144xf32, #tpu.memory_space<smem>>
    %1189 = vector.broadcast %1188 : f32 to vector<8x16xf32>
    %1190 = arith.mulf %1189, %1187 : vector<8x16xf32>
    %1191 = arith.addf %1173, %1190 : vector<8x16xf32>
    %c13_480 = arith.constant 13 : index
    %1192 = memref.load %arg3[%c13_480] : memref<144xf32, #tpu.memory_space<smem>>
    %1193 = vector.broadcast %1192 : f32 to vector<8x16xf32>
    %1194 = arith.mulf %1193, %1187 : vector<8x16xf32>
    %1195 = arith.addf %1177, %1194 : vector<8x16xf32>
    %c14_481 = arith.constant 14 : index
    %1196 = memref.load %arg3[%c14_481] : memref<144xf32, #tpu.memory_space<smem>>
    %1197 = vector.broadcast %1196 : f32 to vector<8x16xf32>
    %1198 = arith.mulf %1197, %1187 : vector<8x16xf32>
    %1199 = arith.addf %1181, %1198 : vector<8x16xf32>
    %c15_482 = arith.constant 15 : index
    %1200 = memref.load %arg3[%c15_482] : memref<144xf32, #tpu.memory_space<smem>>
    %1201 = vector.broadcast %1200 : f32 to vector<8x16xf32>
    %1202 = arith.mulf %1201, %1187 : vector<8x16xf32>
    %1203 = arith.addf %1185, %1202 : vector<8x16xf32>
    %c1_483 = arith.constant 1 : index
    %c3_484 = arith.constant 3 : index
    %c0_485 = arith.constant 0 : index
    %c0_486 = arith.constant 0 : index
    %c1_487 = arith.constant 1 : index
    %1204 = vector.load %arg2[%c1_483, %c3_484, %c0_485, %c0_486, %c1_487] : memref<2x4x1x10x18xf32, #tpu.memory_space<vmem>>, vector<1x1x1x8x16xf32>
    %1205 = vector.shape_cast %1204 : vector<1x1x1x8x16xf32> to vector<8x16xf32>
    %c28_488 = arith.constant 28 : index
    %1206 = memref.load %arg3[%c28_488] : memref<144xf32, #tpu.memory_space<smem>>
    %1207 = vector.broadcast %1206 : f32 to vector<8x16xf32>
    %1208 = arith.mulf %1207, %1205 : vector<8x16xf32>
    %1209 = arith.addf %1191, %1208 : vector<8x16xf32>
    %c29_489 = arith.constant 29 : index
    %1210 = memref.load %arg3[%c29_489] : memref<144xf32, #tpu.memory_space<smem>>
    %1211 = vector.broadcast %1210 : f32 to vector<8x16xf32>
    %1212 = arith.mulf %1211, %1205 : vector<8x16xf32>
    %1213 = arith.addf %1195, %1212 : vector<8x16xf32>
    %c30_490 = arith.constant 30 : index
    %1214 = memref.load %arg3[%c30_490] : memref<144xf32, #tpu.memory_space<smem>>
    %1215 = vector.broadcast %1214 : f32 to vector<8x16xf32>
    %1216 = arith.mulf %1215, %1205 : vector<8x16xf32>
    %1217 = arith.addf %1199, %1216 : vector<8x16xf32>
    %c31_491 = arith.constant 31 : index
    %1218 = memref.load %arg3[%c31_491] : memref<144xf32, #tpu.memory_space<smem>>
    %1219 = vector.broadcast %1218 : f32 to vector<8x16xf32>
    %1220 = arith.mulf %1219, %1205 : vector<8x16xf32>
    %1221 = arith.addf %1203, %1220 : vector<8x16xf32>
    %c1_492 = arith.constant 1 : index
    %c3_493 = arith.constant 3 : index
    %c0_494 = arith.constant 0 : index
    %c0_495 = arith.constant 0 : index
    %c2_496 = arith.constant 2 : index
    %1222 = vector.load %arg2[%c1_492, %c3_493, %c0_494, %c0_495, %c2_496] : memref<2x4x1x10x18xf32, #tpu.memory_space<vmem>>, vector<1x1x1x8x16xf32>
    %1223 = vector.shape_cast %1222 : vector<1x1x1x8x16xf32> to vector<8x16xf32>
    %c44_497 = arith.constant 44 : index
    %1224 = memref.load %arg3[%c44_497] : memref<144xf32, #tpu.memory_space<smem>>
    %1225 = vector.broadcast %1224 : f32 to vector<8x16xf32>
    %1226 = arith.mulf %1225, %1223 : vector<8x16xf32>
    %1227 = arith.addf %1209, %1226 : vector<8x16xf32>
    %c45_498 = arith.constant 45 : index
    %1228 = memref.load %arg3[%c45_498] : memref<144xf32, #tpu.memory_space<smem>>
    %1229 = vector.broadcast %1228 : f32 to vector<8x16xf32>
    %1230 = arith.mulf %1229, %1223 : vector<8x16xf32>
    %1231 = arith.addf %1213, %1230 : vector<8x16xf32>
    %c46_499 = arith.constant 46 : index
    %1232 = memref.load %arg3[%c46_499] : memref<144xf32, #tpu.memory_space<smem>>
    %1233 = vector.broadcast %1232 : f32 to vector<8x16xf32>
    %1234 = arith.mulf %1233, %1223 : vector<8x16xf32>
    %1235 = arith.addf %1217, %1234 : vector<8x16xf32>
    %c47_500 = arith.constant 47 : index
    %1236 = memref.load %arg3[%c47_500] : memref<144xf32, #tpu.memory_space<smem>>
    %1237 = vector.broadcast %1236 : f32 to vector<8x16xf32>
    %1238 = arith.mulf %1237, %1223 : vector<8x16xf32>
    %1239 = arith.addf %1221, %1238 : vector<8x16xf32>
    %c1_501 = arith.constant 1 : index
    %c3_502 = arith.constant 3 : index
    %c0_503 = arith.constant 0 : index
    %c1_504 = arith.constant 1 : index
    %c0_505 = arith.constant 0 : index
    %1240 = vector.load %arg2[%c1_501, %c3_502, %c0_503, %c1_504, %c0_505] : memref<2x4x1x10x18xf32, #tpu.memory_space<vmem>>, vector<1x1x1x8x16xf32>
    %1241 = vector.shape_cast %1240 : vector<1x1x1x8x16xf32> to vector<8x16xf32>
    %c60_506 = arith.constant 60 : index
    %1242 = memref.load %arg3[%c60_506] : memref<144xf32, #tpu.memory_space<smem>>
    %1243 = vector.broadcast %1242 : f32 to vector<8x16xf32>
    %1244 = arith.mulf %1243, %1241 : vector<8x16xf32>
    %1245 = arith.addf %1227, %1244 : vector<8x16xf32>
    %c61_507 = arith.constant 61 : index
    %1246 = memref.load %arg3[%c61_507] : memref<144xf32, #tpu.memory_space<smem>>
    %1247 = vector.broadcast %1246 : f32 to vector<8x16xf32>
    %1248 = arith.mulf %1247, %1241 : vector<8x16xf32>
    %1249 = arith.addf %1231, %1248 : vector<8x16xf32>
    %c62_508 = arith.constant 62 : index
    %1250 = memref.load %arg3[%c62_508] : memref<144xf32, #tpu.memory_space<smem>>
    %1251 = vector.broadcast %1250 : f32 to vector<8x16xf32>
    %1252 = arith.mulf %1251, %1241 : vector<8x16xf32>
    %1253 = arith.addf %1235, %1252 : vector<8x16xf32>
    %c63_509 = arith.constant 63 : index
    %1254 = memref.load %arg3[%c63_509] : memref<144xf32, #tpu.memory_space<smem>>
    %1255 = vector.broadcast %1254 : f32 to vector<8x16xf32>
    %1256 = arith.mulf %1255, %1241 : vector<8x16xf32>
    %1257 = arith.addf %1239, %1256 : vector<8x16xf32>
    %c1_510 = arith.constant 1 : index
    %c3_511 = arith.constant 3 : index
    %c0_512 = arith.constant 0 : index
    %c1_513 = arith.constant 1 : index
    %c1_514 = arith.constant 1 : index
    %1258 = vector.load %arg2[%c1_510, %c3_511, %c0_512, %c1_513, %c1_514] : memref<2x4x1x10x18xf32, #tpu.memory_space<vmem>>, vector<1x1x1x8x16xf32>
    %1259 = vector.shape_cast %1258 : vector<1x1x1x8x16xf32> to vector<8x16xf32>
    %c76_515 = arith.constant 76 : index
    %1260 = memref.load %arg3[%c76_515] : memref<144xf32, #tpu.memory_space<smem>>
    %1261 = vector.broadcast %1260 : f32 to vector<8x16xf32>
    %1262 = arith.mulf %1261, %1259 : vector<8x16xf32>
    %1263 = arith.addf %1245, %1262 : vector<8x16xf32>
    %c77_516 = arith.constant 77 : index
    %1264 = memref.load %arg3[%c77_516] : memref<144xf32, #tpu.memory_space<smem>>
    %1265 = vector.broadcast %1264 : f32 to vector<8x16xf32>
    %1266 = arith.mulf %1265, %1259 : vector<8x16xf32>
    %1267 = arith.addf %1249, %1266 : vector<8x16xf32>
    %c78_517 = arith.constant 78 : index
    %1268 = memref.load %arg3[%c78_517] : memref<144xf32, #tpu.memory_space<smem>>
    %1269 = vector.broadcast %1268 : f32 to vector<8x16xf32>
    %1270 = arith.mulf %1269, %1259 : vector<8x16xf32>
    %1271 = arith.addf %1253, %1270 : vector<8x16xf32>
    %c79_518 = arith.constant 79 : index
    %1272 = memref.load %arg3[%c79_518] : memref<144xf32, #tpu.memory_space<smem>>
    %1273 = vector.broadcast %1272 : f32 to vector<8x16xf32>
    %1274 = arith.mulf %1273, %1259 : vector<8x16xf32>
    %1275 = arith.addf %1257, %1274 : vector<8x16xf32>
    %c1_519 = arith.constant 1 : index
    %c3_520 = arith.constant 3 : index
    %c0_521 = arith.constant 0 : index
    %c1_522 = arith.constant 1 : index
    %c2_523 = arith.constant 2 : index
    %1276 = vector.load %arg2[%c1_519, %c3_520, %c0_521, %c1_522, %c2_523] : memref<2x4x1x10x18xf32, #tpu.memory_space<vmem>>, vector<1x1x1x8x16xf32>
    %1277 = vector.shape_cast %1276 : vector<1x1x1x8x16xf32> to vector<8x16xf32>
    %c92_524 = arith.constant 92 : index
    %1278 = memref.load %arg3[%c92_524] : memref<144xf32, #tpu.memory_space<smem>>
    %1279 = vector.broadcast %1278 : f32 to vector<8x16xf32>
    %1280 = arith.mulf %1279, %1277 : vector<8x16xf32>
    %1281 = arith.addf %1263, %1280 : vector<8x16xf32>
    %c93_525 = arith.constant 93 : index
    %1282 = memref.load %arg3[%c93_525] : memref<144xf32, #tpu.memory_space<smem>>
    %1283 = vector.broadcast %1282 : f32 to vector<8x16xf32>
    %1284 = arith.mulf %1283, %1277 : vector<8x16xf32>
    %1285 = arith.addf %1267, %1284 : vector<8x16xf32>
    %c94_526 = arith.constant 94 : index
    %1286 = memref.load %arg3[%c94_526] : memref<144xf32, #tpu.memory_space<smem>>
    %1287 = vector.broadcast %1286 : f32 to vector<8x16xf32>
    %1288 = arith.mulf %1287, %1277 : vector<8x16xf32>
    %1289 = arith.addf %1271, %1288 : vector<8x16xf32>
    %c95_527 = arith.constant 95 : index
    %1290 = memref.load %arg3[%c95_527] : memref<144xf32, #tpu.memory_space<smem>>
    %1291 = vector.broadcast %1290 : f32 to vector<8x16xf32>
    %1292 = arith.mulf %1291, %1277 : vector<8x16xf32>
    %1293 = arith.addf %1275, %1292 : vector<8x16xf32>
    %c1_528 = arith.constant 1 : index
    %c3_529 = arith.constant 3 : index
    %c0_530 = arith.constant 0 : index
    %c2_531 = arith.constant 2 : index
    %c0_532 = arith.constant 0 : index
    %1294 = vector.load %arg2[%c1_528, %c3_529, %c0_530, %c2_531, %c0_532] : memref<2x4x1x10x18xf32, #tpu.memory_space<vmem>>, vector<1x1x1x8x16xf32>
    %1295 = vector.shape_cast %1294 : vector<1x1x1x8x16xf32> to vector<8x16xf32>
    %c108_533 = arith.constant 108 : index
    %1296 = memref.load %arg3[%c108_533] : memref<144xf32, #tpu.memory_space<smem>>
    %1297 = vector.broadcast %1296 : f32 to vector<8x16xf32>
    %1298 = arith.mulf %1297, %1295 : vector<8x16xf32>
    %1299 = arith.addf %1281, %1298 : vector<8x16xf32>
    %c109_534 = arith.constant 109 : index
    %1300 = memref.load %arg3[%c109_534] : memref<144xf32, #tpu.memory_space<smem>>
    %1301 = vector.broadcast %1300 : f32 to vector<8x16xf32>
    %1302 = arith.mulf %1301, %1295 : vector<8x16xf32>
    %1303 = arith.addf %1285, %1302 : vector<8x16xf32>
    %c110_535 = arith.constant 110 : index
    %1304 = memref.load %arg3[%c110_535] : memref<144xf32, #tpu.memory_space<smem>>
    %1305 = vector.broadcast %1304 : f32 to vector<8x16xf32>
    %1306 = arith.mulf %1305, %1295 : vector<8x16xf32>
    %1307 = arith.addf %1289, %1306 : vector<8x16xf32>
    %c111_536 = arith.constant 111 : index
    %1308 = memref.load %arg3[%c111_536] : memref<144xf32, #tpu.memory_space<smem>>
    %1309 = vector.broadcast %1308 : f32 to vector<8x16xf32>
    %1310 = arith.mulf %1309, %1295 : vector<8x16xf32>
    %1311 = arith.addf %1293, %1310 : vector<8x16xf32>
    %c1_537 = arith.constant 1 : index
    %c3_538 = arith.constant 3 : index
    %c0_539 = arith.constant 0 : index
    %c2_540 = arith.constant 2 : index
    %c1_541 = arith.constant 1 : index
    %1312 = vector.load %arg2[%c1_537, %c3_538, %c0_539, %c2_540, %c1_541] : memref<2x4x1x10x18xf32, #tpu.memory_space<vmem>>, vector<1x1x1x8x16xf32>
    %1313 = vector.shape_cast %1312 : vector<1x1x1x8x16xf32> to vector<8x16xf32>
    %c124_542 = arith.constant 124 : index
    %1314 = memref.load %arg3[%c124_542] : memref<144xf32, #tpu.memory_space<smem>>
    %1315 = vector.broadcast %1314 : f32 to vector<8x16xf32>
    %1316 = arith.mulf %1315, %1313 : vector<8x16xf32>
    %1317 = arith.addf %1299, %1316 : vector<8x16xf32>
    %c125_543 = arith.constant 125 : index
    %1318 = memref.load %arg3[%c125_543] : memref<144xf32, #tpu.memory_space<smem>>
    %1319 = vector.broadcast %1318 : f32 to vector<8x16xf32>
    %1320 = arith.mulf %1319, %1313 : vector<8x16xf32>
    %1321 = arith.addf %1303, %1320 : vector<8x16xf32>
    %c126_544 = arith.constant 126 : index
    %1322 = memref.load %arg3[%c126_544] : memref<144xf32, #tpu.memory_space<smem>>
    %1323 = vector.broadcast %1322 : f32 to vector<8x16xf32>
    %1324 = arith.mulf %1323, %1313 : vector<8x16xf32>
    %1325 = arith.addf %1307, %1324 : vector<8x16xf32>
    %c127_545 = arith.constant 127 : index
    %1326 = memref.load %arg3[%c127_545] : memref<144xf32, #tpu.memory_space<smem>>
    %1327 = vector.broadcast %1326 : f32 to vector<8x16xf32>
    %1328 = arith.mulf %1327, %1313 : vector<8x16xf32>
    %1329 = arith.addf %1311, %1328 : vector<8x16xf32>
    %c1_546 = arith.constant 1 : index
    %c3_547 = arith.constant 3 : index
    %c0_548 = arith.constant 0 : index
    %c2_549 = arith.constant 2 : index
    %c2_550 = arith.constant 2 : index
    %1330 = vector.load %arg2[%c1_546, %c3_547, %c0_548, %c2_549, %c2_550] : memref<2x4x1x10x18xf32, #tpu.memory_space<vmem>>, vector<1x1x1x8x16xf32>
    %1331 = vector.shape_cast %1330 : vector<1x1x1x8x16xf32> to vector<8x16xf32>
    %c140_551 = arith.constant 140 : index
    %1332 = memref.load %arg3[%c140_551] : memref<144xf32, #tpu.memory_space<smem>>
    %1333 = vector.broadcast %1332 : f32 to vector<8x16xf32>
    %1334 = arith.mulf %1333, %1331 : vector<8x16xf32>
    %1335 = arith.addf %1317, %1334 : vector<8x16xf32>
    %c141_552 = arith.constant 141 : index
    %1336 = memref.load %arg3[%c141_552] : memref<144xf32, #tpu.memory_space<smem>>
    %1337 = vector.broadcast %1336 : f32 to vector<8x16xf32>
    %1338 = arith.mulf %1337, %1331 : vector<8x16xf32>
    %1339 = arith.addf %1321, %1338 : vector<8x16xf32>
    %c142_553 = arith.constant 142 : index
    %1340 = memref.load %arg3[%c142_553] : memref<144xf32, #tpu.memory_space<smem>>
    %1341 = vector.broadcast %1340 : f32 to vector<8x16xf32>
    %1342 = arith.mulf %1341, %1331 : vector<8x16xf32>
    %1343 = arith.addf %1325, %1342 : vector<8x16xf32>
    %c143_554 = arith.constant 143 : index
    %1344 = memref.load %arg3[%c143_554] : memref<144xf32, #tpu.memory_space<smem>>
    %1345 = vector.broadcast %1344 : f32 to vector<8x16xf32>
    %1346 = arith.mulf %1345, %1331 : vector<8x16xf32>
    %1347 = arith.addf %1329, %1346 : vector<8x16xf32>
    %c0_555 = arith.constant 0 : index
    %1348 = memref.load %arg4[%c0_555] : memref<4xf32, #tpu.memory_space<smem>>
    %1349 = vector.broadcast %1348 : f32 to vector<8x16xf32>
    %1350 = arith.addf %1335, %1349 : vector<8x16xf32>
    %c1_556 = arith.constant 1 : index
    %c0_557 = arith.constant 0 : index
    %c0_558 = arith.constant 0 : index
    %c1_559 = arith.constant 1 : index
    %c1_560 = arith.constant 1 : index
    %1351 = vector.load %arg2[%c1_556, %c0_557, %c0_558, %c1_559, %c1_560] : memref<2x4x1x10x18xf32, #tpu.memory_space<vmem>>, vector<1x1x1x8x16xf32>
    %1352 = vector.shape_cast %1351 : vector<1x1x1x8x16xf32> to vector<8x16xf32>
    %cst_561 = arith.constant 1.000000e+00 : f32
    %1353 = vector.broadcast %cst_561 : f32 to vector<8x16xf32>
    %1354 = arith.mulf %1353, %1352 : vector<8x16xf32>
    %1355 = arith.addf %1350, %1354 : vector<8x16xf32>
    %c1_562 = arith.constant 1 : index
    %c0_563 = arith.constant 0 : index
    %c0_564 = arith.constant 0 : index
    %c0_565 = arith.constant 0 : index
    %1356 = vector.load %arg5[%c1_562, %c0_563, %c0_564, %c0_565] : memref<2x4x8x16xf32, #tpu.memory_space<vmem>>, vector<1x1x8x16xf32>
    %1357 = vector.shape_cast %1356 : vector<1x1x8x16xf32> to vector<8x16xf32>
    %1358 = vector.shape_cast %1355 : vector<8x16xf32> to vector<1x1x8x16xf32>
    tpu.vector_store %arg5[%c1_562, %c0_563, %c0_564, %c0_565], %1358 {strides = array<i32>} : memref<2x4x8x16xf32, #tpu.memory_space<vmem>>, vector<1x1x8x16xf32>,
    %c1_566 = arith.constant 1 : index
    %1359 = memref.load %arg4[%c1_566] : memref<4xf32, #tpu.memory_space<smem>>
    %1360 = vector.broadcast %1359 : f32 to vector<8x16xf32>
    %1361 = arith.addf %1339, %1360 : vector<8x16xf32>
    %c1_567 = arith.constant 1 : index
    %c1_568 = arith.constant 1 : index
    %c0_569 = arith.constant 0 : index
    %c1_570 = arith.constant 1 : index
    %c1_571 = arith.constant 1 : index
    %1362 = vector.load %arg2[%c1_567, %c1_568, %c0_569, %c1_570, %c1_571] : memref<2x4x1x10x18xf32, #tpu.memory_space<vmem>>, vector<1x1x1x8x16xf32>
    %1363 = vector.shape_cast %1362 : vector<1x1x1x8x16xf32> to vector<8x16xf32>
    %cst_572 = arith.constant 1.000000e+00 : f32
    %1364 = vector.broadcast %cst_572 : f32 to vector<8x16xf32>
    %1365 = arith.mulf %1364, %1363 : vector<8x16xf32>
    %1366 = arith.addf %1361, %1365 : vector<8x16xf32>
    %c1_573 = arith.constant 1 : index
    %c1_574 = arith.constant 1 : index
    %c0_575 = arith.constant 0 : index
    %c0_576 = arith.constant 0 : index
    %1367 = vector.load %arg5[%c1_573, %c1_574, %c0_575, %c0_576] : memref<2x4x8x16xf32, #tpu.memory_space<vmem>>, vector<1x1x8x16xf32>
    %1368 = vector.shape_cast %1367 : vector<1x1x8x16xf32> to vector<8x16xf32>
    %1369 = vector.shape_cast %1366 : vector<8x16xf32> to vector<1x1x8x16xf32>
    tpu.vector_store %arg5[%c1_573, %c1_574, %c0_575, %c0_576], %1369 {strides = array<i32>} : memref<2x4x8x16xf32, #tpu.memory_space<vmem>>, vector<1x1x8x16xf32>,
    %c2_577 = arith.constant 2 : index
    %1370 = memref.load %arg4[%c2_577] : memref<4xf32, #tpu.memory_space<smem>>
    %1371 = vector.broadcast %1370 : f32 to vector<8x16xf32>
    %1372 = arith.addf %1343, %1371 : vector<8x16xf32>
    %c1_578 = arith.constant 1 : index
    %c2_579 = arith.constant 2 : index
    %c0_580 = arith.constant 0 : index
    %c1_581 = arith.constant 1 : index
    %c1_582 = arith.constant 1 : index
    %1373 = vector.load %arg2[%c1_578, %c2_579, %c0_580, %c1_581, %c1_582] : memref<2x4x1x10x18xf32, #tpu.memory_space<vmem>>, vector<1x1x1x8x16xf32>
    %1374 = vector.shape_cast %1373 : vector<1x1x1x8x16xf32> to vector<8x16xf32>
    %cst_583 = arith.constant 1.000000e+00 : f32
    %1375 = vector.broadcast %cst_583 : f32 to vector<8x16xf32>
    %1376 = arith.mulf %1375, %1374 : vector<8x16xf32>
    %1377 = arith.addf %1372, %1376 : vector<8x16xf32>
    %c1_584 = arith.constant 1 : index
    %c2_585 = arith.constant 2 : index
    %c0_586 = arith.constant 0 : index
    %c0_587 = arith.constant 0 : index
    %1378 = vector.load %arg5[%c1_584, %c2_585, %c0_586, %c0_587] : memref<2x4x8x16xf32, #tpu.memory_space<vmem>>, vector<1x1x8x16xf32>
    %1379 = vector.shape_cast %1378 : vector<1x1x8x16xf32> to vector<8x16xf32>
    %1380 = vector.shape_cast %1377 : vector<8x16xf32> to vector<1x1x8x16xf32>
    tpu.vector_store %arg5[%c1_584, %c2_585, %c0_586, %c0_587], %1380 {strides = array<i32>} : memref<2x4x8x16xf32, #tpu.memory_space<vmem>>, vector<1x1x8x16xf32>,
    %c3_588 = arith.constant 3 : index
    %1381 = memref.load %arg4[%c3_588] : memref<4xf32, #tpu.memory_space<smem>>
    %1382 = vector.broadcast %1381 : f32 to vector<8x16xf32>
    %1383 = arith.addf %1347, %1382 : vector<8x16xf32>
    %c1_589 = arith.constant 1 : index
    %c3_590 = arith.constant 3 : index
    %c0_591 = arith.constant 0 : index
    %c1_592 = arith.constant 1 : index
    %c1_593 = arith.constant 1 : index
    %1384 = vector.load %arg2[%c1_589, %c3_590, %c0_591, %c1_592, %c1_593] : memref<2x4x1x10x18xf32, #tpu.memory_space<vmem>>, vector<1x1x1x8x16xf32>
    %1385 = vector.shape_cast %1384 : vector<1x1x1x8x16xf32> to vector<8x16xf32>
    %cst_594 = arith.constant 1.000000e+00 : f32
    %1386 = vector.broadcast %cst_594 : f32 to vector<8x16xf32>
    %1387 = arith.mulf %1386, %1385 : vector<8x16xf32>
    %1388 = arith.addf %1383, %1387 : vector<8x16xf32>
    %c1_595 = arith.constant 1 : index
    %c3_596 = arith.constant 3 : index
    %c0_597 = arith.constant 0 : index
    %c0_598 = arith.constant 0 : index
    %1389 = vector.load %arg5[%c1_595, %c3_596, %c0_597, %c0_598] : memref<2x4x8x16xf32, #tpu.memory_space<vmem>>, vector<1x1x8x16xf32>
    %1390 = vector.shape_cast %1389 : vector<1x1x8x16xf32> to vector<8x16xf32>
    %1391 = vector.shape_cast %1388 : vector<8x16xf32> to vector<1x1x8x16xf32>
    tpu.vector_store %arg5[%c1_595, %c3_596, %c0_597, %c0_598], %1391 {strides = array<i32>} : memref<2x4x8x16xf32, #tpu.memory_space<vmem>>, vector<1x1x8x16xf32>,
    return
  }
  func.func @transform_0(%arg0: i32, %arg1: i32) -> (i32, i32, i32, i32, i32) {
    %c0_i32 = arith.constant 0 : i32
    %c0_i32_0 = arith.constant 0 : i32
    %c0_i32_1 = arith.constant 0 : i32
    %c0_i32_2 = arith.constant 0 : i32
    return %arg0, %c0_i32, %arg1, %c0_i32_0, %c0_i32_1 : i32, i32, i32, i32, i32
  }
  func.func @transform_1(%arg0: i32, %arg1: i32) -> i32 {
    %c0_i32 = arith.constant 0 : i32
    %c0_i32_0 = arith.constant 0 : i32
    return %c0_i32 : i32
  }
  func.func @transform_2(%arg0: i32, %arg1: i32) -> i32 {
    %c0_i32 = arith.constant 0 : i32
    %c0_i32_0 = arith.constant 0 : i32
    return %c0_i32 : i32
  }
  func.func @transform_3(%arg0: i32, %arg1: i32) -> (i32, i32, i32, i32) {
    %c0_i32 = arith.constant 0 : i32
    %c0_i32_0 = arith.constant 0 : i32
    %c0_i32_1 = arith.constant 0 : i32
    return %arg0, %c0_i32, %arg1, %c0_i32_0 : i32, i32, i32, i32
  }
}

</mosaic_0001>

<bundles_post_ra>
// kernel: tpu_custom_call.1
= control target key start
LH: loop header
LB: loop body
LE: loop exit
PB: predicated region body
PF: predicated region fallthrough
CT: control target
= control target key end

     0   :  { %s4605_s0 = inlined_call_operand.hbm [shape: f32[2,4,2,10,18], index: 0, kind: input, shape index: {}]   ;;  %s4606_s1 = inlined_call_operand.hbm [shape: f32[144], index: 1, kind: input, shape index: {}]   ;;  %s4607_s2 = inlined_call_operand.hbm [shape: f32[4], index: 2, kind: input, shape index: {}]   ;;  %s4608_s3 = inlined_call_operand.hbm [shape: f32[2,4,16,16], index: 3, kind: output, shape index: {}]  }
   0x1   :  { %4609 = sst [smem:[#allocation17_spill]] %s4606_s1 }
   0x2   :  { %8 = vsyncpa [#allocation3], 0 }
   0x3   :  { %10 = vsyncpa [#allocation3 + $0x1], 0 }
   0x4   :  { %11 = vsyncpa [#allocation5], 0 }
   0x5   :  { %12 = vsyncpa [#allocation8], 0 }
   0x6   :  { %13 = vsyncpa [#allocation4], 0 }
   0x7   :  { %15 = vsyncpa [#allocation4 + $0x1], 0  ;;  %s3025_s12 = smov 0   ;;  %s3027_s13 = smov 0  }
   0x8   :  { %s3029_s14 = smov 0   ;;  %s3031_s15 = smov 0  }
   0x9   :  { %s3033_s16 = smov 0   ;;  %s3035_s17 = smov 0  }
   0xa LB: > { %s2419_s18 = sadd.s32 4294967295, %s2989_s17   ;;  %s2420_s19 = sadd.s32 4294967294, %s2989_s17   ;;  %s2989_s17 = sphi %s3035_s17, %s21_s17   ;;  %s2985_s16 = sphi %s3033_s16, %s4622_s16   ;;  %s2981_s15 = sphi %s3031_s15, %s4621_s15   ;;  %s2977_s14 = sphi %s3029_s14, %s4620_s14   ;;  %s2973_s13 = sphi %s3027_s13, %s4619_s13   ;;  %s2969_s12 = sphi %s3025_s12, %s4618_s12  }
   0xb   : > { %s30_s20 = sadd.s32 1, %s2985_s16  ;;  %s42_s21 = sadd.s32 1, %s2977_s14 }
   0xc   : > { %p31_p0 = scmp.ge.s32.totalorder %s30_s20, 2  ;;  %p49_p1 = scmp.ne.s32.totalorder %s2977_s14, %s2973_s13 }
   0xd   : > { %p50_p2 = scmp.eq.s32.totalorder %s2989_s17, 0  ;;  %p55_p3 = scmp.ne.s32.totalorder %s2973_s13, %s2969_s12 }
   0xe   : > { %s4624_s20 = smov (%p31_p0, %s30_s20), 0  ;;  %p3070_p5 = scmp.eq.s32.totalorder %s2419_s18, 0 }
   0xf   : > { %p3066_p4 = por %p50_p2, %p49_p1  ;;  %s38_s24 = ssub.s32 %s2985_s16, %s4624_s20 }
  0x10   : > { %p123_p6 = scmp.eq.s32.totalorder %s2419_s18, 1  ;;  %p40_p7 = scmp.eq.s32.totalorder %s38_s24, 0 }
  0x11   : > { %p3078_p8 = por %p3070_p5, %p55_p3  ;;  %p129_p10 = scmp.eq.s32.totalorder %s2420_s19, 1 }
  0x12   : > { %p3082_p9 = por %p123_p6, %p49_p1  ;;  %p2421_p12 = scmp.ge.s32.totalorder %s2989_s17, 1 }
  0x13   : > { %s3087_s27 = scalar_select %p40_p7, %s2977_s14, %s42_s21  }
  0x14   : > { %p3089_p11 = por %p129_p10, %p55_p3  ;;  %p136_p13 = scmp.lt.s32.totalorder %s2989_s17, 3 }
  0x15   : > { %s4617_s1 = sld [smem:[#allocation17_spill]] }
  0x16   : > { %p3095_p0 = pnand %p2421_p12, %p136_p13 }
  0x18   : > { %p2785_p2 = pneg %p3095_p0 }
  0x1a   : > { %p3103_p1 = pnand %p2785_p2, %p3070_p5 }
  0x1b   : > { %s2873_s6 = scalar_lea.hbm %s4617_s1, 32 }
  0x1c   : > { %p2874_p3 = scmp.ne.s32.totalorder %s4617_s1, %s2873_s6  ;;  %p2875_p6 = pneg %p3103_p1 }
  0x1d   : > { %p2880_p12 = scmp.lt.u32.totalorder %s2873_s6, %s4617_s1 }
  0x1e   : > { %p2876_p7 = pnand %p2875_p6, %p2874_p3 }
  0x20   : > { %p2877_p10 = pneg %p2876_p7 }
  0x22   : > { %p2882_p13 = pnand %p2880_p12, %p2877_p10 }
  0x24   : > { %2885 = shalt.err (!%p2882_p13)
}
  0x25   : > { %s2991_s11 = smov [#allocation6]   ;;  %s2886_s4 = scalar_lea.hbm %s4607_s2, 16 }
  0x26   : > { %2788 = dma.hbm_to_smem (!%p3103_p1), %s4617_s1, 32, %s2991_s11, [#allocation5]  }
  0x27   : > { %p2887_p2 = scmp.ne.s32.totalorder %s4607_s2, %s2886_s4  ;;  %p2893_p10 = scmp.lt.u32.totalorder %s2886_s4, %s4607_s2 }
  0x29   : > { %p2889_p3 = pnand %p2887_p2, %p2875_p6 }
  0x2b   : > { %p2890_p7 = pneg %p2889_p3 }
  0x2d   : > { %p2895_p12 = pnand %p2893_p10, %p2890_p7 }
  0x2f   : > { %2898 = shalt.err (!%p2895_p12)
}
  0x30   : > { %s2992_s9 = smov [#allocation7]   ;;  %p2424_p13 = scmp.ge.s32.totalorder %s2989_s17, 2 }
  0x31   : > { %2791 = dma.hbm_to_smem (!%p3103_p1), %s4607_s2, 16, %s2992_s9, [#allocation8]  }
  0x32   : > { %163 = sbr.rel (%p2424_p13) target bundleno = 70 (0x46), region = 24 }
  0x39   : > { %s167_s18 = sand.u32 1, %s2977_s14   ;;  %s2765_s19 = sshll.u32 %s2985_s16, 8 }
  0x3a   : > { %s2425_s30 = sshll.u32 %s167_s18, 7  ;;  %s180_s4 = scalar_lea.hbm %s4605_s0, %s2765_s19 }
  0x3b   : > { %s2770_s5 = scalar_select %p3066_p4, [#allocation0], [#allocation12] }
  0x3c   : > { %s171_s7 = scalar_lea.vmem [#allocation2], %s2425_s30  ;;  %s2993_s9 = smov 512  }
  0x3d   : > { %s193_s6 = sshll.u32 %s171_s7, 4  ;;  %s185_s8 = sld [smem:[%s2770_s5]]   ;;  %s194_s6 = int_to_ptr.vmem [resolvable:$true] %s193_s6 }
  0x3e   : > { %2771 = sst [smem:[#allocation11]] (%p3066_p4), %s2993_s9  ;;  %s2994_s10 = smov 256  }
  0x3f   : > { %2772 = sst [smem:[#allocation11 + $0x1]] (%p3066_p4), %s2994_s10  ;;  %s2995_s11 = smov 2  }
  0x40   : > { %2773 = sst [smem:[#allocation11 + $0x2]] (%p3066_p4), %s2995_s11  ;;  %s2996_s1 = smov 128  }
  0x41   : > { %2774 = sst [smem:[#allocation11 + $0x3]] (%p3066_p4), %s2996_s1  ;;  %s2997_s30 = smov 8  }
  0x42   : > { %2775 = sst [smem:[#allocation11 + $0x4]] (%p3066_p4), %s2996_s1  ;;  %s168_s24 = scalar_lea.sflag [#allocation3], %s167_s18 }
  0x43   : > { %s2428_s19 = sshll.u32 %s185_s8, 26  ;;  %2776 = sst [smem:[#allocation11 + $0x5]] (%p3066_p4), %s2997_s30 }
  0x44   : > { %s2429_s21 = sadd.s32 134217728, %s2428_s19  ;;  %s2998_s5 = smov [#allocation10]  }
  0x45   : > { %2777 = dma.general (%p3066_p4), %s180_s4, 2048, %s194_s6, %s168_s24, %s2998_s5, [#allocation11], %s2429_s21, 0  }
  0x46 PF: > { %218 = sbr.rel (%p3095_p0) target bundleno = 622 (0x26e), region = 32  ;;  %s3164_s7 = sand.u32 (!%p3095_p0), 1, %s2973_s13  }
  0x47   : > { %s2431_s1 = sshll.u32 (!%p3095_p0), %s3164_s7, 7  ;;  %s221_s8 = scalar_lea.sflag (!%p3095_p0), [#allocation3], %s3164_s7 }
  0x48   : > { %s3168_s9 = scalar_lea.vmem (!%p3095_p0), [#allocation2], %s2431_s1 }
  0x4d   : > { %2952 = dma.done.wait (%p3078_p8), %s221_s8, 2048  }
  0x4e   : > { %2954 = vsyncadd (%p3078_p8), %s221_s8, 4294965248 }
  0x4f   : > { %2956 = dma.done.wait (%p3070_p5), [#allocation5], 32  }
  0x50   : > { %2958 = vsyncadd (%p3070_p5), [#allocation5], 4294967264 }
  0x51   : > { %2960 = dma.done.wait (%p3070_p5), [#allocation8], 16  }
  0x52   : > { %2962 = vsyncadd (%p3070_p5), [#allocation8], 4294967280 }
  0x53   : > { %237 = sfence }
  0x54   : > { %s2440_s22 = sld [smem:[#allocation6 + $0x12]]  ;;  %s2438_s29 = sld [smem:[#allocation6 + $0x10]]  ;;  %v3183_v0 = vld [vmem:[%s3168_s9] sm:$0xff]  ;;  %v3238_v51 = vld [vmem:[%s3168_s9 + $0x10] sm:$0xff]  ;;  %vm1241_vm0 = vcmask 130048  }
  0x55   : > { %s2441_s18 = sld [smem:[#allocation6 + $0x13]]  ;;  %s2439_s4 = sld [smem:[#allocation6 + $0x11]]  ;;  %v3200_v17 = vld [vmem:[%s3168_s9 + $0x1] sm:$0xff] }
  0x56   : > { %s2443_s25 = sld [smem:[#allocation6 + $0x21]]  ;;  %s2442_s6 = sld [smem:[#allocation6 + $0x20]]  ;;  %v3219_v34 = vld [vmem:[%s3168_s9 + $0x2] sm:$0xff] }
  0x57   : > { %s2445_s10 = sld [smem:[#allocation6 + $0x23]]  ;;  %s2444_s11 = sld [smem:[#allocation6 + $0x22]] }
  0x58   : > { %s2999_s23 = smov 127   ;;  %s2451_s19 = sld [smem:[#allocation6 + $0x41]] }
  0x59   : > { %s2450_s30 = sld [smem:[#allocation6 + $0x40]]  ;;  %s2453_s21 = sld [smem:[#allocation6 + $0x43]] }
  0x5a   : > { %v292_v1 = vstv %s2440_s22  ;;  %v276_v3 = vstv %s2438_s29  ;;  %s2452_s24 = sld [smem:[#allocation6 + $0x42]]  ;;  %s3000_s5 = smov 126  }
  0x5b   : > { %v293_v2 = vmul.f32 %v292_v1, %v3183_v0  ;;  %v300_v4 = vstv %s2441_s18  ;;  %v277_v5 = vmul.f32 %v276_v3, %v3183_v0  ;;  %v284_v6 = vstv %s2439_s4  ;;  %s2455_s1 = sld [smem:[#allocation6 + $0x51]]  ;;  %s2454_s8 = sld [smem:[#allocation6 + $0x50]] }
  0x5c   : > { %v301_v7 = vmul.f32 %v300_v4, %v3183_v0  ;;  %v285_v8 = vmul.f32 %v284_v6, %v3183_v0  ;;  %v316_v9 = vstv %s2443_s25  ;;  %v308_v10 = vstv %s2442_s6  ;;  %s2457_s22 = sld [smem:[#allocation6 + $0x53]]  ;;  %s2456_s29 = sld [smem:[#allocation6 + $0x52]] }
  0x5d   : > { %295 = vrot.lane.b32.xlu1 %v293_v2, %s2999_s23  ;;  %279 = vrot.lane.b32.xlu0 %v277_v5, %s2999_s23  ;;  %v317_v11 = vmul.f32 %v316_v9, %v3183_v0  ;;  %v309_v12 = vmul.f32 %v308_v10, %v3183_v0  ;;  %v332_v13 = vstv %s2445_s10  ;;  %v324_v14 = vstv %s2444_s11  ;;  %s2463_s18 = sld [smem:[#allocation6 + $0x71]]  ;;  %s2462_s4 = sld [smem:[#allocation6 + $0x70]] }
  0x5e   : > { %v333_v15 = vmul.f32 %v332_v13, %v3183_v0  ;;  %v325_v16 = vmul.f32 %v324_v14, %v3183_v0  ;;  %v365_v18 = vstv %s2451_s19  ;;  %s2465_s25 = sld [smem:[#allocation6 + $0x73]]  ;;  %s2464_s6 = sld [smem:[#allocation6 + $0x72]]  ;;  %v3257_v5 = vld [vmem:[%s3168_s9 + $0x11] sm:$0xff] }
  0x5f   : > { %v357_v19 = vstv %s2450_s30  ;;  %v366_v20 = vmul.f32 %v365_v18, %v3200_v17  ;;  %v381_v22 = vstv %s2453_s21  ;;  %s2467_s10 = sld [smem:[#allocation6 + $0x81]]  ;;  %s2466_s11 = sld [smem:[#allocation6 + $0x80]] }
  0x60   : > { %v358_v21 = vmul.f32 %v357_v19, %v3200_v17  ;;  %v373_v23 = vstv %s2452_s24  ;;  %v382_v24 = vmul.f32 %v381_v22, %v3200_v17  ;;  %s2469_s19 = sld [smem:[#allocation6 + $0x83]]  ;;  %s2468_s30 = sld [smem:[#allocation6 + $0x82]] }
  0x61   : > { %303 = vrot.lane.b32.xlu1 %v301_v7, %s2999_s23  ;;  %287 = vrot.lane.b32.xlu0 %v285_v8, %s2999_s23  ;;  %v374_v25 = vmul.f32 %v373_v23, %v3200_v17  ;;  %v397_v26 = vstv %s2455_s1  ;;  %v389_v27 = vstv %s2454_s8  ;;  %s2476_s21 = sld [smem:[#allocation6 + $0x15]]  ;;  %s2475_s24 = sld [smem:[#allocation6 + $0x14]] }
  0x62   : > { %v398_v28 = vmul.f32 %v397_v26, %v3200_v17  ;;  %v390_v29 = vmul.f32 %v389_v27, %v3200_v17  ;;  %v413_v30 = vstv %s2457_s22  ;;  %v405_v31 = vstv %s2456_s29  ;;  %s2478_s1 = sld [smem:[#allocation6 + $0x17]]  ;;  %s2477_s8 = sld [smem:[#allocation6 + $0x16]]  ;;  %v3276_v23 = vld [vmem:[%s3168_s9 + $0x12] sm:$0xff] }
  0x63   : > { %v414_v32 = vmul.f32 %v413_v30, %v3200_v17  ;;  %v406_v33 = vmul.f32 %v405_v31, %v3200_v17  ;;  %v446_v35 = vstv %s2463_s18  ;;  %v438_v36 = vstv %s2462_s4  ;;  %s2480_s22 = sld [smem:[#allocation6 + $0x25]]  ;;  %s2479_s29 = sld [smem:[#allocation6 + $0x24]] }
  0x64   : > { %v447_v37 = vmul.f32 %v446_v35, %v3219_v34  ;;  %v439_v38 = vmul.f32 %v438_v36, %v3219_v34  ;;  %v462_v39 = vstv %s2465_s25  ;;  %v454_v40 = vstv %s2464_s6  ;;  %s2482_s18 = sld [smem:[#allocation6 + $0x27]]  ;;  %s2481_s4 = sld [smem:[#allocation6 + $0x26]] }
  0x65   : > { %319 = vrot.lane.b32.xlu1 %v317_v11, %s3000_s5  ;;  %311 = vrot.lane.b32.xlu0 %v309_v12, %s3000_s5  ;;  %v463_v41 = vmul.f32 %v462_v39, %v3219_v34  ;;  %v455_v42 = vmul.f32 %v454_v40, %v3219_v34  ;;  %v478_v43 = vstv %s2467_s10  ;;  %v470_v44 = vstv %s2466_s11  ;;  %s2489_s25 = sld [smem:[#allocation6 + $0x45]]  ;;  %s2488_s6 = sld [smem:[#allocation6 + $0x44]] }
  0x66   : > { %v479_v45 = vmul.f32 %v478_v43, %v3219_v34  ;;  %v471_v46 = vmul.f32 %v470_v44, %v3219_v34  ;;  %v494_v47 = vstv %s2469_s19  ;;  %v486_v48 = vstv %s2468_s30  ;;  %s2491_s10 = sld [smem:[#allocation6 + $0x47]]  ;;  %s2490_s11 = sld [smem:[#allocation6 + $0x46]] }
  0x67   : > { %v495_v49 = vmul.f32 %v494_v47, %v3219_v34  ;;  %v487_v50 = vmul.f32 %v486_v48, %v3219_v34  ;;  %v528_v52 = vstv %s2476_s21  ;;  %v520_v53 = vstv %s2475_s24  ;;  %s2493_s19 = sld [smem:[#allocation6 + $0x55]]  ;;  %s2492_s30 = sld [smem:[#allocation6 + $0x54]] }
  0x68   : > { %v529_v54 = vmul.f32 %v3238_v51, %v528_v52  ;;  %v521_v55 = vmul.f32 %v3238_v51, %v520_v53  ;;  %v544_v56 = vstv %s2478_s1  ;;  %v536_v57 = vstv %s2477_s8  ;;  %s2495_s21 = sld [smem:[#allocation6 + $0x57]]  ;;  %s2494_s24 = sld [smem:[#allocation6 + $0x56]] }
  0x69   : > { %335 = vrot.lane.b32.xlu1 %v333_v15, %s3000_s5  ;;  %327 = vrot.lane.b32.xlu0 %v325_v16, %s3000_s5  ;;  %v545_v58 = vmul.f32 %v3238_v51, %v544_v56  ;;  %v537_v59 = vmul.f32 %v3238_v51, %v536_v57  ;;  %v560_v60 = vstv %s2480_s22  ;;  %v552_v61 = vstv %s2479_s29  ;;  %s2502_s1 = sld [smem:[#allocation6 + $0x75]]  ;;  %s2501_s8 = sld [smem:[#allocation6 + $0x74]] }
  0x6a   : > { %v561_v62 = vmul.f32 %v3238_v51, %v560_v60  ;;  %v553_v63 = vmul.f32 %v3238_v51, %v552_v61  ;;  %v576_v1 = vstv %s2482_s18  ;;  %v568_v2 = vstv %s2481_s4  ;;  %s2504_s22 = sld [smem:[#allocation6 + $0x77]]  ;;  %s2503_s29 = sld [smem:[#allocation6 + $0x76]] }
  0x6b   : > { %v577_v3 = vmul.f32 %v3238_v51, %v576_v1  ;;  %v569_v4 = vmul.f32 %v3238_v51, %v568_v2  ;;  %v609_v6 = vstv %s2489_s25  ;;  %v601_v7 = vstv %s2488_s6  ;;  %s2506_s18 = sld [smem:[#allocation6 + $0x85]]  ;;  %s2505_s4 = sld [smem:[#allocation6 + $0x84]] }
  0x6c   : > { %v610_v8 = vmul.f32 %v3257_v5, %v609_v6  ;;  %v602_v9 = vmul.f32 %v3257_v5, %v601_v7  ;;  %v625_v10 = vstv %s2491_s10  ;;  %v617_v11 = vstv %s2490_s11  ;;  %s2508_s25 = sld [smem:[#allocation6 + $0x87]]  ;;  %s2507_s6 = sld [smem:[#allocation6 + $0x86]] }
  0x6d   : > { %368 = vrot.lane.b32.xlu1 %v366_v20, %s2999_s23  ;;  %360 = vrot.lane.b32.xlu0 %v358_v21, %s2999_s23  ;;  %v626_v12 = vmul.f32 %v3257_v5, %v625_v10  ;;  %v618_v13 = vmul.f32 %v3257_v5, %v617_v11  ;;  %v641_v14 = vstv %s2493_s19  ;;  %v633_v15 = vstv %s2492_s30  ;;  %s2515_s10 = sld [smem:[#allocation6 + $0x19]]  ;;  %s2514_s11 = sld [smem:[#allocation6 + $0x18]] }
  0x6e   : > { %v642_v16 = vmul.f32 %v3257_v5, %v641_v14  ;;  %v634_v18 = vmul.f32 %v3257_v5, %v633_v15  ;;  %v657_v19 = vstv %s2495_s21  ;;  %v649_v20 = vstv %s2494_s24  ;;  %s2517_s19 = sld [smem:[#allocation6 + $0x1b]]  ;;  %s2516_s30 = sld [smem:[#allocation6 + $0x1a]] }
  0x6f   : > { %v658_v21 = vmul.f32 %v3257_v5, %v657_v19  ;;  %v650_v22 = vmul.f32 %v3257_v5, %v649_v20  ;;  %s2519_s21 = sld [smem:[#allocation6 + $0x29]]  ;;  %s2518_s24 = sld [smem:[#allocation6 + $0x28]]  ;;  %v3355_v19 = vld [vmem:[%s3168_s9 + $0x22] sm:$0xff] }
  0x71   : > { %384 = vrot.lane.b32.xlu1 %v382_v24, %s2999_s23  ;;  %376 = vrot.lane.b32.xlu0 %v374_v25, %s2999_s23  ;;  %v690_v24 = vstv %s2502_s1  ;;  %v682_v25 = vstv %s2501_s8  ;;  %s2521_s1 = sld [smem:[#allocation6 + $0x2b]]  ;;  %s2520_s8 = sld [smem:[#allocation6 + $0x2a]] }
  0x72   : > { %v691_v26 = vmul.f32 %v3276_v23, %v690_v24  ;;  %v683_v27 = vmul.f32 %v3276_v23, %v682_v25 }
  0x73   : > { %v764_v43 = vstv %s2514_s11  ;;  %s2533_s11 = sld [smem:[#allocation6 + $0x5a]] }
  0x74   : > { %v780_v47 = vstv %s2516_s30  ;;  %s3328_s30 = sld [smem:[#allocation6 + $0x1]] }
  0x75   : > { %400 = vrot.lane.b32.xlu1 %v398_v28, %s3000_s5  ;;  %392 = vrot.lane.b32.xlu0 %v390_v29, %s3000_s5  ;;  %v706_v28 = vstv %s2504_s22  ;;  %v698_v29 = vstv %s2503_s29  ;;  %s2528_s22 = sld [smem:[#allocation6 + $0x49]]  ;;  %s2527_s29 = sld [smem:[#allocation6 + $0x48]] }
  0x76   : > { %v707_v30 = vmul.f32 %v3276_v23, %v706_v28  ;;  %v699_v31 = vmul.f32 %v3276_v23, %v698_v29  ;;  %v796_v52 = vstv %s2518_s24  ;;  %s3332_s24 = sld [smem:[#allocation6]] }
  0x77   : > { %v812_v56 = vstv %s2520_s8  ;;  %s3340_s8 = sld [smem:[#allocation6 + $0x7b]] }
  0x79   : > { %416 = vrot.lane.b32.xlu1 %v414_v32, %s3000_s5  ;;  %408 = vrot.lane.b32.xlu0 %v406_v33, %s3000_s5  ;;  %v722_v32 = vstv %s2506_s18  ;;  %v714_v33 = vstv %s2505_s4  ;;  %s2530_s18 = sld [smem:[#allocation6 + $0x4b]]  ;;  %s2529_s4 = sld [smem:[#allocation6 + $0x4a]] }
  0x7a   : > { %v723_v35 = vmul.f32 %v3276_v23, %v722_v32  ;;  %v715_v36 = vmul.f32 %v3276_v23, %v714_v33  ;;  %v893_v14 = vstv %s2533_s11  ;;  %s3371_s11 = sld [smem:[#allocation6 + $0x32]] }
  0x7b   : > { %v853_v60 = vstv %s2528_s22  ;;  %v845_v61 = vstv %s2527_s29  ;;  %s3344_s22 = sld [smem:[#allocation6 + $0x7a]] }
  0x7c   : > { %s3346_s29 = sld [smem:[#allocation6 + $0x2]]  ;;  %v260_v25 = vstv %s3332_s24  ;;  %s3387_s24 = sld [smem:[#allocation6 + $0x60]] }
  0x7d   : > { %449 = vrot.lane.b32.xlu1 %v447_v37, %s2999_s23  ;;  %441 = vrot.lane.b32.xlu0 %v439_v38, %s2999_s23  ;;  %v738_v37 = vstv %s2508_s25  ;;  %v730_v38 = vstv %s2507_s6  ;;  %s2532_s25 = sld [smem:[#allocation6 + $0x59]]  ;;  %s2531_s6 = sld [smem:[#allocation6 + $0x58]]  ;;  %v261_v32 = vmul.f32 %v260_v25, %v3183_v0 }
  0x7e   : > { %v739_v39 = vmul.f32 %v3276_v23, %v738_v37  ;;  %v731_v40 = vmul.f32 %v3276_v23, %v730_v38 }
  0x7f   : > { %v869_v1 = vstv %s2530_s18  ;;  %v861_v2 = vstv %s2529_s4  ;;  %s3350_s18 = sld [smem:[#allocation6 + $0x31]]  ;;  %s3358_s4 = sld [smem:[#allocation6 + $0x30]] }
  0x81   : > { %465 = vrot.lane.b32.xlu1 %v463_v41, %s2999_s23  ;;  %457 = vrot.lane.b32.xlu0 %v455_v42, %s2999_s23  ;;  %v3295_v41 = vld [vmem:[%s3168_s9 + $0x20] sm:$0xff]  ;;  %v772_v42 = vstv %s2515_s10  ;;  %s2534_s10 = sld [smem:[#allocation6 + $0x5b]] }
  0x82   : > { %v773_v44 = vmul.f32 %v3295_v41, %v772_v42 }
  0x83   : > { %v885_v6 = vstv %s2532_s25  ;;  %s3360_s25 = sld [smem:[#allocation6 + $0x89]] }
  0x85   : > { %481 = vrot.lane.b32.xlu1 %v479_v45, %s3000_s5  ;;  %473 = vrot.lane.b32.xlu0 %v471_v46, %s3000_s5  ;;  %v765_v45 = vmul.f32 %v3295_v41, %v764_v43  ;;  %v788_v46 = vstv %s2517_s19  ;;  %s3324_s19 = sld [smem:[#allocation6 + $0x79]]  ;;  %v341_v43 = vstv %s3358_s4  ;;  %s3423_s4 = sld [smem:[#allocation6 + $0x1e]] }
  0x86   : > { %v789_v48 = vmul.f32 %v3295_v41, %v788_v46 }
  0x89   : > { %497 = vrot.lane.b32.xlu1 %v495_v49, %s3000_s5  ;;  %489 = vrot.lane.b32.xlu0 %v487_v50, %s3000_s5  ;;  %v781_v49 = vmul.f32 %v3295_v41, %v780_v47  ;;  %v804_v50 = vstv %s2519_s21  ;;  %s3330_s21 = sld [smem:[#allocation6 + $0x78]] }
  0x8a   : > { %v805_v53 = vmul.f32 %v3295_v41, %v804_v50 }
  0x8b   : > { %v934_v20 = vstv %s3324_s19  ;;  %s3378_s19 = sld [smem:[#allocation6 + $0x8b]] }
  0x8d   : > { %531 = vrot.lane.b32.xlu1 %v529_v54, %s2999_s23  ;;  %523 = vrot.lane.b32.xlu0 %v521_v55, %s2999_s23  ;;  %v797_v54 = vmul.f32 %v3295_v41, %v796_v52  ;;  %v820_v55 = vstv %s2521_s1  ;;  %s3337_s1 = sld [smem:[#allocation6 + $0x3]] }
  0x8e   : > { %v821_v57 = vmul.f32 %v3295_v41, %v820_v55 }
  0x8f   : > { %v926_v24 = vstv %s3330_s21  ;;  %s3384_s21 = sld [smem:[#allocation6 + $0x61]] }
  0x91   : > { %547 = vrot.lane.b32.xlu1 %v545_v58, %s2999_s23  ;;  %539 = vrot.lane.b32.xlu0 %v537_v59, %s2999_s23  ;;  %v813_v58 = vmul.f32 %v3295_v41, %v812_v56  ;;  %v3314_v59 = vld [vmem:[%s3168_s9 + $0x21] sm:$0xff]  ;;  %v342_v56 = vmul.f32 %v341_v43, %v3200_v17 }
  0x92   : > { %v886_v10 = vmul.f32 %v3314_v59, %v885_v6 }
  0x93   : > { %v272_v28 = vstv %s3337_s1  ;;  %s3397_s1 = sld [smem:[#allocation6 + $0x1d]] }
  0x94   : > { %v273_v38 = vmul.f32 %v272_v28, %v3183_v0 }
  0x95   : > { %563 = vrot.lane.b32.xlu1 %v561_v62, %s3000_s5  ;;  %555 = vrot.lane.b32.xlu0 %v553_v63, %s3000_s5  ;;  %v854_v62 = vmul.f32 %v3314_v59, %v853_v60  ;;  %v846_v63 = vmul.f32 %v3314_v59, %v845_v61  ;;  %v982_v61 = vstv %s3378_s19  ;;  %s3456_s19 = sld [smem:[#allocation6 + $0x5]] }
  0x99   : > { %579 = vrot.lane.b32.xlu1 %v577_v3, %s3000_s5  ;;  %571 = vrot.lane.b32.xlu0 %v569_v4, %s3000_s5  ;;  %v870_v3 = vmul.f32 %v3314_v59, %v869_v1  ;;  %v862_v4 = vmul.f32 %v3314_v59, %v861_v2 }
  0x9d   : > { %612 = vrot.lane.b32.xlu1 %v610_v8, %s2999_s23  ;;  %604 = vrot.lane.b32.xlu0 %v602_v9, %s2999_s23  ;;  %v877_v8 = vstv %s2531_s6  ;;  %s3364_s6 = sld [smem:[#allocation6 + $0x88]] }
  0x9e   : > { %v878_v11 = vmul.f32 %v3314_v59, %v877_v8 }
  0xa1   : > { %628 = vrot.lane.b32.xlu1 %v626_v12, %s2999_s23  ;;  %620 = vrot.lane.b32.xlu0 %v618_v13, %s2999_s23  ;;  %v901_v12 = vstv %s2534_s10  ;;  %s3367_s10 = sld [smem:[#allocation6 + $0x33]] }
  0xa5   : > { %644 = vrot.lane.b32.xlu1 %v642_v16, %s3000_s5  ;;  %636 = vrot.lane.b32.xlu0 %v634_v18, %s3000_s5  ;;  %v902_v16 = vmul.f32 %v3314_v59, %v901_v12  ;;  %v894_v18 = vmul.f32 %v3314_v59, %v893_v14 }
  0xa9   : > { %660 = vrot.lane.b32.xlu1 %v658_v21, %s3000_s5  ;;  %652 = vrot.lane.b32.xlu0 %v650_v22, %s3000_s5  ;;  %v264_v21 = vstv %s3328_s30  ;;  %s3380_s30 = sld [smem:[#allocation6 + $0x8a]] }
  0xaa   : > { %v265_v29 = vmul.f32 %v264_v21, %v3183_v0 }
  0xad   : > { %693 = vrot.lane.b32.xlu1 %v691_v26, %s2999_s23  ;;  %685 = vrot.lane.b32.xlu0 %v683_v27, %s2999_s23  ;;  %v935_v27 = vmul.f32 %v3355_v19, %v934_v20 }
  0xb1   : > { %709 = vrot.lane.b32.xlu1 %v707_v30, %s2999_s23  ;;  %701 = vrot.lane.b32.xlu0 %v699_v31, %s2999_s23  ;;  %v927_v30 = vmul.f32 %v3355_v19, %v926_v24  ;;  %v950_v31 = vstv %s3340_s8  ;;  %s3399_s8 = sld [smem:[#allocation6 + $0x1c]] }
  0xb5   : > { %725 = vrot.lane.b32.xlu1 %v723_v35, %s3000_s5  ;;  %717 = vrot.lane.b32.xlu0 %v715_v36, %s3000_s5  ;;  %v942_v35 = vstv %s3344_s22  ;;  %v268_v36 = vstv %s3346_s29  ;;  %s3403_s22 = sld [smem:[#allocation6 + $0x63]]  ;;  %s3407_s29 = sld [smem:[#allocation6 + $0x62]] }
  0xb6   : > { %v269_v46 = vmul.f32 %v268_v36, %v3183_v0  ;;  %v349_v0 = vstv %s3371_s11  ;;  %s3452_s11 = sld [smem:[#allocation6 + $0x2e]] }
  0xb7   : > { %v350_v8 = vmul.f32 %v349_v0, %v3200_v17 }
  0xb9   : > { %741 = vrot.lane.b32.xlu1 %v739_v39, %s3000_s5  ;;  %733 = vrot.lane.b32.xlu0 %v731_v40, %s3000_s5  ;;  %v345_v39 = vstv %s3350_s18  ;;  %v951_v40 = vmul.f32 %v3355_v19, %v950_v31  ;;  %s3418_s18 = sld [smem:[#allocation6 + $0x1f]] }
  0xba   : > { %v346_v52 = vmul.f32 %v345_v39, %v3200_v17 }
  0xbb   : > { %v434_v24 = vstv %s3403_s22  ;;  %s3480_s22 = sld [smem:[#allocation6 + $0x4f]] }
  0xbc   : > { %v435_v36 = vmul.f32 %v434_v24, %v3219_v34  ;;  %v1056_v0 = vstv %s3452_s11  ;;  %s2579_s11 = sld [smem:[#allocation6 + $0x7c]] }
  0xbd   : > { %775 = vrot.lane.b32.xlu1 %v773_v44, %s2999_s23  ;;  %767 = vrot.lane.b32.xlu0 %v765_v45, %s2999_s23  ;;  %v943_v44 = vmul.f32 %v3355_v19, %v942_v35  ;;  %v966_v45 = vstv %s3360_s25  ;;  %s3437_s25 = sld [smem:[#allocation6 + $0x2d]] }
  0xbf   : > { %v1032_v35 = vstv %s3418_s18  ;;  %s3496_s18 = sld [smem:[#allocation6 + $0x5d]] }
  0xc1   : > { %791 = vrot.lane.b32.xlu1 %v789_v48, %s2999_s23  ;;  %783 = vrot.lane.b32.xlu0 %v781_v49, %s2999_s23  ;;  %v958_v49 = vstv %s3364_s6  ;;  %s3441_s6 = sld [smem:[#allocation6 + $0x2c]] }
  0xc2   : > { %v959_v60 = vmul.f32 %v3355_v19, %v958_v49 }
  0xc5   : > { %807 = vrot.lane.b32.xlu1 %v805_v53, %s3000_s5  ;;  %799 = vrot.lane.b32.xlu0 %v797_v54, %s3000_s5  ;;  %v353_v54 = vstv %s3367_s10  ;;  %s3450_s10 = sld [smem:[#allocation6 + $0x2f]] }
  0xc6   : > { %v354_v1 = vmul.f32 %v353_v54, %v3200_v17 }
  0xc9   : > { %823 = vrot.lane.b32.xlu1 %v821_v57, %s3000_s5  ;;  %815 = vrot.lane.b32.xlu0 %v813_v58, %s3000_s5  ;;  %v967_v57 = vmul.f32 %v3355_v19, %v966_v45 }
  0xcd   : > { %856 = vrot.lane.b32.xlu1 %v854_v62, %s2999_s23  ;;  %848 = vrot.lane.b32.xlu0 %v846_v63, %s2999_s23  ;;  %v974_v62 = vstv %s3380_s30  ;;  %s3458_s30 = sld [smem:[#allocation6 + $0x4]] }
  0xcf   : > { %v3326_v7 = vpop.permute.xlu1 %295  ;;  %v280_v9 = vpop.permute.xlu0 %279 }
  0xd0   : > { %v282_v47 = vadd.f32 %v280_v9, %v261_v32  ;;  %v298_v63 = vadd.f32 %v3326_v7, %v269_v46  ;;  %v983_v7 = vmul.f32 %v3355_v19, %v982_v61 }
  0xd1   : > { %872 = vrot.lane.b32.xlu1 %v870_v3, %s2999_s23  ;;  %864 = vrot.lane.b32.xlu0 %v862_v4, %s2999_s23  ;;  %v426_v3 = vstv %s3384_s21  ;;  %s3465_s21 = sld [smem:[#allocation6 + $0x4d]] }
  0xd2   : > { %v427_v17 = vmul.f32 %v426_v3, %v3219_v34 }
  0xd3   : > { %v3342_v13 = vpop.permute.xlu1 %303  ;;  %v288_v15 = vpop.permute.xlu0 %287  ;;  %v504_v61 = vstv %s3458_s30  ;;  %s3539_s30 = sld [smem:[#allocation6 + $0x7e]] }
  0xd4   : > { %v290_v42 = vadd.f32 %v288_v15, %v265_v29  ;;  %v306_v58 = vadd.f32 %v3342_v13, %v273_v38  ;;  %v975_v13 = vmul.f32 %v3355_v19, %v974_v62  ;;  %v3432_v15 = vld [vmem:[%s3168_s9 + $0x30] sm:$0xff] }
  0xd5   : > { %888 = vrot.lane.b32.xlu1 %v886_v10, %s3000_s5  ;;  %880 = vrot.lane.b32.xlu0 %v878_v11, %s3000_s5  ;;  %v422_v10 = vstv %s3387_s24  ;;  %v1033_v46 = vmul.f32 %v3432_v15, %v1032_v35  ;;  %s3467_s24 = sld [smem:[#allocation6 + $0x4c]] }
  0xd7   : > { %v320_v22 = vpop.permute.xlu1 %319  ;;  %v312_v26 = vpop.permute.xlu0 %311  ;;  %v1097_v3 = vstv %s3465_s21  ;;  %s3543_s21 = sld [smem:[#allocation6 + $0x35]] }
  0xd8   : > { %v322_v50 = vadd.f32 %v320_v22, %v290_v42  ;;  %v314_v55 = vadd.f32 %v312_v26, %v282_v47  ;;  %v423_v22 = vmul.f32 %v422_v10, %v3219_v34  ;;  %v505_v10 = vmul.f32 %v3238_v51, %v504_v61 }
  0xd9   : > { %904 = vrot.lane.b32.xlu1 %v902_v16, %s3000_s5  ;;  %896 = vrot.lane.b32.xlu0 %v894_v18, %s3000_s5  ;;  %v1016_v16 = vstv %s3397_s1  ;;  %v1008_v18 = vstv %s3399_s8  ;;  %s3470_s1 = sld [smem:[#allocation6 + $0x7]]  ;;  %s3472_s8 = sld [smem:[#allocation6 + $0x6]] }
  0xda   : > { %v347_v6 = vadd.f32 %v346_v52, %v322_v50  ;;  %v343_v12 = vadd.f32 %v342_v56, %v314_v55  ;;  %v1009_v31 = vmul.f32 %v3432_v15, %v1008_v18  ;;  %v1040_v52 = vstv %s3441_s6  ;;  %s3517_s6 = sld [smem:[#allocation6 + $0x5e]] }
  0xdb   : > { %v336_v33 = vpop.permute.xlu1 %335  ;;  %v328_v37 = vpop.permute.xlu0 %327  ;;  %v1041_v55 = vmul.f32 %v3432_v15, %v1040_v52  ;;  %v1064_v56 = vstv %s3450_s10  ;;  %s3526_s10 = sld [smem:[#allocation6 + $0x7d]] }
  0xdc   : > { %v338_v4 = vadd.f32 %v336_v33, %v306_v58  ;;  %v330_v11 = vadd.f32 %v328_v37, %v298_v63  ;;  %v508_v58 = vstv %s3456_s19  ;;  %v1065_v62 = vmul.f32 %v3432_v15, %v1064_v56  ;;  %s3536_s19 = sld [smem:[#allocation6 + $0x7f]] }
  0xdd   : > { %937 = vrot.lane.b32.xlu1 %v935_v27, %s2999_s23  ;;  %929 = vrot.lane.b32.xlu0 %v927_v30, %s2999_s23  ;;  %v430_v27 = vstv %s3407_s29  ;;  %v1017_v30 = vmul.f32 %v3432_v15, %v1016_v16  ;;  %s3483_s29 = sld [smem:[#allocation6 + $0x4e]]  ;;  %v1057_v63 = vmul.f32 %v3432_v15, %v1056_v0  ;;  %v1186_v56 = vstv %s3539_s30  ;;  %s3614_s30 = sld [smem:[#allocation6 + $0x10]] }
  0xde   : > { %v355_v19 = vadd.f32 %v354_v1, %v338_v4  ;;  %v351_v28 = vadd.f32 %v350_v8, %v330_v11  ;;  %v431_v42 = vmul.f32 %v430_v27, %v3219_v34  ;;  %v1048_v34 = vstv %s3437_s25  ;;  %s3511_s25 = sld [smem:[#allocation6 + $0x5f]] }
  0xdf   : > { %v369_v48 = vpop.permute.xlu1 %368  ;;  %v361_v53 = vpop.permute.xlu0 %360  ;;  %v1049_v54 = vmul.f32 %v3432_v15, %v1048_v34  ;;  %v1089_v4 = vstv %s3467_s24  ;;  %v516_v11 = vstv %s3470_s1  ;;  %s3551_s24 = sld [smem:[#allocation6 + $0x34]]  ;;  %s3553_s1 = sld [smem:[#allocation6 + $0x8d]] }
  0xe0   : > { %v371_v14 = vadd.f32 %v369_v48, %v347_v6  ;;  %v363_v20 = vadd.f32 %v361_v53, %v343_v12  ;;  %v509_v6 = vmul.f32 %v3238_v51, %v508_v58 }
  0xe1   : > { %953 = vrot.lane.b32.xlu1 %v951_v40, %s2999_s23  ;;  %945 = vrot.lane.b32.xlu0 %v943_v44, %s2999_s23  ;;  %v1024_v40 = vstv %s3423_s4  ;;  %s3500_s4 = sld [smem:[#allocation6 + $0x5c]] }
  0xe2   : > { %v1025_v47 = vmul.f32 %v3432_v15, %v1024_v40 }
  0xe3   : > { %v385_v2 = vpop.permute.xlu1 %384  ;;  %v377_v9 = vpop.permute.xlu0 %376 }
  0xe4   : > { %v387_v32 = vadd.f32 %v385_v2, %v355_v19  ;;  %v379_v37 = vadd.f32 %v377_v9, %v351_v28  ;;  %v3491_v2 = vld [vmem:[%s3168_s9 + $0x31] sm:$0xff]  ;;  %v1145_v40 = vstv %s3511_s25  ;;  %s3571_s25 = sld [smem:[#allocation6 + $0x65]] }
  0xe5   : > { %969 = vrot.lane.b32.xlu1 %v967_v57, %s3000_s5  ;;  %961 = vrot.lane.b32.xlu0 %v959_v60, %s3000_s5  ;;  %v1098_v15 = vmul.f32 %v3491_v2, %v1097_v3  ;;  %v1090_v16 = vmul.f32 %v3491_v2, %v1089_v4  ;;  %v585_v61 = vstv %s3551_s24  ;;  %s3622_s24 = sld [smem:[#allocation6 + $0x12]] }
  0xe7   : > { %v401_v21 = vpop.permute.xlu1 %400  ;;  %v393_v26 = vpop.permute.xlu0 %392 }
  0xe8   : > { %v403_v25 = vadd.f32 %v401_v21, %v371_v14  ;;  %v395_v29 = vadd.f32 %v393_v26, %v363_v20  ;;  %v1113_v20 = vstv %s3480_s22  ;;  %v517_v21 = vmul.f32 %v3238_v51, %v516_v11  ;;  %s3559_s22 = sld [smem:[#allocation6 + $0x37]] }
  0xe9   : > { %985 = vrot.lane.b32.xlu1 %v983_v7, %s3000_s5  ;;  %977 = vrot.lane.b32.xlu0 %v975_v13, %s3000_s5  ;;  %v512_v13 = vstv %s3472_s8  ;;  %s3555_s8 = sld [smem:[#allocation6 + $0x8c]]  ;;  %v586_v11 = vmul.f32 %v3257_v5, %v585_v61  ;;  %v1295_v61 = vstv %s3614_s30  ;;  %s3688_s30 = sld [smem:[#allocation6 + $0x42]] }
  0xea   : > { %v428_v33 = vadd.f32 %v427_v17, %v403_v25  ;;  %v424_v39 = vadd.f32 %v423_v22, %v395_v29  ;;  %v1105_v25 = vstv %s3483_s29  ;;  %v513_v26 = vmul.f32 %v3238_v51, %v512_v13  ;;  %s3564_s29 = sld [smem:[#allocation6 + $0x36]] }
  0xeb   : > { %v417_v38 = vpop.permute.xlu1 %416  ;;  %v409_v44 = vpop.permute.xlu0 %408 }
  0xec   : > { %v419_v43 = vadd.f32 %v417_v38, %v387_v32  ;;  %v411_v45 = vadd.f32 %v409_v44, %v379_v37 }
  0xed   : > { %1019 = vrot.lane.b32.xlu1 %v1017_v30, %s2999_s23  ;;  %1011 = vrot.lane.b32.xlu0 %v1009_v31, %s2999_s23  ;;  %v1114_v30 = vmul.f32 %v3491_v2, %v1113_v20  ;;  %v1106_v31 = vmul.f32 %v3491_v2, %v1105_v25 }
  0xee   : > { %v436_v48 = vadd.f32 %v435_v36, %v419_v43  ;;  %v432_v50 = vadd.f32 %v431_v42, %v411_v45  ;;  %v1121_v36 = vstv %s3500_s4  ;;  %v1137_v43 = vstv %s3517_s6  ;;  %s3569_s4 = sld [smem:[#allocation6 + $0x8e]]  ;;  %s3573_s6 = sld [smem:[#allocation6 + $0x64]] }
  0xef   : > { %v450_v49 = vpop.permute.xlu1 %449  ;;  %v442_v53 = vpop.permute.xlu0 %441  ;;  %v1146_v45 = vmul.f32 %v3491_v2, %v1145_v40  ;;  %v1202_v4 = vstv %s3555_s8  ;;  %s3627_s8 = sld [smem:[#allocation6 + $0x8]] }
  0xf0   : > { %v452_v1 = vadd.f32 %v450_v49, %v428_v33  ;;  %v444_v8 = vadd.f32 %v442_v53, %v424_v39  ;;  %v1129_v33 = vstv %s3496_s18  ;;  %v1122_v39 = vmul.f32 %v3491_v2, %v1121_v36  ;;  %s3566_s18 = sld [smem:[#allocation6 + $0x8f]] }
  0xf1   : > { %1035 = vrot.lane.b32.xlu1 %v1033_v46, %s2999_s23  ;;  %1027 = vrot.lane.b32.xlu0 %v1025_v47, %s2999_s23  ;;  %v1130_v38 = vmul.f32 %v3491_v2, %v1129_v33  ;;  %v1138_v46 = vmul.f32 %v3491_v2, %v1137_v43  ;;  %v3548_v47 = vld [vmem:[%s3168_s9 + $0x32] sm:$0xff]  ;;  %v1170_v49 = vstv %s2579_s11  ;;  %s3588_s11 = sld [smem:[#allocation6 + $0x66]] }
  0xf2   : > { %v1171_v53 = vmul.f32 %v3548_v47, %v1170_v49 }
  0xf3   : > { %v466_v57 = vpop.permute.xlu1 %465  ;;  %v458_v60 = vpop.permute.xlu0 %457 }
  0xf4   : > { %v468_v18 = vadd.f32 %v466_v57, %v436_v48  ;;  %v460_v22 = vadd.f32 %v458_v60, %v432_v50  ;;  %v1178_v48 = vstv %s3526_s10  ;;  %v589_v57 = vstv %s3543_s21  ;;  %s3585_s10 = sld [smem:[#allocation6 + $0x67]]  ;;  %s3620_s21 = sld [smem:[#allocation6 + $0x13]] }
  0xf5   : > { %1051 = vrot.lane.b32.xlu1 %v1049_v54, %s3000_s5  ;;  %1043 = vrot.lane.b32.xlu0 %v1041_v55, %s3000_s5  ;;  %v1179_v52 = vmul.f32 %v3548_v47, %v1178_v48  ;;  %v1194_v54 = vstv %s3536_s19  ;;  %v1218_v20 = vstv %s3569_s4  ;;  %s3610_s19 = sld [smem:[#allocation6 + $0x11]]  ;;  %s3644_s4 = sld [smem:[#allocation6 + $0xa]] }
  0xf6   : > { %v1195_v58 = vmul.f32 %v3548_v47, %v1194_v54 }
  0xf7   : > { %v482_v9 = vpop.permute.xlu1 %481  ;;  %v474_v7 = vpop.permute.xlu0 %473 }
  0xf8   : > { %v484_v12 = vadd.f32 %v482_v9, %v452_v1  ;;  %v476_v14 = vadd.f32 %v474_v7, %v444_v8  ;;  %v590_v8 = vmul.f32 %v3257_v5, %v589_v57  ;;  %v3634_v57 = vld [vmem:[%s3168_s9 + $0x40] sm:$0xff] }
  0xf9   : > { %1067 = vrot.lane.b32.xlu1 %v1065_v62, %s3000_s5  ;;  %1059 = vrot.lane.b32.xlu0 %v1057_v63, %s3000_s5  ;;  %v1187_v62 = vmul.f32 %v3548_v47, %v1186_v56  ;;  %v1210_v63 = vstv %s3553_s1  ;;  %s3625_s1 = sld [smem:[#allocation6 + $0x9]]  ;;  %v2862_v56 = vld [vmem:[%s3168_s9 + $0x1] sm:$0xff] }
  0xfa   : > { %v3507_v17 = vadd.f32 %v509_v6, %v484_v12  ;;  %v3513_v19 = vadd.f32 %v505_v10, %v476_v14  ;;  %v597_v12 = vstv %s3559_s22  ;;  %v1211_v7 = vmul.f32 %v3548_v47, %v1210_v63  ;;  %s3637_s22 = sld [smem:[#allocation6 + $0x21]] }
  0xfb   : > { %v498_v24 = vpop.permute.xlu1 %497  ;;  %v490_v28 = vpop.permute.xlu0 %489  ;;  %v593_v14 = vstv %s3564_s29  ;;  %s3639_s29 = sld [smem:[#allocation6 + $0x20]]  ;;  %v1296_v63 = vmul.f32 %v3634_v57, %v1295_v61 }
  0xfc   : > { %v500_v27 = vadd.f32 %v498_v24, %v468_v18  ;;  %v492_v29 = vadd.f32 %v490_v28, %v460_v22 }
  0xfd   : > { %1100 = vrot.lane.b32.xlu1 %v1098_v15, %s2999_s23  ;;  %1092 = vrot.lane.b32.xlu0 %v1090_v16, %s2999_s23  ;;  %v1203_v15 = vmul.f32 %v3548_v47, %v1202_v4  ;;  %v1226_v16 = vstv %s3566_s18  ;;  %s3642_s18 = sld [smem:[#allocation6 + $0xb]] }
  0xfe   : > { %v3523_v32 = vadd.f32 %v517_v21, %v500_v27  ;;  %v3528_v35 = vadd.f32 %v513_v26, %v492_v29  ;;  %v670_v21 = vstv %s3571_s25  ;;  %v666_v26 = vstv %s3573_s6  ;;  %s3654_s25 = sld [smem:[#allocation6 + $0x23]]  ;;  %s3657_s6 = sld [smem:[#allocation6 + $0x22]] }
  0xff   : > { %v532_v51 = vpop.permute.xlu1 %531  ;;  %v524_v37 = vpop.permute.xlu0 %523  ;;  %v594_v29 = vmul.f32 %v3257_v5, %v593_v14  ;;  %v671_v33 = vmul.f32 %v3276_v23, %v670_v21  ;;  %v667_v36 = vmul.f32 %v3276_v23, %v666_v26  ;;  %v756_v21 = vstv %s3644_s4  ;;  %s2628_s4 = sld [smem:[#allocation6 + $0x72]] }
 0x100   : > { %v534_v60 = vadd.f32 %v532_v51, %v3507_v17  ;;  %v526_v1 = vadd.f32 %v524_v37, %v3513_v19  ;;  %v598_v19 = vmul.f32 %v3257_v5, %v597_v12  ;;  %v678_v37 = vstv %s3585_s10  ;;  %s3667_s10 = sld [smem:[#allocation6 + $0x41]] }
 0x101   : > { %1116 = vrot.lane.b32.xlu1 %v1114_v30, %s2999_s23  ;;  %1108 = vrot.lane.b32.xlu0 %v1106_v31, %s2999_s23  ;;  %v1227_v30 = vmul.f32 %v3548_v47, %v1226_v16  ;;  %v679_v48 = vmul.f32 %v3276_v23, %v678_v37  ;;  %v1335_v12 = vstv %s3637_s22  ;;  %s2627_s22 = sld [smem:[#allocation6 + $0x71]] }
 0x103   : > { %v548_v42 = vpop.permute.xlu1 %547  ;;  %v540_v44 = vpop.permute.xlu0 %539 }
 0x104   : > { %v550_v13 = vadd.f32 %v548_v42, %v3523_v32  ;;  %v542_v18 = vadd.f32 %v540_v44, %v3528_v35  ;;  %v1219_v32 = vmul.f32 %v3548_v47, %v1218_v20  ;;  %v674_v42 = vstv %s3588_s11  ;;  %s3671_s11 = sld [smem:[#allocation6 + $0x40]] }
 0x105   : > { %1132 = vrot.lane.b32.xlu1 %v1130_v38, %s3000_s5  ;;  %1124 = vrot.lane.b32.xlu0 %v1122_v39, %s3000_s5 }
 0x107   : > { %v564_v34 = vpop.permute.xlu1 %563  ;;  %v556_v50 = vpop.permute.xlu0 %555 }
 0x108   : > { %v566_v6 = vadd.f32 %v564_v34, %v534_v60  ;;  %v558_v10 = vadd.f32 %v556_v50, %v526_v1  ;;  %v1319_v1 = vstv %s3620_s21  ;;  %s2618_s21 = sld [smem:[#allocation6 + $0x51]] }
 0x109   : > { %1148 = vrot.lane.b32.xlu1 %v1146_v45, %s3000_s5  ;;  %1140 = vrot.lane.b32.xlu0 %v1138_v46, %s3000_s5 }
 0x10a   : > { %v591_v24 = vadd.f32 %v590_v8, %v566_v6  ;;  %v587_v28 = vadd.f32 %v586_v11, %v558_v10  ;;  %v752_v6 = vstv %s3625_s1  ;;  %v1320_v10 = vmul.f32 %v3634_v57, %v1319_v1  ;;  %s2620_s1 = sld [smem:[#allocation6 + $0x53]] }
 0x10b   : > { %v580_v55 = vpop.permute.xlu1 %579  ;;  %v572_v0 = vpop.permute.xlu0 %571 }
 0x10c   : > { %v582_v22 = vadd.f32 %v580_v55, %v550_v13  ;;  %v574_v27 = vadd.f32 %v572_v0, %v542_v18  ;;  %v753_v13 = vmul.f32 %v3295_v41, %v752_v6  ;;  %v760_v18 = vstv %s3642_s18  ;;  %s2629_s18 = sld [smem:[#allocation6 + $0x73]] }
 0x10d   : > { %1181 = vrot.lane.b32.xlu1 %v1179_v52, %s2999_s23  ;;  %1173 = vrot.lane.b32.xlu0 %v1171_v53, %s2999_s23  ;;  %v675_v52 = vmul.f32 %v3276_v23, %v674_v42  ;;  %v1303_v23 = vstv %s3610_s19  ;;  %s3682_s19 = sld [smem:[#allocation6 + $0x43]]  ;;  %v1465_v6 = vstv %s2627_s22  ;;  %s3779_s22 = sld [smem:[#allocation6 + $0x27]] }
 0x10e   : > { %v599_v38 = vadd.f32 %v598_v19, %v582_v22  ;;  %v595_v43 = vadd.f32 %v594_v29, %v574_v27  ;;  %v1351_v27 = vstv %s3654_s25  ;;  %s2631_s25 = sld [smem:[#allocation6 + $0x81]] }
 0x10f   : > { %v613_v3 = vpop.permute.xlu1 %612  ;;  %v605_v9 = vpop.permute.xlu0 %604  ;;  %v1352_v37 = vmul.f32 %v3634_v57, %v1351_v27 }
 0x110   : > { %v615_v31 = vadd.f32 %v613_v3, %v591_v24  ;;  %v607_v51 = vadd.f32 %v605_v9, %v587_v28  ;;  %v1311_v3 = vstv %s3622_s24  ;;  %v748_v9 = vstv %s3627_s8  ;;  %s2617_s24 = sld [smem:[#allocation6 + $0x50]]  ;;  %s2619_s8 = sld [smem:[#allocation6 + $0x52]] }
 0x111   : > { %1197 = vrot.lane.b32.xlu1 %v1195_v58, %s2999_s23  ;;  %1189 = vrot.lane.b32.xlu0 %v1187_v62, %s2999_s23  ;;  %v1304_v62 = vmul.f32 %v3634_v57, %v1303_v23  ;;  %v749_v16 = vmul.f32 %v3295_v41, %v748_v9  ;;  %v1336_v24 = vmul.f32 %v3634_v57, %v1335_v12  ;;  %v1432_v61 = vstv %s2620_s1  ;;  %s2644_s1 = sld [smem:[#allocation6 + $0x25]] }
 0x112   : > { %v761_v28 = vmul.f32 %v3295_v41, %v760_v18  ;;  %v1481_v12 = vstv %s2629_s18  ;;  %s3788_s18 = sld [smem:[#allocation6 + $0x39]] }
 0x113   : > { %v629_v17 = vpop.permute.xlu1 %628  ;;  %v621_v25 = vpop.permute.xlu0 %620 }
 0x114   : > { %v631_v45 = vadd.f32 %v629_v17, %v599_v38  ;;  %v623_v34 = vadd.f32 %v621_v25, %v595_v43  ;;  %v1497_v18 = vstv %s2631_s25  ;;  %s3795_s25 = sld [smem:[#allocation6 + $0x44]] }
 0x115   : > { %1213 = vrot.lane.b32.xlu1 %v1211_v7, %s3000_s5  ;;  %1205 = vrot.lane.b32.xlu0 %v1203_v15, %s3000_s5  ;;  %v1327_v7 = vstv %s3639_s29  ;;  %s2626_s29 = sld [smem:[#allocation6 + $0x70]] }
 0x116   : > { %v1328_v19 = vmul.f32 %v3634_v57, %v1327_v7 }
 0x117   : > { %v645_v35 = vpop.permute.xlu1 %644  ;;  %v637_v40 = vpop.permute.xlu0 %636 }
 0x118   : > { %v647_v39 = vadd.f32 %v645_v35, %v615_v31  ;;  %v639_v44 = vadd.f32 %v637_v40, %v607_v51  ;;  %v3697_v40 = vld [vmem:[%s3168_s9 + $0x41] sm:$0xff] }
 0x119   : > { %1229 = vrot.lane.b32.xlu1 %v1227_v30, %s3000_s5  ;;  %1221 = vrot.lane.b32.xlu0 %v1219_v32, %s3000_s5  ;;  %v1343_v32 = vstv %s3657_s6  ;;  %v1433_v1 = vmul.f32 %v3697_v40, %v1432_v61  ;;  %s2630_s6 = sld [smem:[#allocation6 + $0x80]]  ;;  %v1595_v61 = vstv %s3779_s22  ;;  %s3843_s22 = sld [smem:[#allocation6 + $0x6b]] }
 0x11a   : > { %v672_v46 = vadd.f32 %v671_v33, %v647_v39  ;;  %v668_v50 = vadd.f32 %v667_v36, %v639_v44  ;;  %v757_v33 = vmul.f32 %v3295_v41, %v756_v21  ;;  %v1344_v38 = vmul.f32 %v3634_v57, %v1343_v32  ;;  %v2634_v32 = vld [vmem:[%s3168_s9 + $0x50] sm:$0xff] }
 0x11b   : > { %v661_v49 = vpop.permute.xlu1 %660  ;;  %v653_v54 = vpop.permute.xlu0 %652  ;;  %v1384_v41 = vstv %s3667_s10  ;;  %v1376_v44 = vstv %s3671_s11  ;;  %v1457_v9 = vstv %s2626_s29  ;;  %s2633_s10 = sld [smem:[#allocation6 + $0x83]]  ;;  %s2632_s11 = sld [smem:[#allocation6 + $0x82]] }
 0x11c   : > { %v663_v53 = vadd.f32 %v661_v49, %v631_v45  ;;  %v655_v55 = vadd.f32 %v653_v54, %v623_v34  ;;  %v1400_v34 = vstv %s3682_s19  ;;  %s2640_s19 = sld [smem:[#allocation6 + $0x15]]  ;;  %s3783_s29 = sld [smem:[#allocation6 + $0x26]] }
 0x11d   : > { %1248 = vrot.lane.b32.xlu1 %v3257_v5, %s2999_s23  ;;  %1237 = vrot.lane.b32.xlu0 %v2862_v56, %s2999_s23 }
 0x11e   : > { %v680_v0 = vadd.f32 %v679_v48, %v663_v53  ;;  %v676_v60 = vadd.f32 %v675_v52, %v655_v55  ;;  %v1377_v48 = vmul.f32 %v3697_v40, %v1376_v44  ;;  %v1401_v53 = vmul.f32 %v3697_v40, %v1400_v34 }
 0x11f   : > { %v694_v58 = vpop.permute.xlu1 %693  ;;  %v686_v5 = vpop.permute.xlu0 %685  ;;  %v1416_v55 = vstv %s2618_s21  ;;  %s2642_s21 = sld [smem:[#allocation6 + $0x17]] }
 0x120   : > { %v696_v11 = vadd.f32 %v694_v58, %v672_v46  ;;  %v688_v14 = vadd.f32 %v686_v5, %v668_v50  ;;  %v1385_v46 = vmul.f32 %v3697_v40, %v1384_v41  ;;  %v1392_v50 = vstv %s3688_s30  ;;  %s2639_s30 = sld [smem:[#allocation6 + $0x14]] }
 0x121   : > { %1270 = vrot.lane.b32.xlu1 %v3491_v2, %s2999_s23  ;;  %1259 = vrot.lane.b32.xlu0 %v3314_v59, %s2999_s23  ;;  %v1312_v59 = vmul.f32 %v3634_v57, %v1311_v3  ;;  %v1393_v54 = vmul.f32 %v3697_v40, %v1392_v50  ;;  %v1417_v58 = vmul.f32 %v3697_v40, %v1416_v55  ;;  %v1505_v27 = vstv %s2632_s11  ;;  %s3806_s11 = sld [smem:[#allocation6 + $0x47]] }
 0x123   : > { %v710_v4 = vpop.permute.xlu1 %709  ;;  %v702_v8 = vpop.permute.xlu0 %701 }
 0x124   : > { %v712_v25 = vadd.f32 %v710_v4, %v680_v0  ;;  %v704_v29 = vadd.f32 %v702_v8, %v676_v60  ;;  %v1408_v0 = vstv %s2617_s24  ;;  %v3738_v4 = vld [vmem:[%s3168_s9 + $0x42] sm:$0xff]  ;;  %s2641_s24 = sld [smem:[#allocation6 + $0x16]] }
 0x125   : > { %1306 = vrot.lane.b32.xlu1 %v1304_v62, %s2999_s23  ;;  %1298 = vrot.lane.b32.xlu0 %v1296_v63, %s2999_s23  ;;  %v1409_v60 = vmul.f32 %v3697_v40, %v1408_v0  ;;  %v1424_v62 = vstv %s2619_s8  ;;  %s2643_s8 = sld [smem:[#allocation6 + $0x24]]  ;;  %v1563_v41 = vstv %s2642_s21  ;;  %s3817_s21 = sld [smem:[#allocation6 + $0x69]] }
 0x126   : > { %v1425_v3 = vmul.f32 %v3697_v40, %v1424_v62  ;;  %v1564_v34 = vmul.f32 %v2634_v32, %v1563_v41 }
 0x127   : > { %v726_v15 = vpop.permute.xlu1 %725  ;;  %v718_v20 = vpop.permute.xlu0 %717 }
 0x128   : > { %v728_v17 = vadd.f32 %v726_v15, %v696_v11  ;;  %v720_v22 = vadd.f32 %v718_v20, %v688_v14  ;;  %v1458_v11 = vmul.f32 %v3738_v4, %v1457_v9  ;;  %v1482_v15 = vmul.f32 %v3738_v4, %v1481_v12 }
 0x129   : > { %1322 = vrot.lane.b32.xlu1 %v1320_v10, %s2999_s23  ;;  %1314 = vrot.lane.b32.xlu0 %v1312_v59, %s2999_s23  ;;  %v1466_v59 = vmul.f32 %v3738_v4, %v1465_v6  ;;  %v1489_v20 = vstv %s2630_s6  ;;  %s3797_s6 = sld [smem:[#allocation6 + $0x38]]  ;;  %v1596_v6 = vmul.f32 %v2634_v32, %v1595_v61  ;;  %v833_v9 = vstv %s3788_s18  ;;  %s3858_s18 = sld [smem:[#allocation6 + $0x56]] }
 0x12a   : > { %v3678_v26 = vadd.f32 %v753_v13, %v728_v17  ;;  %v3684_v31 = vadd.f32 %v749_v16, %v720_v22  ;;  %v1473_v13 = vstv %s2628_s4  ;;  %v1498_v22 = vmul.f32 %v3738_v4, %v1497_v18  ;;  %s3791_s4 = sld [smem:[#allocation6 + $0x45]] }
 0x12b   : > { %v742_v30 = vpop.permute.xlu1 %741  ;;  %v734_v35 = vpop.permute.xlu0 %733  ;;  %v1474_v16 = vmul.f32 %v3738_v4, %v1473_v13  ;;  %v1571_v55 = vstv %s2643_s8  ;;  %s3836_s8 = sld [smem:[#allocation6 + $0x68]]  ;;  %v914_v41 = vstv %s3817_s21  ;;  %s3909_s21 = sld [smem:[#allocation6 + $0x76]] }
 0x12c   : > { %v744_v51 = vadd.f32 %v742_v30, %v712_v25  ;;  %v736_v36 = vadd.f32 %v734_v35, %v704_v29  ;;  %v1506_v30 = vmul.f32 %v3738_v4, %v1505_v27  ;;  %v1539_v35 = vstv %s2639_s30  ;;  %s3813_s30 = sld [smem:[#allocation6 + $0x3a]] }
 0x12d   : > { %1338 = vrot.lane.b32.xlu1 %v1336_v24, %s3000_s5  ;;  %1330 = vrot.lane.b32.xlu0 %v1328_v19, %s3000_s5  ;;  %v1490_v24 = vmul.f32 %v3738_v4, %v1489_v20  ;;  %v1513_v19 = vstv %s2633_s10  ;;  %s3802_s10 = sld [smem:[#allocation6 + $0x3b]] }
 0x12e   : > { %v3694_v39 = vadd.f32 %v761_v28, %v744_v51  ;;  %v3702_v43 = vadd.f32 %v757_v33, %v736_v36  ;;  %v1514_v29 = vmul.f32 %v3738_v4, %v1513_v19  ;;  %v1547_v33 = vstv %s2640_s19  ;;  %s3811_s19 = sld [smem:[#allocation6 + $0x46]] }
 0x12f   : > { %v3700_v42 = vpop.permute.xlu1 %775  ;;  %v3705_v45 = vpop.permute.xlu0 %767  ;;  %v829_v18 = vstv %s3797_s6  ;;  %s3878_s6 = sld [smem:[#allocation6 + $0x75]] }
 0x130   : > { %v1628_v12 = vstv %s3791_s4  ;;  %s3863_s4 = sld [smem:[#allocation6 + $0x6a]] }
 0x131   : > { %1354 = vrot.lane.b32.xlu1 %v1352_v37, %s3000_s5  ;;  %1346 = vrot.lane.b32.xlu0 %v1344_v38, %s3000_s5  ;;  %v1548_v37 = vmul.f32 %v2634_v32, %v1547_v33  ;;  %v1540_v38 = vmul.f32 %v2634_v32, %v1539_v35 }
 0x132   : > { %v837_v35 = vstv %s3813_s30  ;;  %s3903_s30 = sld [smem:[#allocation6 + $0x77]] }
 0x133   : > { %v3712_v49 = vpop.permute.xlu1 %791  ;;  %v3715_v52 = vpop.permute.xlu0 %783 }
 0x134   : > { %v1636_v33 = vstv %s3811_s19  ;;  %s3895_s19 = sld [smem:[#allocation6 + $0xf]] }
 0x135   : > { %1387 = vrot.lane.b32.xlu1 %v1385_v46, %s2999_s23  ;;  %1379 = vrot.lane.b32.xlu0 %v1377_v48, %s2999_s23  ;;  %v1555_v46 = vstv %s2641_s24  ;;  %s3826_s24 = sld [smem:[#allocation6 + $0x55]] }
 0x136   : > { %v1556_v50 = vmul.f32 %v2634_v32, %v1555_v46 }
 0x137   : > { %v3721_v56 = vpop.permute.xlu1 %807  ;;  %v3723_v23 = vpop.permute.xlu0 %799 }
 0x139   : > { %1403 = vrot.lane.b32.xlu1 %v1401_v53, %s2999_s23  ;;  %1395 = vrot.lane.b32.xlu0 %v1393_v54, %s2999_s23  ;;  %v1579_v53 = vstv %s2644_s1  ;;  %s3831_s1 = sld [smem:[#allocation6 + $0x54]] }
 0x13b   : > { %v3729_v5 = vpop.permute.xlu1 %823  ;;  %v3731_v63 = vpop.permute.xlu0 %815 }
 0x13d   : > { %1419 = vrot.lane.b32.xlu1 %v1417_v58, %s3000_s5  ;;  %1411 = vrot.lane.b32.xlu0 %v1409_v60, %s3000_s5  ;;  %v1580_v58 = vmul.f32 %v2634_v32, %v1579_v53  ;;  %v1572_v60 = vmul.f32 %v2634_v32, %v1571_v55 }
 0x13f   : > { %v3740_v8 = vpop.permute.xlu1 %856  ;;  %v3742_v10 = vpop.permute.xlu0 %848 }
 0x141   : > { %1435 = vrot.lane.b32.xlu1 %v1433_v1, %s3000_s5  ;;  %1427 = vrot.lane.b32.xlu0 %v1425_v3, %s3000_s5  ;;  %v1587_v1 = vstv %s3783_s29  ;;  %s3852_s29 = sld [smem:[#allocation6 + $0x57]] }
 0x143   : > { %v3748_v7 = vpop.permute.xlu1 %872  ;;  %v3750_v14 = vpop.permute.xlu0 %864 }
 0x145   : > { %1468 = vrot.lane.b32.xlu1 %v1466_v59, %s2999_s23  ;;  %1460 = vrot.lane.b32.xlu0 %v1458_v11, %s2999_s23  ;;  %v1588_v59 = vmul.f32 %v2634_v32, %v1587_v1  ;;  %v3823_v11 = vld [vmem:[%s3168_s9 + $0x51] sm:$0xff] }
 0x146   : > { %v1629_v27 = vmul.f32 %v3823_v11, %v1628_v12 }
 0x147   : > { %v3756_v17 = vpop.permute.xlu1 %888  ;;  %v3758_v21 = vpop.permute.xlu0 %880 }
 0x149   : > { %1484 = vrot.lane.b32.xlu1 %v1482_v15, %s2999_s23  ;;  %1476 = vrot.lane.b32.xlu0 %v1474_v16, %s2999_s23  ;;  %v1620_v15 = vstv %s3795_s25  ;;  %v778_v16 = vadd.f32 %v3700_v42, %v3678_v26  ;;  %v841_v42 = vstv %s3802_s10  ;;  %s3870_s25 = sld [smem:[#allocation6 + $0xd]]  ;;  %s3884_s10 = sld [smem:[#allocation6 + $0x74]] }
 0x14b   : > { %v3764_v25 = vpop.permute.xlu1 %904  ;;  %v3766_v28 = vpop.permute.xlu0 %896  ;;  %v810_v26 = vadd.f32 %v3721_v56, %v778_v16  ;;  %v794_v56 = vadd.f32 %v3712_v49, %v3694_v39 }
 0x14d   : > { %1500 = vrot.lane.b32.xlu1 %v1498_v22, %s3000_s5  ;;  %1492 = vrot.lane.b32.xlu0 %v1490_v24, %s3000_s5  ;;  %v770_v22 = vadd.f32 %v3705_v45, %v3684_v31  ;;  %v2863_v24 = vld [vmem:[%s3168_s9 + $0x21] sm:$0xff]  ;;  %v826_v39 = vadd.f32 %v3729_v5, %v794_v56 }
 0x14e   : > { %v834_v19 = vmul.f32 %v2863_v24, %v833_v9  ;;  %v830_v45 = vmul.f32 %v2863_v24, %v829_v18  ;;  %v838_v53 = vmul.f32 %v2863_v24, %v837_v35  ;;  %v922_v9 = vstv %s3843_s22  ;;  %s3936_s22 = sld [smem:[#allocation6 + $0x84]] }
 0x14f   : > { %v3773_v51 = vpop.permute.xlu1 %937  ;;  %v3775_v36 = vpop.permute.xlu0 %929  ;;  %v802_v31 = vadd.f32 %v3723_v23, %v770_v22  ;;  %v842_v23 = vmul.f32 %v2863_v24, %v841_v42 }
 0x150   : > { %v835_v49 = vadd.f32 %v834_v19, %v810_v26  ;;  %v1668_v19 = vstv %s3858_s18  ;;  %s3948_s18 = sld [smem:[#allocation6 + $0x3f]] }
 0x151   : > { %1516 = vrot.lane.b32.xlu1 %v1514_v29, %s3000_s5  ;;  %1508 = vrot.lane.b32.xlu0 %v1506_v30, %s3000_s5  ;;  %v1621_v29 = vmul.f32 %v3823_v11, %v1620_v15  ;;  %v1644_v30 = vstv %s3806_s11  ;;  %s3888_s11 = sld [smem:[#allocation6 + $0xc]]  ;;  %v843_v12 = vadd.f32 %v842_v23, %v826_v39 }
 0x152   : > { %v1645_v46 = vmul.f32 %v3823_v11, %v1644_v30  ;;  %v859_v5 = vadd.f32 %v3740_v8, %v835_v49  ;;  %v2865_v49 = vld [vmem:[%s3168_s9 + $0x30] sm:$0xff] }
 0x153   : > { %v3781_v44 = vpop.permute.xlu1 %953  ;;  %v3785_v48 = vpop.permute.xlu0 %945 }
 0x154   : > { %v891_v8 = vadd.f32 %v3756_v17, %v859_v5  ;;  %v875_v17 = vadd.f32 %v3748_v7, %v843_v12 }
 0x155   : > { %1550 = vrot.lane.b32.xlu1 %v1548_v37, %s2999_s23  ;;  %1542 = vrot.lane.b32.xlu0 %v1540_v38, %s2999_s23  ;;  %v786_v38 = vadd.f32 %v3715_v52, %v3702_v43  ;;  %v1660_v43 = vstv %s3826_s24  ;;  %s3913_s24 = sld [smem:[#allocation6 + $0xe]] }
 0x157   : > { %v3793_v54 = vpop.permute.xlu1 %969  ;;  %v3799_v0 = vpop.permute.xlu0 %961  ;;  %v818_v52 = vadd.f32 %v3731_v63, %v786_v38 }
 0x159   : > { %1566 = vrot.lane.b32.xlu1 %v1564_v34, %s2999_s23  ;;  %1558 = vrot.lane.b32.xlu0 %v1556_v50, %s2999_s23  ;;  %v1637_v34 = vmul.f32 %v3823_v11, %v1636_v33  ;;  %v831_v50 = vadd.f32 %v830_v45, %v802_v31  ;;  %v839_v16 = vadd.f32 %v838_v53, %v818_v52  ;;  %v3927_v33 = vld [vmem:[%s3168_s9 + $0x52] sm:$0xff] }
 0x15a   : > { %v907_v31 = vadd.f32 %v3764_v25, %v875_v17  ;;  %v1669_v45 = vmul.f32 %v3823_v11, %v1668_v19  ;;  %v1733_v19 = vstv %s3936_s22  ;;  %s4023_s22 = sld [smem:[#allocation6 + $0x29]] }
 0x15b   : > { %v3808_v62 = vpop.permute.xlu1 %985  ;;  %v3815_v3 = vpop.permute.xlu0 %977  ;;  %v851_v1 = vadd.f32 %v3742_v10, %v831_v50  ;;  %v1676_v10 = vstv %s3852_s29  ;;  %v867_v42 = vadd.f32 %v3750_v14, %v839_v16  ;;  %v1709_v14 = vstv %s3878_s6  ;;  %s3940_s29 = sld [smem:[#allocation6 + $0x3c]]  ;;  %s3965_s6 = sld [smem:[#allocation6 + $0x3e]] }
 0x15c   : > { %v1677_v30 = vmul.f32 %v3823_v11, %v1676_v10 }
 0x15d   : > { %1582 = vrot.lane.b32.xlu1 %v1580_v58, %s3000_s5  ;;  %1574 = vrot.lane.b32.xlu0 %v1572_v60, %s3000_s5  ;;  %v1652_v58 = vstv %s3831_s1  ;;  %v910_v60 = vstv %s3836_s8  ;;  %v883_v18 = vadd.f32 %v3758_v21, %v851_v1  ;;  %s3920_s1 = sld [smem:[#allocation6 + $0x3d]]  ;;  %v899_v56 = vadd.f32 %v3766_v28, %v867_v42 }
 0x15e   : > { %v1653_v15 = vmul.f32 %v3823_v11, %v1652_v58  ;;  %v996_v21 = vstv %s3870_s25  ;;  %s3930_s8 = sld [smem:[#allocation6 + $0x85]]  ;;  %v1717_v1 = vstv %s3909_s21  ;;  %s3961_s25 = sld [smem:[#allocation6 + $0x86]] }
 0x15f   : > { %v3828_v13 = vpop.permute.xlu1 %1019  ;;  %v3838_v20 = vpop.permute.xlu0 %1011  ;;  %v997_v28 = vmul.f32 %v2865_v49, %v996_v21  ;;  %v1085_v21 = vstv %s3948_s18  ;;  %s3994_s21 = sld [smem:[#allocation6 + $0x6f]]  ;;  %s4039_s18 = sld [smem:[#allocation6 + $0x2b]] }
 0x161   : > { %1598 = vrot.lane.b32.xlu1 %v1596_v6, %s3000_s5  ;;  %1590 = vrot.lane.b32.xlu0 %v1588_v59, %s3000_s5  ;;  %v2864_v6 = vld [vmem:[%s3168_s9 + $0x22] sm:$0xff]  ;;  %v1661_v59 = vmul.f32 %v3823_v11, %v1660_v43  ;;  %v1710_v43 = vmul.f32 %v3927_v33, %v1709_v14  ;;  %v1073_v17 = vstv %s3940_s29  ;;  %s4027_s29 = sld [smem:[#allocation6 + $0x28]] }
 0x162   : > { %v915_v63 = vmul.f32 %v2864_v6, %v914_v41  ;;  %v911_v22 = vmul.f32 %v2864_v6, %v910_v60  ;;  %v1701_v41 = vstv %s3884_s10  ;;  %s3973_s10 = sld [smem:[#allocation6 + $0x6d]]  ;;  %v1074_v14 = vmul.f32 %v3491_v2, %v1073_v17 }
 0x163   : > { %v3855_v32 = vpop.permute.xlu1 %1035  ;;  %v3865_v37 = vpop.permute.xlu0 %1027  ;;  %v1702_v50 = vmul.f32 %v3927_v33, %v1701_v41  ;;  %v1077_v12 = vstv %s3920_s1  ;;  %s4005_s1 = sld [smem:[#allocation6 + $0x1a]] }
 0x164   : > { %v916_v7 = vadd.f32 %v915_v63, %v891_v8  ;;  %v912_v35 = vadd.f32 %v911_v22, %v883_v18  ;;  %v1741_v10 = vstv %s3930_s8  ;;  %s4009_s8 = sld [smem:[#allocation6 + $0x6e]] }
 0x165   : > { %1631 = vrot.lane.b32.xlu1 %v1629_v27, %s2999_s23  ;;  %1623 = vrot.lane.b32.xlu0 %v1621_v29, %s2999_s23  ;;  %v918_v27 = vstv %s3863_s4  ;;  %v923_v29 = vmul.f32 %v2864_v6, %v922_v9  ;;  %s3955_s4 = sld [smem:[#allocation6 + $0x87]] }
 0x166   : > { %v919_v38 = vmul.f32 %v2864_v6, %v918_v27  ;;  %v940_v25 = vadd.f32 %v3773_v51, %v916_v7  ;;  %v932_v39 = vadd.f32 %v3775_v36, %v912_v35  ;;  %v1725_v36 = vstv %s3903_s30  ;;  %s3987_s30 = sld [smem:[#allocation6 + $0x6c]] }
 0x167   : > { %v3881_v55 = vpop.permute.xlu1 %1051  ;;  %v3890_v61 = vpop.permute.xlu0 %1043  ;;  %v924_v52 = vadd.f32 %v923_v29, %v907_v31  ;;  %v1000_v6 = vstv %s3913_s24  ;;  %v1078_v29 = vmul.f32 %v3491_v2, %v1077_v12  ;;  %v1734_v31 = vmul.f32 %v3927_v33, %v1733_v19  ;;  %s4000_s24 = sld [smem:[#allocation6 + $0x1b]] }
 0x168   : > { %v972_v51 = vadd.f32 %v3793_v54, %v940_v25  ;;  %v920_v53 = vadd.f32 %v919_v38, %v899_v56  ;;  %v964_v58 = vadd.f32 %v3799_v0, %v932_v39  ;;  %v1726_v0 = vmul.f32 %v3927_v33, %v1725_v36 }
 0x169   : > { %1647 = vrot.lane.b32.xlu1 %v1645_v46, %s2999_s23  ;;  %1639 = vrot.lane.b32.xlu0 %v1637_v34, %s2999_s23  ;;  %v992_v46 = vstv %s3888_s11  ;;  %v1004_v34 = vstv %s3895_s19  ;;  %v956_v54 = vadd.f32 %v3781_v44, %v924_v52  ;;  %s3979_s11 = sld [smem:[#allocation6 + $0x19]]  ;;  %v1001_v18 = vmul.f32 %v2865_v49, %v1000_v6  ;;  %s3983_s19 = sld [smem:[#allocation6 + $0x18]] }
 0x16a   : > { %v993_v5 = vmul.f32 %v2865_v49, %v992_v46  ;;  %v948_v9 = vadd.f32 %v3785_v48, %v920_v53  ;;  %v998_v44 = vadd.f32 %v997_v28, %v972_v51  ;;  %v1749_v35 = vstv %s3961_s25  ;;  %v2866_v46 = vld [vmem:[%s3168_s9 + $0x31] sm:$0xff]  ;;  %s4045_s25 = sld [smem:[#allocation6 + $0x2a]] }
 0x16b   : > { %v3906_v24 = vpop.permute.xlu1 %1067  ;;  %v3915_v26 = vpop.permute.xlu0 %1059  ;;  %v988_v8 = vadd.f32 %v3808_v62, %v956_v54  ;;  %v1081_v38 = vstv %s3965_s6  ;;  %v1086_v39 = vmul.f32 %v2866_v46, %v1085_v21  ;;  %v1158_v2 = vstv %s3973_s10  ;;  %s4049_s6 = sld [smem:[#allocation7]]  ;;  %s4058_s10 = sld [smem:[#allocation6 + $0x49]] }
 0x16c   : > { %v980_v48 = vadd.f32 %v3815_v3, %v948_v9  ;;  %v994_v16 = vadd.f32 %v993_v5, %v964_v58  ;;  %v1022_v62 = vadd.f32 %v3828_v13, %v998_v44  ;;  %v1742_v3 = vmul.f32 %v3927_v33, %v1741_v10 }
 0x16d   : > { %1663 = vrot.lane.b32.xlu1 %v1661_v59, %s3000_s5  ;;  %1655 = vrot.lane.b32.xlu0 %v1653_v15, %s3000_s5  ;;  %v1005_v59 = vmul.f32 %v2865_v49, %v1004_v34  ;;  %v1718_v15 = vmul.f32 %v3927_v33, %v1717_v1  ;;  %v4020_v34 = vld [vmem:[%s3168_s9 + $0x60] sm:$0xff]  ;;  %v1082_v51 = vmul.f32 %v2866_v46, %v1081_v38  ;;  %v1154_v53 = vstv %s3987_s30  ;;  %s4066_s30 = sld [smem:[#allocation7 + $0x2]] }
 0x16e   : > { %v1014_v42 = vadd.f32 %v3838_v20, %v994_v16  ;;  %v1054_v13 = vadd.f32 %v3881_v55, %v1022_v62  ;;  %v1757_v20 = vstv %s3955_s4  ;;  %v1002_v7 = vadd.f32 %v1001_v18, %v980_v48  ;;  %s4043_s4 = sld [smem:[#allocation7 + $0x1]] }
 0x16f   : > { %v3933_v23 = vpop.permute.xlu1 %1100  ;;  %v3942_v11 = vpop.permute.xlu0 %1092  ;;  %v1783_v36 = vstv %s3983_s19  ;;  %v1159_v1 = vmul.f32 %v3548_v47, %v1158_v2  ;;  %v1166_v54 = vstv %s3994_s21  ;;  %v1799_v44 = vstv %s4005_s1  ;;  %s4064_s19 = sld [smem:[#allocation6 + $0x48]]  ;;  %s4073_s21 = sld [smem:[#allocation6 + $0x4b]] }
 0x170   : > { %v1030_v25 = vadd.f32 %v3865_v37, %v1002_v7  ;;  %v1079_v28 = vadd.f32 %v1078_v29, %v1054_v13  ;;  %v1791_v37 = vstv %s3979_s11  ;;  %v1162_v10 = vstv %s4009_s8  ;;  %s4062_s11 = sld [smem:[#allocation7 + $0x3]]  ;;  %s2434_s1 = sshll.u32 %s3164_s7, 6 }
 0x171   : > { %1679 = vrot.lane.b32.xlu1 %v1677_v30, %s3000_s5  ;;  %1671 = vrot.lane.b32.xlu0 %v1669_v45, %s3000_s5  ;;  %v1006_v30 = vadd.f32 %v1005_v59, %v988_v8  ;;  %v1046_v45 = vadd.f32 %v3890_v61, %v1014_v42  ;;  %v1758_v61 = vmul.f32 %v3927_v33, %v1757_v20  ;;  %v1815_v21 = vstv %s4027_s29  ;;  %s4089_s8 = sld [smem:[#allocation6 + $0x59]] }
 0x172   : > { %v1784_v59 = vmul.f32 %v4020_v34, %v1783_v36  ;;  %v1167_v18 = vmul.f32 %v3548_v47, %v1166_v54  ;;  %v1800_v17 = vmul.f32 %v4020_v34, %v1799_v44  ;;  %v1816_v7 = vmul.f32 %v4020_v34, %v1815_v21  ;;  %s4098_s29 = sld [smem:[#allocation6 + $0x1]] }
 0x173   : > { %v3958_v60 = vpop.permute.xlu1 %1116  ;;  %v3967_v63 = vpop.permute.xlu0 %1108  ;;  %v1038_v55 = vadd.f32 %v3855_v32, %v1006_v30  ;;  %v1750_v32 = vmul.f32 %v3927_v33, %v1749_v35  ;;  %v1075_v52 = vadd.f32 %v1074_v14, %v1046_v45  ;;  %v1839_v45 = vstv %s4039_s18  ;;  %s4100_s18 = scalar_lea.vmem [#allocation9], %s2434_s1  ;;  %s4145_s1 = sld [smem:[#allocation6 + $0x7b]] }
 0x174   : > { %v1831_v38 = vstv %s4045_s25  ;;  %v1234_v46 = vstv %s4049_s6  ;;  %v1840_v2 = vmul.f32 %v4020_v34, %v1839_v45  ;;  %s4109_s25 = sld [smem:[#allocation6 + $0x5b]] }
 0x175   : > { %1712 = vrot.lane.b32.xlu1 %v1710_v43, %s2999_s23  ;;  %1704 = vrot.lane.b32.xlu0 %v1702_v50, %s2999_s23  ;;  %v1070_v49 = vadd.f32 %v3906_v24, %v1038_v55  ;;  %v1062_v43 = vadd.f32 %v3915_v26, %v1030_v25  ;;  %v1103_v24 = vadd.f32 %v3933_v23, %v1079_v28  ;;  %v1807_v23 = vstv %s4000_s24  ;;  %s4077_s24 = sld [smem:[#allocation6 + $0x4a]]  ;;  %s4114_s6 = sld [smem:[#allocation6 + $0x3]] }
 0x176   : > { %v1095_v5 = vadd.f32 %v3942_v11, %v1075_v52  ;;  %v1792_v26 = vmul.f32 %v4020_v34, %v1791_v37  ;;  %v1155_v11 = vmul.f32 %v3548_v47, %v1154_v53  ;;  %v1244_v55 = vstv %s4043_s4  ;;  %s4106_s4 = sld [smem:[#allocation6]] }
 0x177   : > { %v1133_v22 = vpop.permute.xlu1 %1132  ;;  %v1125_v27 = vpop.permute.xlu0 %1124  ;;  %v1087_v6 = vadd.f32 %v1086_v39, %v1070_v49  ;;  %v1083_v12 = vadd.f32 %v1082_v51, %v1062_v43  ;;  %v1832_v28 = vmul.f32 %v4020_v34, %v1831_v38  ;;  %v1872_v37 = vstv %s4058_s10  ;;  %s4116_s10 = sld [smem:[#allocation6 + $0x5a]] }
 0x178   : > { %v1135_v9 = vadd.f32 %v1133_v22, %v1103_v24  ;;  %v1808_v22 = vmul.f32 %v4020_v34, %v1807_v23  ;;  %v1864_v36 = vstv %s4064_s19  ;;  %s4122_s19 = sld [smem:[#allocation6 + $0x31]] }
 0x179   : > { %1728 = vrot.lane.b32.xlu1 %v1726_v0, %s2999_s23  ;;  %1720 = vrot.lane.b32.xlu0 %v1718_v15, %s2999_s23  ;;  %v1127_v0 = vadd.f32 %v1125_v27, %v1095_v5  ;;  %v1119_v15 = vadd.f32 %v3958_v60, %v1087_v6  ;;  %v1111_v16 = vadd.f32 %v3967_v63, %v1083_v12  ;;  %v1823_v60 = vstv %s4023_s22  ;;  %s4093_s22 = sld [smem:[#allocation6 + $0x58]] }
 0x17a   : > { %v1160_v62 = vadd.f32 %v1159_v1, %v1135_v9  ;;  %v1163_v63 = vmul.f32 %v3548_v47, %v1162_v10  ;;  %v1888_v6 = vstv %s4073_s21  ;;  %s4131_s21 = sld [smem:[#allocation6 + $0x30]] }
 0x17b   : > { %v1149_v56 = vpop.permute.xlu1 %1148  ;;  %v1141_v41 = vpop.permute.xlu0 %1140  ;;  %v1156_v42 = vadd.f32 %v1155_v11, %v1127_v0  ;;  %v1880_v23 = vstv %s4077_s24  ;;  %s4136_s24 = sld [smem:[#allocation6 + $0x78]] }
 0x17c   : > { %v1151_v19 = vadd.f32 %v1149_v56, %v1119_v15  ;;  %v1143_v27 = vadd.f32 %v1141_v41, %v1111_v16  ;;  %v1904_v15 = vstv %s4089_s8  ;;  %s4149_s8 = sld [smem:[#allocation6 + $0x7a]] }
 0x17d   : > { %1744 = vrot.lane.b32.xlu1 %v1742_v3, %s3000_s5  ;;  %1736 = vrot.lane.b32.xlu0 %v1734_v31, %s3000_s5  ;;  %v1824_v31 = vmul.f32 %v4020_v34, %v1823_v60  ;;  %v1291_v60 = vstv %s4114_s6  ;;  %s4181_s6 = sld [smem:[#allocation6 + $0x8b]] }
 0x17e   : > { %v1168_v47 = vadd.f32 %v1167_v18, %v1151_v19  ;;  %v1164_v14 = vadd.f32 %v1163_v63, %v1143_v27  ;;  %v1283_v18 = vstv %s4098_s29  ;;  %v1279_v19 = vstv %s4106_s4  ;;  %s4155_s29 = sld [smem:[#allocation6 + $0x32]]  ;;  %s4169_s4 = sld [smem:[#allocation6 + $0x89]] }
 0x17f   : > { %v1182_v50 = vpop.permute.xlu1 %1181  ;;  %v1174_v58 = vpop.permute.xlu0 %1173  ;;  %v1284_v63 = vmul.f32 %v3634_v57, %v1283_v18 }
 0x180   : > { %v1184_v3 = vadd.f32 %v1182_v50, %v1160_v62  ;;  %v1176_v13 = vadd.f32 %v1174_v58, %v1156_v42  ;;  %v1266_v50 = vstv %s4062_s11  ;;  %v1255_v58 = vstv %s4066_s30  ;;  %s4118_s11 = sld [smem:[#allocation6 + $0x2]]  ;;  %s4129_s30 = sld [smem:[#allocation6 + $0x79]] }
 0x181   : > { %1760 = vrot.lane.b32.xlu1 %v1758_v61, %s3000_s5  ;;  %1752 = vrot.lane.b32.xlu0 %v1750_v32, %s3000_s5  ;;  %v4086_v32 = vld [vmem:[%s3168_s9 + $0x61] sm:$0xff]  ;;  %v1912_v42 = vstv %s4116_s10  ;;  %s4185_s10 = sld [smem:[#allocation6 + $0x8a]] }
 0x182   : > { %v1873_v1 = vmul.f32 %v4086_v32, %v1872_v37  ;;  %v1881_v44 = vmul.f32 %v4086_v32, %v1880_v23 }
 0x183   : > { %v1198_v8 = vpop.permute.xlu1 %1197  ;;  %v1190_v48 = vpop.permute.xlu0 %1189 }
 0x184   : > { %v1200_v41 = vadd.f32 %v1198_v8, %v1168_v47  ;;  %v1192_v39 = vadd.f32 %v1190_v48, %v1164_v14  ;;  %v1889_v8 = vmul.f32 %v4086_v32, %v1888_v6  ;;  %v1896_v48 = vstv %s4093_s22  ;;  %s4151_s22 = sld [smem:[#allocation6 + $0x33]] }
 0x185   : > { %1794 = vrot.lane.b32.xlu1 %v1792_v26, %s2999_s23  ;;  %1786 = vrot.lane.b32.xlu0 %v1784_v59, %s2999_s23  ;;  %v1865_v26 = vmul.f32 %v4086_v32, %v1864_v36  ;;  %v1897_v62 = vmul.f32 %v4086_v32, %v1896_v48  ;;  %v1360_v14 = vstv %s4131_s21  ;;  %v1985_v6 = vstv %s4169_s4  ;;  %s4202_s21 = sld [smem:[#allocation6 + $0x60]]  ;;  %s4230_s4 = sld [smem:[#allocation6 + $0x2c]] }
 0x186   : > { %v1953_v45 = vstv %s4129_s30  ;;  %s4200_s30 = sld [smem:[#allocation6 + $0x61]] }
 0x187   : > { %v1214_v29 = vpop.permute.xlu1 %1213  ;;  %v1206_v30 = vpop.permute.xlu0 %1205  ;;  %v1993_v18 = vstv %s4185_s10  ;;  %s4253_s10 = sld [smem:[#allocation6 + $0x4d]] }
 0x188   : > { %v1216_v20 = vadd.f32 %v1214_v29, %v1184_v3  ;;  %v1208_v56 = vadd.f32 %v1206_v30, %v1176_v13  ;;  %v1287_v29 = vstv %s4118_s11  ;;  %v1280_v3 = vmul.f32 %v3634_v57, %v1279_v19  ;;  %s4194_s11 = sld [smem:[#allocation6 + $0x1d]] }
 0x189   : > { %1810 = vrot.lane.b32.xlu1 %v1808_v22, %s2999_s23  ;;  %1802 = vrot.lane.b32.xlu0 %v1800_v17, %s2999_s23  ;;  %v1905_v22 = vmul.f32 %v4086_v32, %v1904_v15  ;;  %v1920_v17 = vstv %s4109_s25  ;;  %v1364_v13 = vstv %s4122_s19  ;;  %s4172_s25 = sld [smem:[#allocation6 + $0x88]]  ;;  %s4198_s19 = sld [smem:[#allocation6 + $0x1c]] }
 0x18a   : > { %v1245_v49 = vadd.f32 %v1244_v55, %v1216_v20  ;;  %v1235_v51 = vadd.f32 %v1234_v46, %v1208_v56  ;;  %v1921_v30 = vmul.f32 %v4086_v32, %v1920_v17  ;;  %v1913_v20 = vmul.f32 %v4086_v32, %v1912_v42 }
 0x18b   : > { %v1230_v35 = vpop.permute.xlu1 %1229  ;;  %v1222_v25 = vpop.permute.xlu0 %1221  ;;  %v1365_v46 = vmul.f32 %v3697_v40, %v1364_v13  ;;  %v1441_v13 = vstv %s4202_s21  ;;  %s4267_s21 = sld [smem:[#allocation6 + $0x4f]] }
 0x18c   : > { %v1232_v61 = vadd.f32 %v1230_v35, %v1200_v41  ;;  %v1224_v43 = vadd.f32 %v1222_v25, %v1192_v39  ;;  %v1945_v35 = vstv %s4136_s24  ;;  %v1361_v39 = vmul.f32 %v3697_v40, %v1360_v14  ;;  %s4209_s24 = sld [smem:[#allocation6 + $0x1f]] }
 0x18d   : > { %1826 = vrot.lane.b32.xlu1 %v1824_v31, %s3000_s5  ;;  %1818 = vrot.lane.b32.xlu0 %v1816_v7, %s3000_s5  ;;  %v2867_v31 = vld [vmem:[%s3168_s9 + $0x40] sm:$0xff] }
 0x18e   : > { %v1267_v54 = vadd.f32 %v1266_v50, %v1232_v61  ;;  %v1256_v59 = vadd.f32 %v1255_v58, %v1224_v43  ;;  %v1292_v47 = vmul.f32 %v2867_v31, %v1291_v60  ;;  %v4165_v7 = vld [vmem:[%s3168_s9 + $0x62] sm:$0xff]  ;;  %v1288_v56 = vmul.f32 %v2867_v31, %v1287_v29 }
 0x18f   : > { %v1249_v52 = vpop.permute.xlu1 %1248  ;;  %v1238_v53 = vpop.permute.xlu0 %1237  ;;  %v1954_v25 = vmul.f32 %v4165_v7, %v1953_v45  ;;  %v1372_v50 = vstv %s4151_s22  ;;  %s4216_s22 = sld [smem:[#allocation6 + $0x62]]  ;;  %v1994_v60 = vmul.f32 %v4165_v7, %v1993_v18  ;;  %v2035_v42 = vstv %s4194_s11  ;;  %s4256_s11 = sld [smem:[#allocation6 + $0x4c]] }
 0x190   : > { %v1251_v24 = vadd.f32 %v1249_v52, %v1245_v49  ;;  %v1240_v5 = vadd.f32 %v1238_v53, %v1235_v51  ;;  %v1946_v49 = vmul.f32 %v4165_v7, %v1945_v35  ;;  %v1961_v51 = vstv %s4149_s8  ;;  %s4214_s8 = sld [smem:[#allocation6 + $0x63]] }
 0x191   : > { %1842 = vrot.lane.b32.xlu1 %v1840_v2, %s3000_s5  ;;  %1834 = vrot.lane.b32.xlu0 %v1832_v28, %s3000_s5  ;;  %v1969_v28 = vstv %s4145_s1  ;;  %v1368_v53 = vstv %s4155_s29  ;;  %s4212_s1 = sld [smem:[#allocation6 + $0x1e]]  ;;  %s4226_s29 = sld [smem:[#allocation6 + $0x2d]] }
 0x192   : > { %2589 = vst.msk [vmem:[%s4100_s18 + $0x8] sm:$0xff] %vm1241_vm0, %v1251_v24  ;;  %1242 = vst.msk [vmem:[%s4100_s18] sm:$0xff] %vm1241_vm0, %v1240_v5  ;;  %v1970_v5 = vmul.f32 %v4165_v7, %v1969_v28  ;;  %v1369_v23 = vmul.f32 %v3697_v40, %v1368_v53  ;;  %v2027_v29 = vstv %s4198_s19  ;;  %v2051_v14 = vstv %s4209_s24  ;;  %s4258_s19 = sld [smem:[#allocation6 + $0x5]]  ;;  %s4270_s24 = sld [smem:[#allocation6 + $0x4e]] }
 0x193   : > { %v1271_v9 = vpop.permute.xlu1 %1270  ;;  %v1260_v0 = vpop.permute.xlu0 %1259 }
 0x194   : > { %v1273_v12 = vadd.f32 %v1271_v9, %v1267_v54  ;;  %v1262_v11 = vadd.f32 %v1260_v0, %v1256_v59  ;;  %v1962_v54 = vmul.f32 %v4165_v7, %v1961_v51  ;;  %v2059_v51 = vstv %s4230_s4  ;;  %s4297_s4 = sld [smem:[#allocation6 + $0x5f]] }
 0x195   : > { %1875 = vrot.lane.b32.xlu1 %v1873_v1, %s2999_s23  ;;  %1867 = vrot.lane.b32.xlu0 %v1865_v26, %s2999_s23  ;;  %v1373_v26 = vmul.f32 %v3697_v40, %v1372_v50 }
 0x196   : > { %2595 = vst.msk [vmem:[%s4100_s18 + $0x18] sm:$0xff] %vm1241_vm0, %v1273_v12  ;;  %2592 = vst.msk [vmem:[%s4100_s18 + $0x10] sm:$0xff] %vm1241_vm0, %v1262_v11  ;;  %v1977_v12 = vstv %s4172_s25  ;;  %s4239_s25 = sld [smem:[#allocation6 + $0x2f]] }
 0x197   : > { %v1307_v10 = vpop.permute.xlu1 %1306  ;;  %v1299_v16 = vpop.permute.xlu0 %1298  ;;  %v1978_v40 = vmul.f32 %v4165_v7, %v1977_v12  ;;  %v2043_v35 = vstv %s4212_s1  ;;  %v2067_v28 = vstv %s4226_s29  ;;  %s4272_s1 = sld [smem:[#allocation6 + $0x7]]  ;;  %s4288_s29 = sld [smem:[#allocation6 + $0x5c]] }
 0x198   : > { %v1309_v55 = vadd.f32 %v1307_v10, %v1284_v63  ;;  %v1301_v41 = vadd.f32 %v1299_v16, %v1280_v3  ;;  %v2001_v10 = vstv %s4181_s6  ;;  %s4244_s6 = sld [smem:[#allocation6 + $0x2e]] }
 0x199   : > { %1891 = vrot.lane.b32.xlu1 %v1889_v8, %s2999_s23  ;;  %1883 = vrot.lane.b32.xlu0 %v1881_v44, %s2999_s23  ;;  %v1986_v44 = vmul.f32 %v4165_v7, %v1985_v6  ;;  %v2002_v17 = vmul.f32 %v4165_v7, %v2001_v10 }
 0x19b   : > { %v1323_v27 = vpop.permute.xlu1 %1322  ;;  %v1315_v21 = vpop.permute.xlu0 %1314 }
 0x19c   : > { %v1325_v2 = vadd.f32 %v1323_v27, %v1292_v47  ;;  %v1317_v37 = vadd.f32 %v1315_v21, %v1288_v56  ;;  %v4223_v27 = vld [vmem:[%s3168_s9 + $0x70] sm:$0xff]  ;;  %v1445_v21 = vstv %s4200_s30  ;;  %s4260_s30 = sld [smem:[#allocation6 + $0x4]] }
 0x19d   : > { %1907 = vrot.lane.b32.xlu1 %v1905_v22, %s3000_s5  ;;  %1899 = vrot.lane.b32.xlu0 %v1897_v62, %s3000_s5  ;;  %v2036_v47 = vmul.f32 %v4223_v27, %v2035_v42  ;;  %v1446_v45 = vmul.f32 %v3738_v4, %v1445_v21  ;;  %v2068_v53 = vmul.f32 %v4223_v27, %v2067_v28  ;;  %v1535_v21 = vstv %s4272_s1  ;;  %s4330_s1 = sld [smem:[#allocation6 + $0x36]] }
 0x19e   : > { %v2075_v6 = vstv %s4244_s6  ;;  %s4309_s6 = sld [smem:[#allocation6 + $0x7d]] }
 0x19f   : > { %v1339_v57 = vpop.permute.xlu1 %1338  ;;  %v1331_v38 = vpop.permute.xlu0 %1330 }
 0x1a0   : > { %v1341_v61 = vadd.f32 %v1339_v57, %v1309_v55  ;;  %v1333_v43 = vadd.f32 %v1331_v38, %v1301_v41  ;;  %v1442_v57 = vmul.f32 %v3738_v4, %v1441_v13  ;;  %v1453_v55 = vstv %s4214_s8  ;;  %s4274_s8 = sld [smem:[#allocation6 + $0x6]] }
 0x1a1   : > { %1923 = vrot.lane.b32.xlu1 %v1921_v30, %s3000_s5  ;;  %1915 = vrot.lane.b32.xlu0 %v1913_v20, %s3000_s5  ;;  %v2028_v20 = vmul.f32 %v4223_v27, %v2027_v29  ;;  %v2124_v29 = vstv %s4270_s24  ;;  %s4328_s24 = sld [smem:[#allocation6 + $0x37]] }
 0x1a2   : > { %v1366_v1 = vadd.f32 %v1365_v46, %v1341_v61  ;;  %v1362_v59 = vadd.f32 %v1361_v39, %v1333_v43  ;;  %v2052_v39 = vmul.f32 %v4223_v27, %v2051_v14  ;;  %v2044_v61 = vmul.f32 %v4223_v27, %v2043_v35 }
 0x1a3   : > { %v1355_v52 = vpop.permute.xlu1 %1354  ;;  %v1347_v24 = vpop.permute.xlu0 %1346 }
 0x1a4   : > { %v1357_v36 = vadd.f32 %v1355_v52, %v1325_v2  ;;  %v1349_v58 = vadd.f32 %v1347_v24, %v1317_v37 }
 0x1a5   : > { %1956 = vrot.lane.b32.xlu1 %v1954_v25, %s2999_s23  ;;  %1948 = vrot.lane.b32.xlu0 %v1946_v49, %s2999_s23  ;;  %v1449_v25 = vstv %s4216_s22  ;;  %v2868_v49 = vld [vmem:[%s3168_s9 + $0x42] sm:$0xff]  ;;  %s4284_s22 = sld [smem:[#allocation6 + $0x5d]] }
 0x1a6   : > { %v1374_v15 = vadd.f32 %v1373_v26, %v1357_v36  ;;  %v1370_v16 = vadd.f32 %v1369_v23, %v1349_v58  ;;  %v1454_v4 = vmul.f32 %v2868_v49, %v1453_v55  ;;  %v1450_v52 = vmul.f32 %v2868_v49, %v1449_v25 }
 0x1a7   : > { %v1388_v9 = vpop.permute.xlu1 %1387  ;;  %v1380_v11 = vpop.permute.xlu0 %1379  ;;  %v1531_v13 = vstv %s4274_s8  ;;  %v2164_v49 = vstv %s4297_s4  ;;  %s4340_s8 = sld [smem:[#allocation6 + $0x8d]]  ;;  %s4357_s4 = sld [smem:[#allocation6 + $0x8e]] }
 0x1a8   : > { %v1390_v0 = vadd.f32 %v1388_v9, %v1366_v1  ;;  %v1382_v8 = vadd.f32 %v1380_v11, %v1362_v59  ;;  %v2083_v1 = vstv %s4239_s25  ;;  %v4281_v11 = vld [vmem:[%s3168_s9 + $0x71] sm:$0xff]  ;;  %s4301_s25 = sld [smem:[#allocation6 + $0x5e]] }
 0x1a9   : > { %1972 = vrot.lane.b32.xlu1 %v1970_v5, %s2999_s23  ;;  %1964 = vrot.lane.b32.xlu0 %v1962_v54, %s2999_s23  ;;  %v2060_v5 = vmul.f32 %v4223_v27, %v2059_v51  ;;  %v2084_v12 = vmul.f32 %v4223_v27, %v2083_v1 }
 0x1ab   : > { %v1404_v48 = vpop.permute.xlu1 %1403  ;;  %v1396_v19 = vpop.permute.xlu0 %1395 }
 0x1ac   : > { %v1406_v22 = vadd.f32 %v1404_v48, %v1374_v15  ;;  %v1398_v62 = vadd.f32 %v1396_v19, %v1370_v16  ;;  %v2108_v15 = vstv %s4256_s11  ;;  %v1523_v16 = vstv %s4260_s30  ;;  %s4314_s11 = sld [smem:[#allocation6 + $0x35]]  ;;  %s4323_s30 = sld [smem:[#allocation6 + $0x7f]] }
 0x1ad   : > { %1988 = vrot.lane.b32.xlu1 %v1986_v44, %s3000_s5  ;;  %1980 = vrot.lane.b32.xlu0 %v1978_v40, %s3000_s5  ;;  %v1527_v40 = vstv %s4258_s19  ;;  %v2109_v19 = vmul.f32 %v4281_v11, %v2108_v15  ;;  %s4316_s19 = sld [smem:[#allocation6 + $0x34]] }
 0x1af   : > { %v1420_v63 = vpop.permute.xlu1 %1419  ;;  %v1412_v30 = vpop.permute.xlu0 %1411 }
 0x1b0   : > { %v1422_v3 = vadd.f32 %v1420_v63, %v1390_v0  ;;  %v1414_v31 = vadd.f32 %v1412_v30, %v1382_v8  ;;  %v2076_v0 = vmul.f32 %v4223_v27, %v2075_v6  ;;  %v2116_v8 = vstv %s4253_s10  ;;  %s4312_s10 = sld [smem:[#allocation6 + $0x7c]] }
 0x1b1   : > { %2004 = vrot.lane.b32.xlu1 %v2002_v17, %s3000_s5  ;;  %1996 = vrot.lane.b32.xlu0 %v1994_v60, %s3000_s5  ;;  %v2132_v60 = vstv %s4267_s21  ;;  %s4326_s21 = sld [smem:[#allocation6 + $0x7e]] }
 0x1b2   : > { %v1447_v2 = vadd.f32 %v1446_v45, %v1422_v3  ;;  %v1443_v43 = vadd.f32 %v1442_v57, %v1414_v31  ;;  %v2125_v45 = vmul.f32 %v4281_v11, %v2124_v29  ;;  %v1608_v1 = vstv %s4314_s11  ;;  %s4378_s11 = sld [smem:[#allocation6 + $0x66]] }
 0x1b3   : > { %v1436_v56 = vpop.permute.xlu1 %1435  ;;  %v1428_v41 = vpop.permute.xlu0 %1427  ;;  %v1604_v6 = vstv %s4316_s19  ;;  %s2676_s19 = sld [smem:[#allocation6 + $0xa]] }
 0x1b4   : > { %v1438_v38 = vadd.f32 %v1436_v56, %v1406_v22  ;;  %v1430_v46 = vadd.f32 %v1428_v41, %v1398_v62  ;;  %v2117_v22 = vmul.f32 %v4281_v11, %v2116_v8  ;;  %v2869_v62 = vld [vmem:[%s3168_s9 + $0x50] sm:$0xff]  ;;  %v2148_v56 = vstv %s4284_s22  ;;  %s4344_s22 = sld [smem:[#allocation6 + $0x8c]] }
 0x1b5   : > { %2038 = vrot.lane.b32.xlu1 %v2036_v47, %s2999_s23  ;;  %2030 = vrot.lane.b32.xlu0 %v2028_v20, %s2999_s23  ;;  %v1528_v17 = vmul.f32 %v2869_v62, %v1527_v40  ;;  %v1524_v63 = vmul.f32 %v2869_v62, %v1523_v16  ;;  %v2133_v47 = vmul.f32 %v4281_v11, %v2132_v60  ;;  %v2213_v8 = vstv %s4323_s30  ;;  %s2688_s30 = sld [smem:[#allocation6 + $0x39]] }
 0x1b6   : > { %v1455_v58 = vadd.f32 %v1454_v4, %v1438_v38  ;;  %v1451_v26 = vadd.f32 %v1450_v52, %v1430_v46  ;;  %v1536_v14 = vmul.f32 %v2869_v62, %v1535_v21  ;;  %v1532_v55 = vmul.f32 %v2869_v62, %v1531_v13 }
 0x1b7   : > { %v1469_v37 = vpop.permute.xlu1 %1468  ;;  %v1461_v36 = vpop.permute.xlu0 %1460  ;;  %v2140_v38 = vstv %s4288_s29  ;;  %s4353_s29 = sld [smem:[#allocation6 + $0x8f]]  ;;  %v2205_v40 = vstv %s4326_s21  ;;  %s2687_s21 = sld [smem:[#allocation6 + $0x38]] }
 0x1b8   : > { %v1471_v50 = vadd.f32 %v1469_v37, %v1447_v2  ;;  %v1463_v24 = vadd.f32 %v1461_v36, %v1443_v43  ;;  %v2156_v37 = vstv %s4301_s25  ;;  %s4366_s25 = sld [smem:[#allocation6 + $0x65]] }
 0x1b9   : > { %2054 = vrot.lane.b32.xlu1 %v2052_v39, %s2999_s23  ;;  %2046 = vrot.lane.b32.xlu0 %v2044_v61, %s2999_s23  ;;  %v2149_v39 = vmul.f32 %v4281_v11, %v2148_v56  ;;  %v2141_v61 = vmul.f32 %v4281_v11, %v2140_v38  ;;  %v2157_v36 = vmul.f32 %v4281_v11, %v2156_v37  ;;  %v2753_v37 = vld [vmem:[%s3168_s9 + $0x51] sm:$0xff] }
 0x1bb   : > { %v1485_v54 = vpop.permute.xlu1 %1484  ;;  %v1477_v59 = vpop.permute.xlu0 %1476 }
 0x1bc   : > { %v1487_v9 = vadd.f32 %v1485_v54, %v1455_v58  ;;  %v1479_v23 = vadd.f32 %v1477_v59, %v1451_v26 }
 0x1bd   : > { %2070 = vrot.lane.b32.xlu1 %v2068_v53, %s3000_s5  ;;  %2062 = vrot.lane.b32.xlu0 %v2060_v5, %s3000_s5  ;;  %v2197_v53 = vstv %s4309_s6  ;;  %v2189_v5 = vstv %s4312_s10  ;;  %s4368_s6 = sld [smem:[#allocation6 + $0x64]]  ;;  %s4376_s10 = sld [smem:[#allocation6 + $0x67]] }
 0x1bf   : > { %v1501_v44 = vpop.permute.xlu1 %1500  ;;  %v1493_v48 = vpop.permute.xlu0 %1492 }
 0x1c0   : > { %v1503_v10 = vadd.f32 %v1501_v44, %v1471_v50  ;;  %v1495_v18 = vadd.f32 %v1493_v48, %v1463_v24  ;;  %v2165_v50 = vmul.f32 %v4281_v11, %v2164_v49  ;;  %v4337_v24 = vld [vmem:[%s3168_s9 + $0x72] sm:$0xff] }
 0x1c1   : > { %2086 = vrot.lane.b32.xlu1 %v2084_v12, %s3000_s5  ;;  %2078 = vrot.lane.b32.xlu0 %v2076_v0, %s3000_s5  ;;  %v2198_v59 = vmul.f32 %v4337_v24, %v2197_v53  ;;  %v2870_v12 = vld [vmem:[%s3168_s9 + $0x51] sm:$0xff] }
 0x1c2   : > { %v1529_v20 = vadd.f32 %v1528_v17, %v1503_v10  ;;  %v1525_v35 = vadd.f32 %v1524_v63, %v1495_v18  ;;  %v1609_v0 = vmul.f32 %v2870_v12, %v1608_v1  ;;  %v1605_v15 = vmul.f32 %v2870_v12, %v1604_v6 }
 0x1c3   : > { %v1517_v42 = vpop.permute.xlu1 %1516  ;;  %v1509_v30 = vpop.permute.xlu0 %1508  ;;  %v1616_v10 = vstv %s4328_s24  ;;  %v1612_v18 = vstv %s4330_s1  ;;  %v2206_v17 = vmul.f32 %v4337_v24, %v2205_v40  ;;  %s4430_s24 = sld [smem:[#allocation6 + $0x3b]]  ;;  %s4434_s1 = sld [smem:[#allocation6 + $0x3a]] }
 0x1c4   : > { %v1519_v3 = vadd.f32 %v1517_v42, %v1487_v9  ;;  %v1511_v31 = vadd.f32 %v1509_v30, %v1479_v23  ;;  %v2190_v23 = vmul.f32 %v4337_v24, %v2189_v5  ;;  %v1617_v60 = vmul.f32 %v2870_v12, %v1616_v10 }
 0x1c5   : > { %2119 = vrot.lane.b32.xlu1 %v2117_v22, %s2999_s23  ;;  %2111 = vrot.lane.b32.xlu0 %v2109_v19, %s2999_s23  ;;  %v2214_v19 = vmul.f32 %v4337_v24, %v2213_v8  ;;  %v2229_v42 = vstv %s4340_s8  ;;  %v1613_v21 = vmul.f32 %v2870_v12, %v1612_v18  ;;  %v1693_v5 = vstv %s4378_s11  ;;  %s4440_s8 = sld [smem:[#allocation6 + $0x69]]  ;;  %s4481_s11 = sld [smem:[#allocation6 + $0xe]] }
 0x1c6   : > { %v1537_v2 = vadd.f32 %v1536_v14, %v1519_v3  ;;  %v1533_v28 = vadd.f32 %v1532_v55, %v1511_v31  ;;  %v2221_v3 = vstv %s4344_s22  ;;  %v2245_v14 = vstv %s4353_s29  ;;  %s4444_s22 = sld [smem:[#allocation6 + $0x68]]  ;;  %s4451_s29 = sld [smem:[#allocation6 + $0x6b]] }
 0x1c7   : > { %v1551_v57 = vpop.permute.xlu1 %1550  ;;  %v1543_v25 = vpop.permute.xlu0 %1542 }
 0x1c8   : > { %v1553_v41 = vadd.f32 %v1551_v57, %v1529_v20  ;;  %v1545_v46 = vadd.f32 %v1543_v25, %v1525_v35  ;;  %v2237_v35 = vstv %s4357_s4  ;;  %v2246_v25 = vmul.f32 %v4337_v24, %v2245_v14  ;;  %s4456_s4 = sld [smem:[#allocation6 + $0x6a]] }
 0x1c9   : > { %2135 = vrot.lane.b32.xlu1 %v2133_v47, %s2999_s23  ;;  %2127 = vrot.lane.b32.xlu0 %v2125_v45, %s2999_s23  ;;  %v2230_v47 = vmul.f32 %v4337_v24, %v2229_v42  ;;  %v2222_v45 = vmul.f32 %v4337_v24, %v2221_v3 }
 0x1cb   : > { %v1567_v4 = vpop.permute.xlu1 %1566  ;;  %v1559_v52 = vpop.permute.xlu0 %1558 }
 0x1cc   : > { %v1569_v43 = vadd.f32 %v1567_v4, %v1537_v2  ;;  %v1561_v51 = vadd.f32 %v1559_v52, %v1533_v28  ;;  %v1689_v2 = vstv %s4366_s25  ;;  %v1685_v4 = vstv %s4368_s6  ;;  %s4463_s25 = sld [smem:[#allocation6 + $0xd]]  ;;  %s4469_s6 = sld [smem:[#allocation6 + $0xc]] }
 0x1cd   : > { %2151 = vrot.lane.b32.xlu1 %v2149_v39, %s3000_s5  ;;  %2143 = vrot.lane.b32.xlu0 %v2141_v61, %s3000_s5 }
 0x1cf   : > { %v1583_v58 = vpop.permute.xlu1 %1582  ;;  %v1575_v26 = vpop.permute.xlu0 %1574 }
 0x1d0   : > { %v1585_v54 = vadd.f32 %v1583_v58, %v1553_v41  ;;  %v1577_v9 = vadd.f32 %v1575_v26, %v1545_v46  ;;  %v2238_v46 = vmul.f32 %v4337_v24, %v2237_v35 }
 0x1d1   : > { %2167 = vrot.lane.b32.xlu1 %v2165_v50, %s3000_s5  ;;  %2159 = vrot.lane.b32.xlu0 %v2157_v36, %s3000_s5  ;;  %v1697_v36 = vstv %s4376_s10  ;;  %s4477_s10 = sld [smem:[#allocation6 + $0xf]] }
 0x1d2   : > { %v1610_v62 = vadd.f32 %v1609_v0, %v1585_v54  ;;  %v1606_v29 = vadd.f32 %v1605_v15, %v1577_v9  ;;  %v2872_v54 = vld [vmem:[%s3168_s9 + $0x41] sm:$0xff] }
 0x1d3   : > { %v1599_v44 = vpop.permute.xlu1 %1598  ;;  %v1591_v16 = vpop.permute.xlu0 %1590 }
 0x1d4   : > { %v1601_v48 = vadd.f32 %v1599_v44, %v1569_v43  ;;  %v1593_v22 = vadd.f32 %v1591_v16, %v1561_v51  ;;  %v1690_v43 = vmul.f32 %v3927_v33, %v1689_v2  ;;  %v2871_v51 = vld [vmem:[%s3168_s9 + $0x52] sm:$0xff]  ;;  %s2675_s9 = sld [smem:[#allocation6 + $0x9]] }
 0x1d5   : > { %2200 = vrot.lane.b32.xlu1 %v2198_v59, %s2999_s23  ;;  %2192 = vrot.lane.b32.xlu0 %v2190_v23, %s2999_s23  ;;  %v1686_v50 = vmul.f32 %v2871_v51, %v1685_v4  ;;  %v1698_v6 = vmul.f32 %v2871_v51, %v1697_v36  ;;  %v1694_v23 = vmul.f32 %v2871_v51, %v1693_v5  ;;  %v1775_v51 = vstv %s2676_s19  ;;  %s4505_s19 = sld [smem:[#allocation6 + $0x3e]] }
 0x1d6   : > { %v1618_v20 = vadd.f32 %v1617_v60, %v1601_v48  ;;  %v1614_v57 = vadd.f32 %v1613_v21, %v1593_v22  ;;  %v1776_v5 = vmul.f32 %v4020_v34, %v1775_v51 }
 0x1d7   : > { %v1632_v63 = vpop.permute.xlu1 %1631  ;;  %v1624_v13 = vpop.permute.xlu0 %1623 }
 0x1d8   : > { %v1634_v30 = vadd.f32 %v1632_v63, %v1610_v62  ;;  %v1626_v31 = vadd.f32 %v1624_v13, %v1606_v29 }
 0x1d9   : > { %2216 = vrot.lane.b32.xlu1 %v2214_v19, %s2999_s23  ;;  %2208 = vrot.lane.b32.xlu0 %v2206_v17, %s2999_s23 }
 0x1da   : > { %v1771_v2 = vstv %s2675_s9  ;;  %s4489_s9 = sld [smem:[#allocation6 + $0x3d]] }
 0x1db   : > { %v1648_v56 = vpop.permute.xlu1 %1647  ;;  %v1640_v38 = vpop.permute.xlu0 %1639 }
 0x1dc   : > { %v1650_v55 = vadd.f32 %v1648_v56, %v1618_v20  ;;  %v1642_v41 = vadd.f32 %v1640_v38, %v1614_v57 }
 0x1dd   : > { %2232 = vrot.lane.b32.xlu1 %v2230_v47, %s3000_s5  ;;  %2224 = vrot.lane.b32.xlu0 %v2222_v45, %s3000_s5 }
 0x1df   : > { %v1664_v39 = vpop.permute.xlu1 %1663  ;;  %v1656_v49 = vpop.permute.xlu0 %1655 }
 0x1e0   : > { %v1666_v61 = vadd.f32 %v1664_v39, %v1634_v30  ;;  %v1658_v28 = vadd.f32 %v1656_v49, %v1626_v31 }
 0x1e1   : > { %2248 = vrot.lane.b32.xlu1 %v2246_v25, %s3000_s5  ;;  %2240 = vrot.lane.b32.xlu0 %v2238_v46, %s3000_s5  ;;  %s2677_s5 = sld [smem:[#allocation6 + $0xb]] }
 0x1e2   : > { %v1691_v26 = vadd.f32 %v1690_v43, %v1666_v61  ;;  %v1687_v59 = vadd.f32 %v1686_v50, %v1658_v28  ;;  %v1772_v28 = vmul.f32 %v4020_v34, %v1771_v2 }
 0x1e3   : > { %v1680_v52 = vpop.permute.xlu1 %1679  ;;  %v1672_v58 = vpop.permute.xlu0 %1671 }
 0x1e4   : > { %v1682_v53 = vadd.f32 %v1680_v52, %v1650_v55  ;;  %v1674_v1 = vadd.f32 %v1672_v58, %v1642_v41 }
 0x1e5   : > { %2267 = vrot.lane.b32.xlu1 %v2753_v37, %s2999_s23  ;;  %2256 = vrot.lane.b32.xlu0 %v2872_v54, %s2999_s23 }
 0x1e6   : > { %v1699_v8 = vadd.f32 %v1698_v6, %v1682_v53  ;;  %v1695_v15 = vadd.f32 %v1694_v23, %v1674_v1  ;;  %v1852_v1 = vstv %s2688_s30  ;;  %v1848_v6 = vstv %s2687_s21  ;;  %s4513_s30 = sld [smem:[#allocation6 + $0x6d]]  ;;  %s4517_s21 = sld [smem:[#allocation6 + $0x6c]] }
 0x1e7   : > { %v1713_v9 = vpop.permute.xlu1 %1712  ;;  %v1705_v33 = vpop.permute.xlu0 %1704  ;;  %v1779_v43 = vstv %s2677_s5  ;;  %s4501_s5 = sld [smem:[#allocation6 + $0x3f]] }
 0x1e8   : > { %v1715_v12 = vadd.f32 %v1713_v9, %v1691_v26  ;;  %v1707_v0 = vadd.f32 %v1705_v33, %v1687_v59  ;;  %v1780_v53 = vmul.f32 %v4020_v34, %v1779_v43  ;;  %v1853_v33 = vmul.f32 %v4086_v32, %v1852_v1 }
 0x1e9   : > { %2289 = vrot.lane.b32.xlu1 %v4281_v11, %s2999_s23  ;;  %2278 = vrot.lane.b32.xlu0 %v4086_v32, %s2999_s23  ;;  %s2674_s23 = sld [smem:[#allocation6 + $0x8]]  ;;  %v1937_v43 = vstv %s4456_s4  ;;  %v2015_v1 = vstv %s4463_s25  ;;  %s2755_s4 = sld [smem:[#allocation7 + $0x2]] }
 0x1ea   : > { %s2311_s25 = sshll.u32 %s4100_s18, 4  ;;  %s4545_s25 = int_to_ptr.vmem [resolvable:$true] %s2311_s25 }
 0x1eb   : > { %v1729_v44 = vpop.permute.xlu1 %1728  ;;  %v1721_v10 = vpop.permute.xlu0 %1720 }
 0x1ec   : > { %v1731_v40 = vadd.f32 %v1729_v44, %v1699_v8  ;;  %v1723_v48 = vadd.f32 %v1721_v10, %v1695_v15  ;;  %v1860_v44 = vstv %s4430_s24  ;;  %v1856_v10 = vstv %s4434_s1  ;;  %s4524_s24 = sld [smem:[#allocation6 + $0x6f]]  ;;  %s4528_s1 = sld [smem:[#allocation6 + $0x6e]] }
 0x1ef   : > { %v1745_v16 = vpop.permute.xlu1 %1744  ;;  %v1737_v22 = vpop.permute.xlu0 %1736  ;;  %v1767_v49 = vstv %s2674_s23  ;;  %s4493_s23 = sld [smem:[#allocation6 + $0x3c]] }
 0x1f0   : > { %v1747_v18 = vadd.f32 %v1745_v16, %v1715_v12  ;;  %v1739_v19 = vadd.f32 %v1737_v22, %v1707_v0  ;;  %v1768_v37 = vmul.f32 %v4020_v34, %v1767_v49  ;;  %v1849_v34 = vmul.f32 %v4086_v32, %v1848_v6 }
 0x1f1   : > { %v2011_v6 = vstv %s4469_s6  ;;  %s2762_s6 = sshll.u32 %s2981_s15, 7  ;;  %s2296_s15 = scalar_lea.sflag [#allocation4], %s3164_s7 }
 0x1f2   : > { %v1773_v36 = vadd.f32 %v1772_v28, %v1747_v18  ;;  %v1769_v58 = vadd.f32 %v1768_v37, %v1739_v19  ;;  %v1861_v19 = vmul.f32 %v4086_v32, %v1860_v44  ;;  %v1941_v28 = vstv %s4451_s29  ;;  %s2758_s29 = sld [smem:[#allocation7 + $0x3]] }
 0x1f3   : > { %v1761_v62 = vpop.permute.xlu1 %1760  ;;  %v1753_v60 = vpop.permute.xlu0 %1752 }
 0x1f4   : > { %v1763_v17 = vadd.f32 %v1761_v62, %v1731_v40  ;;  %v1755_v42 = vadd.f32 %v1753_v60, %v1723_v48  ;;  %v1857_v60 = vmul.f32 %v4086_v32, %v1856_v10 }
 0x1f6   : > { %v1781_v23 = vadd.f32 %v1780_v53, %v1763_v17  ;;  %v1777_v0 = vadd.f32 %v1776_v5, %v1755_v42  ;;  %v1933_v42 = vstv %s4440_s8  ;;  %v1938_v5 = vmul.f32 %v4165_v7, %v1937_v43  ;;  %s2752_s8 = sld [smem:[#allocation7 + $0x1]] }
 0x1f7   : > { %v1795_v63 = vpop.permute.xlu1 %1794  ;;  %v1787_v29 = vpop.permute.xlu0 %1786 }
 0x1f8   : > { %v1797_v26 = vadd.f32 %v1795_v63, %v1773_v36  ;;  %v1789_v59 = vadd.f32 %v1787_v29, %v1769_v58 }
 0x1fb   : > { %v1811_v21 = vpop.permute.xlu1 %1810  ;;  %v1803_v3 = vpop.permute.xlu0 %1802 }
 0x1fc   : > { %v1813_v40 = vadd.f32 %v1811_v21, %v1781_v23  ;;  %v1805_v16 = vadd.f32 %v1803_v3, %v1777_v0  ;;  %v1929_v21 = vstv %s4444_s22  ;;  %v2016_v23 = vmul.f32 %v4223_v27, %v2015_v1  ;;  %s2252_s22 = sld [smem:[#allocation7]] }
 0x1fd   : > { %v1930_v49 = vmul.f32 %v4165_v7, %v1929_v21  ;;  %v2023_v0 = vstv %s4477_s10  ;;  %v2104_v21 = vstv %s4501_s5  ;;  %s3001_s5 = smov [#allocation9]  }
 0x1ff   : > { %v1827_v30 = vpop.permute.xlu1 %1826  ;;  %v1819_v13 = vpop.permute.xlu0 %1818 }
 0x200   : > { %v1829_v12 = vadd.f32 %v1827_v30, %v1797_v26  ;;  %v1821_v8 = vadd.f32 %v1819_v13, %v1789_v59 }
 0x202   : > { %v1854_v22 = vadd.f32 %v1853_v33, %v1829_v12  ;;  %v1850_v17 = vadd.f32 %v1849_v34, %v1821_v8  ;;  %v2012_v33 = vmul.f32 %v4223_v27, %v2011_v6  ;;  %v2019_v34 = vstv %s4481_s11 }
 0x203   : > { %v1843_v31 = vpop.permute.xlu1 %1842  ;;  %v1835_v47 = vpop.permute.xlu0 %1834 }
 0x204   : > { %v1845_v18 = vadd.f32 %v1843_v31, %v1813_v40  ;;  %v1837_v62 = vadd.f32 %v1835_v47, %v1805_v16  ;;  %v1934_v47 = vmul.f32 %v4165_v7, %v1933_v42 }
 0x206   : > { %v1862_v13 = vadd.f32 %v1861_v19, %v1845_v18  ;;  %v1858_v32 = vadd.f32 %v1857_v60, %v1837_v62  ;;  %v2020_v18 = vmul.f32 %v4223_v27, %v2019_v34  ;;  %v2092_v62 = vstv %s4493_s23  ;;  %s2899_s23 = scalar_lea.vmem %s4545_s25, 1024 }
 0x207   : > { %v4400_v20 = vpop.permute.xlu1 %1875  ;;  %v4402_v45 = vpop.permute.xlu0 %1867  ;;  %p2900_p4 = scmp.ne.s32.totalorder %s4545_s25, %s2899_s23 }
 0x208   : > { %v1878_v29 = vadd.f32 %v4400_v20, %v1854_v22  ;;  %v1870_v30 = vadd.f32 %v4402_v45, %v1850_v17  ;;  %v2096_v22 = vstv %s4489_s9  ;;  %s4552_s9 = scalar_lea.hbm %s4608_s3, %s2762_s6 }
 0x209   : > { %v2097_v60 = vmul.f32 %v4281_v11, %v2096_v22  ;;  %p2901_p5 = pnand %p2900_p4, %p3082_p9 }
 0x20b   : > { %v4404_v14 = vpop.permute.xlu1 %1891  ;;  %v4406_v56 = vpop.permute.xlu0 %1883  ;;  %p2902_p8 = pneg %p2901_p5 }
 0x20c   : > { %v1894_v37 = vadd.f32 %v4404_v14, %v1862_v13  ;;  %v2100_v13 = vstv %s4505_s19  ;;  %s2903_s19 = sshll.u32 %s3001_s5, 4  ;;  %s2904_s19 = int_to_ptr.vmem [resolvable:$false] %s2903_s19 }
 0x20d   : > { %p2906_p0 = scmp.lt.s32.totalorder %s4545_s25, %s2904_s19 }
 0x20f   : > { %v4408_v57 = vpop.permute.xlu1 %1907  ;;  %v4410_v35 = vpop.permute.xlu0 %1899 }
 0x210   : > { %v1910_v31 = vadd.f32 %v4408_v57, %v1878_v29  ;;  %v1902_v2 = vadd.f32 %v4410_v35, %v1870_v30  ;;  %v1886_v57 = vadd.f32 %v4406_v56, %v1858_v32  ;;  %v1942_v35 = vmul.f32 %v4165_v7, %v1941_v28 }
 0x211   : > { %v2093_v29 = vmul.f32 %v4281_v11, %v2092_v62  ;;  %v2177_v28 = vstv %s4513_s30  ;;  %v2285_v62 = vstv %s2758_s29  ;;  %s2905_s30 = scalar_lea.vmem %s2904_s19, 2048 }
 0x212   : > { %v1935_v36 = vadd.f32 %v1934_v47, %v1910_v31  ;;  %v1931_v58 = vadd.f32 %v1930_v49, %v1902_v2  ;;  %v2101_v49 = vmul.f32 %v4281_v11, %v2100_v13  ;;  %p2907_p1 = scmp.lt.s32.totalorder %s2905_s30, %s2899_s23 }
 0x213   : > { %v4412_v55 = vpop.permute.xlu1 %1923  ;;  %v4414_v38 = vpop.permute.xlu0 %1915 }
 0x214   : > { %v1926_v51 = vadd.f32 %v4412_v55, %v1894_v37  ;;  %v1918_v53 = vadd.f32 %v4414_v38, %v1886_v57  ;;  %p2908_p6 = por %p2907_p1, %p2906_p0 }
 0x216   : > { %v1943_v59 = vadd.f32 %v1942_v35, %v1926_v51  ;;  %v1939_v12 = vadd.f32 %v1938_v5, %v1918_v53  ;;  %v2185_v5 = vstv %s4524_s24  ;;  %p2909_p2 = pnand %p2908_p6, %p2902_p8 }
 0x217   : > { %v4416_v41 = vpop.permute.xlu1 %1956  ;;  %v4418_v25 = vpop.permute.xlu0 %1948 }
 0x218   : > { %v1959_v26 = vadd.f32 %v4416_v41, %v1935_v36  ;;  %v1951_v55 = vadd.f32 %v4418_v25, %v1931_v58 }
 0x21b   : > { %v4420_v46 = vpop.permute.xlu1 %1972  ;;  %v4422_v39 = vpop.permute.xlu0 %1964 }
 0x21c   : > { %v1975_v8 = vadd.f32 %v4420_v46, %v1943_v59 }
 0x21f   : > { %v4424_v61 = vpop.permute.xlu1 %1988  ;;  %v4426_v4 = vpop.permute.xlu0 %1980 }
 0x220   : > { %v1991_v38 = vadd.f32 %v4424_v61, %v1959_v26  ;;  %v1983_v7 = vadd.f32 %v4426_v4, %v1951_v55  ;;  %v1967_v61 = vadd.f32 %v4422_v39, %v1939_v12  ;;  %v2024_v4 = vmul.f32 %v4223_v27, %v2023_v0 }
 0x222   : > { %v2017_v40 = vadd.f32 %v2016_v23, %v1991_v38  ;;  %v2013_v16 = vadd.f32 %v2012_v33, %v1983_v7 }
 0x223   : > { %v4432_v52 = vpop.permute.xlu1 %2004  ;;  %v4436_v50 = vpop.permute.xlu0 %1996 }
 0x224   : > { %v2007_v44 = vadd.f32 %v4432_v52, %v1975_v8  ;;  %v1999_v10 = vadd.f32 %v4436_v50, %v1967_v61 }
 0x226   : > { %v2025_v17 = vadd.f32 %v2024_v4, %v2007_v44  ;;  %v2021_v42 = vadd.f32 %v2020_v18, %v1999_v10  ;;  %v2263_v44 = vstv %s2752_s8  ;;  %v2253_v10 = vstv %s2252_s22 }
 0x227   : > { %v4442_v54 = vpop.permute.xlu1 %2038  ;;  %v4446_v9 = vpop.permute.xlu0 %2030 }
 0x228   : > { %v2041_v46 = vadd.f32 %v4442_v54, %v2017_v40  ;;  %v2033_v52 = vadd.f32 %v4446_v9, %v2013_v16 }
 0x22b   : > { %v4453_v15 = vpop.permute.xlu1 %2054  ;;  %v4458_v48 = vpop.permute.xlu0 %2046 }
 0x22c   : > { %v2057_v54 = vadd.f32 %v4453_v15, %v2025_v17  ;;  %v2049_v9 = vadd.f32 %v4458_v48, %v2021_v42  ;;  %v2173_v15 = vstv %s4517_s21  ;;  %v2178_v48 = vmul.f32 %v4337_v24, %v2177_v28 }
 0x22d   : > { %v2174_v58 = vmul.f32 %v4337_v24, %v2173_v15  ;;  %v2274_v17 = vstv %s2755_s4 }
 0x22f   : > { %v4465_v63 = vpop.permute.xlu1 %2070  ;;  %v2063_v3 = vpop.permute.xlu0 %2062 }
 0x230   : > { %v2073_v50 = vadd.f32 %v4465_v63, %v2041_v46  ;;  %v2065_v27 = vadd.f32 %v2063_v3, %v2033_v52  ;;  %v2105_v3 = vmul.f32 %v4281_v11, %v2104_v21  ;;  %v2181_v11 = vstv %s4528_s1 }
 0x231   : > { %v2182_v23 = vmul.f32 %v4337_v24, %v2181_v11 }
 0x232   : > { %v2098_v47 = vadd.f32 %v2097_v60, %v2073_v50  ;;  %v2094_v2 = vadd.f32 %v2093_v29, %v2065_v27 }
 0x233   : > { %v2087_v20 = vpop.permute.xlu1 %2086  ;;  %v2079_v45 = vpop.permute.xlu0 %2078 }
 0x234   : > { %v2089_v63 = vadd.f32 %v2087_v20, %v2057_v54  ;;  %v2081_v32 = vadd.f32 %v2079_v45, %v2049_v9 }
 0x236   : > { %v2106_v36 = vadd.f32 %v2105_v3, %v2089_v63  ;;  %v2102_v20 = vadd.f32 %v2101_v49, %v2081_v32 }
 0x237   : > { %v2120_v14 = vpop.permute.xlu1 %2119  ;;  %v2112_v56 = vpop.permute.xlu0 %2111 }
 0x238   : > { %v2122_v43 = vadd.f32 %v2120_v14, %v2098_v47  ;;  %v2114_v51 = vadd.f32 %v2112_v56, %v2094_v2  ;;  %v2186_v56 = vmul.f32 %v4337_v24, %v2185_v5 }
 0x23b   : > { %v2136_v41 = vpop.permute.xlu1 %2135  ;;  %v2128_v25 = vpop.permute.xlu0 %2127 }
 0x23c   : > { %v2138_v1 = vadd.f32 %v2136_v41, %v2106_v36  ;;  %v2130_v6 = vadd.f32 %v2128_v25, %v2102_v20 }
 0x23f   : > { %v2152_v19 = vpop.permute.xlu1 %2151  ;;  %v2144_v39 = vpop.permute.xlu0 %2143 }
 0x240   : > { %v2154_v35 = vadd.f32 %v2152_v19, %v2122_v43  ;;  %v2146_v53 = vadd.f32 %v2144_v39, %v2114_v51 }
 0x242   : > { %v2179_v55 = vadd.f32 %v2178_v48, %v2154_v35  ;;  %v2175_v38 = vadd.f32 %v2174_v58, %v2146_v53 }
 0x243   : > { %v2168_v30 = vpop.permute.xlu1 %2167  ;;  %v2160_v31 = vpop.permute.xlu0 %2159 }
 0x244   : > { %v2170_v14 = vadd.f32 %v2168_v30, %v2138_v1  ;;  %v2162_v59 = vadd.f32 %v2160_v31, %v2130_v6 }
 0x246   : > { %v2187_v8 = vadd.f32 %v2186_v56, %v2170_v14  ;;  %v2183_v34 = vadd.f32 %v2182_v23, %v2162_v59 }
 0x247   : > { %v2201_v37 = vpop.permute.xlu1 %2200  ;;  %v2193_v57 = vpop.permute.xlu0 %2192 }
 0x248   : > { %v2203_v7 = vadd.f32 %v2201_v37, %v2179_v55  ;;  %v2195_v0 = vadd.f32 %v2193_v57, %v2175_v38 }
 0x24b   : > { %v2217_v45 = vpop.permute.xlu1 %2216  ;;  %v2209_v26 = vpop.permute.xlu0 %2208 }
 0x24c   : > { %v2219_v40 = vadd.f32 %v2217_v45, %v2187_v8  ;;  %v2211_v16 = vadd.f32 %v2209_v26, %v2183_v34 }
 0x24f   : > { %v2233_v12 = vpop.permute.xlu1 %2232  ;;  %v2225_v33 = vpop.permute.xlu0 %2224 }
 0x250   : > { %v2235_v41 = vadd.f32 %v2233_v12, %v2203_v7  ;;  %v2227_v61 = vadd.f32 %v2225_v33, %v2195_v0 }
 0x252   : > { %v2264_v18 = vadd.f32 %v2263_v44, %v2235_v41  ;;  %v2254_v46 = vadd.f32 %v2253_v10, %v2227_v61 }
 0x253   : > { %v2249_v25 = vpop.permute.xlu1 %2248  ;;  %v2241_v4 = vpop.permute.xlu0 %2240 }
 0x254   : > { %v2251_v24 = vadd.f32 %v2249_v25, %v2219_v40  ;;  %v2243_v22 = vadd.f32 %v2241_v4, %v2211_v16 }
 0x256   : > { %v2286_v60 = vadd.f32 %v2285_v62, %v2251_v24  ;;  %v2275_v27 = vadd.f32 %v2274_v17, %v2243_v22 }
 0x257   : > { %v2268_v19 = vpop.permute.xlu1 %2267  ;;  %v2257_v52 = vpop.permute.xlu0 %2256 }
 0x258   : > { %v2270_v39 = vadd.f32 %v2268_v19, %v2264_v18  ;;  %v2259_v50 = vadd.f32 %v2257_v52, %v2254_v46 }
 0x25a   : > { %2754 = vst.msk [vmem:[%s4100_s18 + $0x28] sm:$0xff] %vm1241_vm0, %v2270_v39  ;;  %2751 = vst.msk [vmem:[%s4100_s18 + $0x20] sm:$0xff] %vm1241_vm0, %v2259_v50 }
 0x25b   : > { %v2290_v42 = vpop.permute.xlu1 %2289  ;;  %v2279_v21 = vpop.permute.xlu0 %2278 }
 0x25c   : > { %v2292_v29 = vadd.f32 %v2290_v42, %v2286_v60  ;;  %v2281_v30 = vadd.f32 %v2279_v21, %v2275_v27 }
 0x25e   : > { %2760 = vst.msk [vmem:[%s4100_s18 + $0x38] sm:$0xff] %vm1241_vm0, %v2292_v29  ;;  %2757 = vst.msk [vmem:[%s4100_s18 + $0x30] sm:$0xff] %vm1241_vm0, %v2281_v30 }
 0x25f   : > { %2912 = shalt.err (!%p2909_p2)
}
 0x260   : > { %s2913_s18 = scalar_lea.hbm %s4552_s9, 1024  ;;  %s2917_s1 = scalar_lea.hbm %s4608_s3, 2048 }
 0x261   : > { %p2914_p3 = scmp.ne.s32.totalorder %s4552_s9, %s2913_s18  ;;  %p2918_p12 = scmp.lt.u32.totalorder %s4552_s9, %s4608_s3 }
 0x262   : > { %p2919_p4 = scmp.lt.u32.totalorder %s2917_s1, %s2913_s18  ;;  %p2921_p8 = scmp.lt.u32.totalorder %s2913_s18, %s4552_s9 }
 0x263   : > { %p2915_p7 = pnand %p2914_p3, %p3082_p9 }
 0x264   : > { %p2920_p5 = por %p2919_p4, %p2918_p12 }
 0x265   : > { %p2916_p10 = pneg %p2915_p7 }
 0x266   : > { %p2922_p0 = por %p2921_p8, %p2920_p5 }
 0x268   : > { %p2923_p1 = pnand %p2922_p0, %p2916_p10 }
 0x26a   : > { %2926 = shalt.err (!%p2923_p1)
}
 0x26b   : > { %s3002_s29 = smov 128   ;;  %s3003_s4 = smov 256  }
 0x26c   : > { %s3004_s6 = smov 8  }
 0x26d   : > { %2783 = dma.vmem_to_hbm [thread:$0]  (%p3082_p9), %s4545_s25, 1024, %s4552_s9, %s2296_s15, %s3002_s29, %s3003_s4, %s3004_s6  }
 0x26e PF: > { %s2326_s10 = sand.u32 1, %s2969_s12   ;;  %p2793_p6 = pnand %p2424_p13, %p3089_p11 }
 0x26f   : > { %s2327_s11 = scalar_lea.sflag [#allocation4], %s2326_s10 }
 0x270   : > { %2964 = dma.done.wait (!%p2793_p6), %s2327_s11, 1024  }
 0x271   : > { %2966 = vsyncadd (!%p2793_p6), %s2327_s11, 4294966272  ;;  %s21_s17 = sadd.s32 1, %s2989_s17   ;;  %s4618_s12 = smov %s2973_s13 }
 0x272   : > { %p18_p2 = scmp.ge.s32.totalorder %s21_s17, 4   ;;  %s4619_s13 = smov %s2977_s14 }
 0x273   : > { %s4620_s14 = smov %s3087_s27  ;;  %s4621_s15 = smov %s2985_s16 }
 0x274   : > { %s4622_s16 = smov %s4624_s20  ;;  %20 = sbr.rel (!%p18_p2) target bundleno = 10 (0xa), region = 105 }
 0x27b   :  { %2332 = vsyncpa [#allocation3], 1 }
 0x27c   :  { %2334 = vsyncpa [#allocation3 + $0x1], 1 }
 0x27d   :  { %2335 = vsyncpa [#allocation4], 1 }
 0x27e   :  { %2337 = vsyncpa [#allocation4 + $0x1], 1 }
 0x27f   :  { %2338 = vsyncpa [#allocation5], 1 }
 0x280   :  { %2340 = vsyncpa [#allocation5 + $0x1], 1 }
 0x281   :  { %2341 = vsyncpa [#allocation8], 1 }

</bundles_post_ra>
